<compile_context>
chip_gen: v7x
topology: tpu7x:2x2x1
jax: 0.10.0
libtpu: 0.0.40
codegen_flags: <defaults>
</compile_context>

<pallas_src>
import functools

import jax
import jax.numpy as jnp
from jax.experimental import pallas as pl
from jax.experimental.pallas import tpu as pltpu

F32 = jnp.float32
BF16 = jnp.bfloat16

DK = 40   # attention key/query channels
DV = 4    # attention value channels
NH = 4    # attention heads


# ----------------------------------------------------------------------------
# Kernel builder: whole forward pass for one batch tile (bt samples).
# ----------------------------------------------------------------------------
def _make_forward_kernel(*, num_blocks, bt, P, cin, out_ch, h1, dk, dv, nh,
                         conservative):
    co_c = out_ch - dv
    dkh, dvh = dk // nh, dv // nh
    MT = bt * P
    f32 = jnp.float32

    def kernel(*refs):
        x_ref = refs[0]
        blocks = [refs[1 + 4 * i: 5 + 4 * i] for i in range(num_blocks)]
        (w1_ref, b1_ref, w2_ref, b2_ref, w3_ref,
         b3_ref) = refs[1 + 4 * num_blocks: 7 + 4 * num_blocks]
        o_ref = refs[7 + 4 * num_blocks]

        # ---- layout constants hoisted once per grid step --------------------
        pos = jax.lax.broadcasted_iota(jnp.int32, (MT, 1), 0) % P
        not_first = (pos != 0).astype(f32)        # kills rows wrapped from p=-1
        not_last = (pos != P - 1).astype(f32)     # kills rows wrapped from p=P
        lane = jax.lax.broadcasted_iota(jnp.int32, (1, out_ch), 1)
        conv_mask = (lane < co_c).astype(f32)     # 1 on conv cols, 0 on attn cols

        def attention(h, wa, ba):
            """Multi-head attention over positions.  Returns the (MT, out_ch)
            attention-branch contribution (zeros on conv columns, projection
            bias included) so no lane concat is ever needed."""
            qkv = h[:, co_c:].astype(BF16)        # single bf16 cast of q|k|v
            contrib = ba                           # (1, out_ch), broadcasts
            for hh in range(nh):
                q3 = qkv[:, hh * dkh:(hh + 1) * dkh].reshape(bt, P, dkh)
                k3 = qkv[:, dk + hh * dkh:
                         dk + (hh + 1) * dkh].reshape(bt, P, dkh)
                v3 = qkv[:, 2 * dk + hh * dvh:
                         2 * dk + (hh + 1) * dvh].reshape(bt, P, dvh)
                logits = jnp.einsum("bqd,bkd->bqk", q3, k3,
                                    preferred_element_type=f32)    # (bt,P,P)
                m = jnp.max(logits, axis=-1, keepdims=True)
                e = jnp.exp(logits - m)
                pr = e * pl.reciprocal(jnp.sum(e, axis=-1, keepdims=True),
                                       approx=True)
                oh = jnp.einsum("bqk,bkv->bqv", pr.astype(BF16), v3,
                                preferred_element_type=f32).reshape(MT, dvh)
                for j in range(dvh):
                    # scatter the head output straight into its output lanes
                    # via the zero-padded projection row (no lane concat).
                    row = hh * dvh + j
                    contrib = contrib + oh[:, j:j + 1] * wa[row:row + 1, :]
            return contrib

        # ---- block 0: 1x1 augmented conv + folded BN0 + relu ----------------
        w, b, wa, ba = (r[...] for r in blocks[0])
        x_bf = x_ref[...].reshape(MT, cin)                        # already bf16
        h = jnp.dot(x_bf, w, preferred_element_type=f32) + b
        act = jnp.maximum(h[:, :out_ch] * conv_mask + attention(h, wa, ba), 0.0)
        shortcut = act

        # ---- residual 3-tap augmented-conv blocks ---------------------------
        for blk in blocks[1:]:
            w, b, wa, ba = (r[...] for r in blk)
            if conservative:
                zrow = jnp.zeros((1, out_ch), f32)
                a_prev_f = jnp.concatenate([zrow, act[:MT - 1, :]], axis=0)
                a_next_f = jnp.concatenate([act[1:, :], zrow], axis=0)
            else:
                a_prev_f = pltpu.roll(act, shift=1, axis=0)
                a_next_f = pltpu.roll(act, shift=MT - 1, axis=0)
            a_prev = (a_prev_f * not_first).astype(BF16)
            a_next = (a_next_f * not_last).astype(BF16)
            a_mid = act.astype(BF16)
            h = (jnp.dot(a_prev, w[0], preferred_element_type=f32)
                 + jnp.dot(a_mid, w[1], preferred_element_type=f32)
                 + jnp.dot(a_next, w[2], preferred_element_type=f32)) + b
            act = (jnp.maximum(h[:, :out_ch] * conv_mask
                               + attention(h, wa, ba), 0.0) + shortcut)

        # ---- fully-connected head (BN5/BN6 folded) --------------------------
        if conservative:
            act3 = act.reshape(bt, P, out_ch).astype(BF16)
            w1 = w1_ref[...]                                       # (P, C, H1)
            acc = jnp.zeros((bt, h1), f32)
            for p in range(P):
                acc = acc + jnp.dot(act3[:, p, :], w1[p],
                                    preferred_element_type=f32)
            hid = jnp.maximum(acc + b1_ref[...], 0.0)
        else:
            feat = act.reshape(bt, P * out_ch).astype(BF16)        # torch order
            w1 = w1_ref[...].reshape(P * out_ch, h1)               # major merge
            hid = jnp.maximum(jnp.dot(feat, w1, preferred_element_type=f32)
                              + b1_ref[...], 0.0)
        hid = jnp.maximum(jnp.dot(hid.astype(BF16), w2_ref[...],
                                  preferred_element_type=f32) + b2_ref[...], 0.0)
        logit = jnp.dot(hid.astype(BF16), w3_ref[...],
                        preferred_element_type=f32) + b3_ref[...]
        sig = 1.0 / (1.0 + jnp.exp(-logit))                        # (bt, 1)
        if conservative:
            o_ref[...] = sig
        else:
            o_ref[...] = sig.reshape(1, 1, bt)                     # lane-dense

    return kernel


# ----------------------------------------------------------------------------
# Tiling configuration
# ----------------------------------------------------------------------------
def _tile_config(block_batch):
    """Generation-aware batch-tile cap and scoped-VMEM limit."""
    vmem_phys = 0
    try:
        vmem_phys = int(getattr(pltpu.get_tpu_info(),
                                "vmem_capacity_bytes", 0) or 0)
    except Exception:
        vmem_phys = 0
    if vmem_phys > 96 * 1024 * 1024:          # v5e / v6e : 128 MiB physical
        cap, vmem_limit = 1024, 100 << 20
    else:                                      # v7x (64 MiB) or unknown
        cap, vmem_limit = 512, 48 << 20
    if block_batch is not None:
        cap = block_batch
    return cap, vmem_limit


def _pick_batch_tile(B, cap):
    bt = min(B, cap)
    if B > 64:                       # keep >= 2 grid steps for dual-TC (v7x)
        bt = min(bt, -(-B // 2))
    if bt >= 8:
        bt -= bt % 8                 # sublane-friendly tile
    return max(bt, 1)


# ----------------------------------------------------------------------------
# Wrapper: one pallas_call for the whole forward pass, grid over batch tiles.
# ----------------------------------------------------------------------------
def forward(params, x, num_inputs, word_size, block_batch=None,
            conservative_layout=False):
    B = x.shape[0]
    P = word_size
    dk, dv, nh = DK, DV, NH

    # NCHW (B, C, P, 1) flatten -> channels-last (B, P, C), bf16 to halve DMA.
    x = jnp.transpose(x.reshape(B, num_inputs, P), (0, 2, 1)).astype(BF16)

    blk0 = params["blk0"]
    layers = params["layers"]
    ctot = blk0["b"].shape[1]
    co_c = ctot - (2 * dk + dv)
    out_ch = co_c + dv
    h1 = params["b1"].shape[1]

    cap, vmem_limit = _tile_config(block_batch)
    bt = _pick_batch_tile(B, cap)
    G = -(-B // bt)
    Bp = G * bt
    if Bp != B:                      # pad the batch instead of one giant tile
        x = jnp.concatenate(
            [x, jnp.zeros((Bp - B, P, num_inputs), x.dtype)], axis=0)

    kernel = _make_forward_kernel(
        num_blocks=len(layers) + 1, bt=bt, P=P, cin=num_inputs,
        out_ch=out_ch, h1=h1, dk=dk, dv=dv, nh=nh,
        conservative=conservative_layout)

    weight_args = [blk0["w"], blk0["b"], blk0["wa"], blk0["ba"]]
    for lp in layers:
        weight_args += [lp["w"], lp["b"], lp["wa"], lp["ba"]]
    weight_args += [params["w1"], params["b1"], params["w2"], params["b2"],
                    params["w3"], params["b3"]]

    def full_spec(a):
        nd = a.ndim
        return pl.BlockSpec(a.shape, lambda i, _nd=nd: (0,) * _nd)

    in_specs = [pl.BlockSpec((bt, P, num_inputs), lambda i: (i, 0, 0))]
    in_specs += [full_spec(a) for a in weight_args]

    if conservative_layout:
        out_shape = jax.ShapeDtypeStruct((Bp, 1), F32)
        out_spec = pl.BlockSpec((bt, 1), lambda i: (i, 0))
    else:
        out_shape = jax.ShapeDtypeStruct((G, 1, bt), F32)
        out_spec = pl.BlockSpec((1, 1, bt), lambda i: (i, 0, 0))

    out = pl.pallas_call(
        kernel,
        out_shape=out_shape,
        grid=(G,),
        in_specs=in_specs,
        out_specs=out_spec,
        compiler_params=pltpu.CompilerParams(
            dimension_semantics=("parallel",),
            vmem_limit_bytes=vmem_limit),
    )(x, *weight_args)

    if conservative_layout:
        return out[:B]
    return out.reshape(Bp, 1)[:B]


# ----------------------------------------------------------------------------
# Parameter initialization (PyTorch-layout raw params) + BN-folding prep
# ----------------------------------------------------------------------------
def init_params(key, num_inputs, word_size, out_ch, num_layers, hidden1,
                dk=DK, dv=DV, nh=NH):
    """Random parameters in (transposed) PyTorch layout; BN inference stats."""
    keys = iter(jax.random.split(key, 128))

    def nrm(shape, s=0.1):
        return s * jax.random.normal(next(keys), shape, dtype=F32)

    def bn_params(C, eps=0.01):
        gamma = 1.0 + nrm((C,), 0.05)
        beta = nrm((C,), 0.05)
        mean = jnp.zeros((C,), F32)    # running stats (inference mode)
        var = jnp.ones((C,), F32)
        s = gamma / jnp.sqrt(var + eps)
        t = beta - mean * s
        return s, t

    p = {}
    cw = nrm((out_ch - dv, num_inputs, 1, 1))
    qw = nrm((2 * dk + dv, num_inputs, 1, 1))
    aw = nrm((dv, dv, 1, 1))
    p["conv0"] = dict(
        conv_w=cw[:, :, 0, 0].T, conv_b=nrm((out_ch - dv,)),
        qkv_w=qw[:, :, 0, 0].T, qkv_b=nrm((2 * dk + dv,)),
        attn_w=aw[:, :, 0, 0].T, attn_b=nrm((dv,)))
    p["bn0_s"], p["bn0_t"] = bn_params(out_ch)

    layers = []
    for _ in range(num_layers - 1):
        cw = nrm((out_ch - dv, out_ch, 3, 3))
        qw = nrm((2 * dk + dv, out_ch, 3, 3))
        aw = nrm((dv, dv, 1, 1))
        # W == 1 with zero padding => only the centre kernel column matters.
        conv = dict(
            conv_w3=jnp.transpose(cw[:, :, :, 1], (2, 1, 0)),   # (3, Cin, Cout)
            conv_b=nrm((out_ch - dv,)),
            qkv_w3=jnp.transpose(qw[:, :, :, 1], (2, 1, 0)),
            qkv_b=nrm((2 * dk + dv,)),
            attn_w=aw[:, :, 0, 0].T, attn_b=nrm((dv,)))
        s, t = bn_params(out_ch)
        layers.append(dict(conv=conv, bn_s=s, bn_t=t))
    p["layers"] = layers

    p["fc1_w"] = nrm((out_ch * word_size, hidden1))
    p["fc1_b"] = nrm((hidden1,))
    p["bn5_s"], p["bn5_t"] = bn_params(hidden1)
    p["fc2_w"] = nrm((hidden1, hidden1))
    p["fc2_b"] = nrm((hidden1,))
    p["bn6_s"], p["bn6_t"] = bn_params(hidden1)
    p["fc3_w"] = nrm((hidden1, 1))
    p["fc3_b"] = nrm((1,))
    return p


def prepare_params(raw, word_size, dk=DK, dv=DV, nh=NH):
    """Fold inference-mode BN + per-head q-scale into the fused weights, pad
    the attn-out projection to full output width (kills lane concats), reorder
    fc1 to (position, channel, hidden), cast matmul weights to bfloat16."""
    out_ch = raw["bn0_s"].shape[0]
    co_c = out_ch - dv
    P = word_size
    dkh = dk // nh
    qscale = dkh ** -0.5
    qkv_scale = jnp.concatenate([jnp.full((dk,), qscale, F32),
                                 jnp.ones((dk + dv,), F32)])

    def fold_block(conv, bn_s, bn_t, ksize):
        s_c, t_c = bn_s[:co_c], bn_t[:co_c]
        s_a, t_a = bn_s[co_c:], bn_t[co_c:]
        col_scale = jnp.concatenate([s_c, qkv_scale])
        if ksize == 1:
            w = jnp.concatenate([conv["conv_w"], conv["qkv_w"]],
                                axis=1) * col_scale[None, :]
        else:
            w = jnp.concatenate([conv["conv_w3"], conv["qkv_w3"]],
                                axis=2) * col_scale[None, None, :]
        b = jnp.concatenate([conv["conv_b"] * s_c + t_c,
                             conv["qkv_b"] * qkv_scale])
        wa = jnp.zeros((dv, out_ch), F32).at[:, co_c:].set(
            conv["attn_w"] * s_a[None, :])
        ba = jnp.zeros((1, out_ch), F32).at[0, co_c:].set(
            conv["attn_b"] * s_a + t_a)
        return dict(w=w.astype(BF16), b=b.reshape(1, -1).astype(F32),
                    wa=wa, ba=ba)

    p = {"blk0": fold_block(raw["conv0"], raw["bn0_s"], raw["bn0_t"], 1),
         "layers": [fold_block(l["conv"], l["bn_s"], l["bn_t"], 3)
                    for l in raw["layers"]]}

    h1 = raw["fc1_b"].shape[0]
    # torch flatten index = c*P + p; kernel feature index = p*out_ch + c
    w1 = (raw["fc1_w"] * raw["bn5_s"][None, :]).reshape(out_ch, P, h1)
    p["w1"] = jnp.transpose(w1, (1, 0, 2)).astype(BF16)            # (P, C, H1)
    p["b1"] = (raw["fc1_b"] * raw["bn5_s"] + raw["bn5_t"]).reshape(1, -1)
    p["w2"] = (raw["fc2_w"] * raw["bn6_s"][None, :]).astype(BF16)
    p["b2"] = (raw["fc2_b"] * raw["bn6_s"] + raw["bn6_t"]).reshape(1, -1)
    p["w3"] = raw["fc3_w"].astype(BF16)
    p["b3"] = raw["fc3_b"].reshape(1, -1)
    return p


# ----------------------------------------------------------------------------
# Pure-JAX (f32) reference of the same forward pass, for correctness checking
# ----------------------------------------------------------------------------
def reference_forward(raw, x, num_inputs, word_size, dk=DK, dv=DV, nh=NH):
    B = x.shape[0]
    P = word_size
    dkh, dvh = dk // nh, dv // nh
    xc = jnp.transpose(x.reshape(B, num_inputs, P), (0, 2, 1))     # (B, P, C)

    def aug(xin, conv, ksize):
        if ksize == 1:
            c_out = jnp.einsum("bpc,cd->bpd", xin, conv["conv_w"]) + conv["conv_b"]
            qkv = jnp.einsum("bpc,cd->bpd", xin, conv["qkv_w"]) + conv["qkv_b"]
        else:
            xp = jnp.pad(xin, ((0, 0), (1, 1), (0, 0)))

            def tap3(w3, bias):
                return (jnp.einsum("bpc,cd->bpd", xp[:, 0:P], w3[0])
                        + jnp.einsum("bpc,cd->bpd", xp[:, 1:P + 1], w3[1])
                        + jnp.einsum("bpc,cd->bpd", xp[:, 2:P + 2], w3[2])
                        + bias)
            c_out = tap3(conv["conv_w3"], conv["conv_b"])
            qkv = tap3(conv["qkv_w3"], conv["qkv_b"])
        q, k, v = qkv[..., :dk], qkv[..., dk:2 * dk], qkv[..., 2 * dk:]
        heads = []
        for hh in range(nh):
            qh = q[..., hh * dkh:(hh + 1) * dkh] * dkh ** -0.5
            kh = k[..., hh * dkh:(hh + 1) * dkh]
            vh = v[..., hh * dvh:(hh + 1) * dvh]
            pw = jax.nn.softmax(jnp.einsum("bqd,bkd->bqk", qh, kh), axis=-1)
            heads.append(jnp.einsum("bqk,bkv->bqv", pw, vh))
        attn = jnp.concatenate(heads, axis=-1)
        attn = jnp.einsum("bpc,cd->bpd", attn, conv["attn_w"]) + conv["attn_b"]
        return jnp.concatenate([c_out, attn], axis=-1)

    def bn_relu(y, s, t):
        return jnp.maximum(y * s + t, 0.0)

    y = bn_relu(aug(xc, raw["conv0"], 1), raw["bn0_s"], raw["bn0_t"])
    shortcut = y
    for lp in raw["layers"]:
        y = bn_relu(aug(y, lp["conv"], 3), lp["bn_s"], lp["bn_t"]) + shortcut
    feats = jnp.transpose(y, (0, 2, 1)).reshape(B, -1)
    h = jnp.maximum((feats @ raw["fc1_w"] + raw["fc1_b"]) * raw["bn5_s"]
                    + raw["bn5_t"], 0.0)
    h = jnp.maximum((h @ raw["fc2_w"] + raw["fc2_b"]) * raw["bn6_s"]
                    + raw["bn6_t"], 0.0)
    return jax.nn.sigmoid(h @ raw["fc3_w"] + raw["fc3_b"])


if __name__ == "__main__":
    WORD_SIZE = 16        # args.word_size
    NUM_INPUTS = 4        # len(args.inputs_type)
    OUT_CH = 16           # args.out_channel0 == args.out_channel1
    NUM_LAYERS = 2        # args.numLayers  -> one residual block
    HIDDEN1 = 32          # args.hidden1

    key = jax.random.PRNGKey(0)
    kx, kx2, kp = jax.random.split(key, 3)

    raw = init_params(kp, NUM_INPUTS, WORD_SIZE, OUT_CH, NUM_LAYERS, HIDDEN1)
    params = prepare_params(raw, WORD_SIZE)

    x = jax.random.normal(kx, (2, NUM_INPUTS * WORD_SIZE), dtype=F32)
    x2 = jax.random.normal(kx2, (20, NUM_INPUTS * WORD_SIZE), dtype=F32)
    ref = reference_forward(raw, x, NUM_INPUTS, WORD_SIZE)
    ref2 = reference_forward(raw, x2, NUM_INPUTS, WORD_SIZE)

    def run_checks(conservative_layout):
        fwd = jax.jit(functools.partial(
            forward, num_inputs=NUM_INPUTS, word_size=WORD_SIZE,
            conservative_layout=conservative_layout))
        out = jax.block_until_ready(fwd(params, x))
        assert out.shape == (2, 1)
        assert bool(jnp.all(jnp.isfinite(out)))
        assert bool(jnp.all((out >= 0.0) & (out <= 1.0)))
        assert float(jnp.max(jnp.abs(out - ref))) < 5e-2

        # multi-tile + batch-padding path (grid of 3 steps, 4 padded rows)
        fwd_tiled = jax.jit(functools.partial(
            forward, num_inputs=NUM_INPUTS, word_size=WORD_SIZE,
            block_batch=8, conservative_layout=conservative_layout))
        out2 = jax.block_until_ready(fwd_tiled(params, x2))
        assert out2.shape == (20, 1)
        assert float(jnp.max(jnp.abs(out2 - ref2))) < 5e-2

    try:
        run_checks(conservative_layout=False)
    except Exception:
        # TODO(synk): pltpu.roll / cross-dim reshape support varies across
        # Mosaic versions; fall back to layout-conservative variants.
        run_checks(conservative_layout=True)

    print("KERNEL_OK")
</pallas_src>

<mosaic_0001>
module attributes {stable_mosaic.version = 11 : i64} {
  func.func @kernel(%arg0: i32, %arg1: memref<2x16x4xbf16, #tpu.memory_space<vmem>>, %arg2: memref<4x96xbf16, #tpu.memory_space<vmem>>, %arg3: memref<1x96xf32, #tpu.memory_space<vmem>>, %arg4: memref<4x16xf32, #tpu.memory_space<vmem>>, %arg5: memref<1x16xf32, #tpu.memory_space<vmem>>, %arg6: memref<3x16x96xbf16, #tpu.memory_space<vmem>>, %arg7: memref<1x96xf32, #tpu.memory_space<vmem>>, %arg8: memref<4x16xf32, #tpu.memory_space<vmem>>, %arg9: memref<1x16xf32, #tpu.memory_space<vmem>>, %arg10: memref<16x16x32xbf16, #tpu.memory_space<vmem>>, %arg11: memref<1x32xf32, #tpu.memory_space<vmem>>, %arg12: memref<32x32xbf16, #tpu.memory_space<vmem>>, %arg13: memref<1x32xf32, #tpu.memory_space<vmem>>, %arg14: memref<32x1xbf16, #tpu.memory_space<vmem>>, %arg15: memref<1x1xf32, #tpu.memory_space<vmem>>, %arg16: memref<1x1x2xf32, #tpu.memory_space<vmem>>) attributes {dimension_semantics = [#tpu.dimension_semantics<parallel>], iteration_bounds = array<i64: 1>, scalar_prefetch = 0 : i64, scratch_operands = 0 : i64, tpu.core_type = #tpu.core_type<tc>, window_params = [{transform_indices = @transform_0, window_bounds = array<i64: 2, 16, 4>}, {pipeline_mode = #tpu.pipeline_mode<synchronous>, transform_indices = @transform_1, window_bounds = array<i64: 4, 96>}, {pipeline_mode = #tpu.pipeline_mode<synchronous>, transform_indices = @transform_2, window_bounds = array<i64: 1, 96>}, {pipeline_mode = #tpu.pipeline_mode<synchronous>, transform_indices = @transform_3, window_bounds = array<i64: 4, 16>}, {pipeline_mode = #tpu.pipeline_mode<synchronous>, transform_indices = @transform_4, window_bounds = array<i64: 1, 16>}, {pipeline_mode = #tpu.pipeline_mode<synchronous>, transform_indices = @transform_5, window_bounds = array<i64: 3, 16, 96>}, {pipeline_mode = #tpu.pipeline_mode<synchronous>, transform_indices = @transform_6, window_bounds = array<i64: 1, 96>}, {pipeline_mode = #tpu.pipeline_mode<synchronous>, transform_indices = @transform_7, window_bounds = array<i64: 4, 16>}, {pipeline_mode = #tpu.pipeline_mode<synchronous>, transform_indices = @transform_8, window_bounds = array<i64: 1, 16>}, {pipeline_mode = #tpu.pipeline_mode<synchronous>, transform_indices = @transform_9, window_bounds = array<i64: 16, 16, 32>}, {pipeline_mode = #tpu.pipeline_mode<synchronous>, transform_indices = @transform_10, window_bounds = array<i64: 1, 32>}, {pipeline_mode = #tpu.pipeline_mode<synchronous>, transform_indices = @transform_11, window_bounds = array<i64: 32, 32>}, {pipeline_mode = #tpu.pipeline_mode<synchronous>, transform_indices = @transform_12, window_bounds = array<i64: 1, 32>}, {pipeline_mode = #tpu.pipeline_mode<synchronous>, transform_indices = @transform_13, window_bounds = array<i64: 32, 1>}, {pipeline_mode = #tpu.pipeline_mode<synchronous>, transform_indices = @transform_14, window_bounds = array<i64: 1, 1>}, {transform_indices = @transform_15, window_bounds = array<i64: 1, 1, 2>}]} {
    %0 = tpu.iota {dimensions = array<i32: 0>} : vector<32x1xi32>
    %c16_i32 = arith.constant 16 : i32
    %c0_i32 = arith.constant 0 : i32
    %1 = arith.cmpi eq, %c16_i32, %c0_i32 : i32
    %c1_i32 = arith.constant 1 : i32
    %2 = arith.select %1, %c1_i32, %c16_i32 : i32
    %3 = vector.broadcast %2 : i32 to vector<32x1xi32>
    %4 = arith.remsi %0, %3 : vector<32x1xi32>
    %c0_i32_0 = arith.constant 0 : i32
    %5 = vector.broadcast %c0_i32_0 : i32 to vector<32x1xi32>
    %6 = arith.cmpi ne, %4, %5 : vector<32x1xi32>
    %c0_i32_1 = arith.constant 0 : i32
    %7 = vector.broadcast %c0_i32_1 : i32 to vector<32x1xi32>
    %8 = arith.cmpi slt, %4, %7 : vector<32x1xi32>
    %c0_i32_2 = arith.constant 0 : i32
    %9 = arith.cmpi slt, %2, %c0_i32_2 : i32
    %10 = vector.broadcast %9 : i1 to vector<32x1xi1>
    %11 = vector.broadcast %10 : vector<32x1xi1> to vector<32x1xi1>
    %12 = arith.xori %8, %11 : vector<32x1xi1>
    %13 = arith.andi %12, %6 : vector<32x1xi1>
    %14 = vector.broadcast %2 : i32 to vector<32x1xi32>
    %15 = arith.addi %4, %14 : vector<32x1xi32>
    %16 = arith.select %13, %15, %4 : vector<32x1xi1>, vector<32x1xi32>
    %c0_i32_3 = arith.constant 0 : i32
    %17 = vector.broadcast %c0_i32_3 : i32 to vector<32x1xi32>
    %18 = arith.cmpi ne, %16, %17 : vector<32x1xi32>
    %19 = arith.extui %18 : vector<32x1xi1> to vector<32x1xi32>
    %20 = arith.sitofp %19 : vector<32x1xi32> to vector<32x1xf32>
    %c15_i32 = arith.constant 15 : i32
    %21 = vector.broadcast %c15_i32 : i32 to vector<32x1xi32>
    %22 = arith.cmpi ne, %16, %21 : vector<32x1xi32>
    %23 = arith.extui %22 : vector<32x1xi1> to vector<32x1xi32>
    %24 = arith.sitofp %23 : vector<32x1xi32> to vector<32x1xf32>
    %25 = tpu.iota {dimensions = array<i32: 1>} : vector<1x16xi32>
    %c12_i32 = arith.constant 12 : i32
    %26 = vector.broadcast %c12_i32 : i32 to vector<1x16xi32>
    %27 = arith.cmpi slt, %25, %26 : vector<1x16xi32>
    %28 = arith.extui %27 : vector<1x16xi1> to vector<1x16xi32>
    %29 = arith.sitofp %28 : vector<1x16xi32> to vector<1x16xf32>
    %c0 = arith.constant 0 : index
    %c0_4 = arith.constant 0 : index
    %30 = vector.load %arg2[%c0, %c0_4] : memref<4x96xbf16, #tpu.memory_space<vmem>>, vector<4x96xbf16>
    %c0_5 = arith.constant 0 : index
    %c0_6 = arith.constant 0 : index
    %31 = vector.load %arg3[%c0_5, %c0_6] : memref<1x96xf32, #tpu.memory_space<vmem>>, vector<1x96xf32>
    %c0_7 = arith.constant 0 : index
    %c0_8 = arith.constant 0 : index
    %32 = vector.load %arg4[%c0_7, %c0_8] : memref<4x16xf32, #tpu.memory_space<vmem>>, vector<4x16xf32>
    %c0_9 = arith.constant 0 : index
    %c0_10 = arith.constant 0 : index
    %33 = vector.load %arg5[%c0_9, %c0_10] : memref<1x16xf32, #tpu.memory_space<vmem>>, vector<1x16xf32>
    %c0_11 = arith.constant 0 : index
    %c0_12 = arith.constant 0 : index
    %c0_13 = arith.constant 0 : index
    %34 = vector.load %arg1[%c0_11, %c0_12, %c0_13] : memref<2x16x4xbf16, #tpu.memory_space<vmem>>, vector<2x16x4xbf16>
    %35 = vector.shape_cast %34 : vector<2x16x4xbf16> to vector<32x4xbf16>
    %cst = arith.constant dense<0.000000e+00> : vector<32x96xf32>
    %36 = tpu.matmul %35, %30, %cst {dimension_numbers = #tpu.dot_dimension_numbers<[1], [0], [0], [1], [0, 0, 1, 1], [], []>} : vector<32x4xbf16>, vector<4x96xbf16>, vector<32x96xf32> -> vector<32x96xf32>
    %37 = vector.broadcast %31 : vector<1x96xf32> to vector<32x96xf32>
    %38 = arith.addf %36, %37 : vector<32x96xf32>
    %39 = vector.extract_strided_slice %38 {offsets = [0, 0], sizes = [32, 16], strides = [1, 1]} : vector<32x96xf32> to vector<32x16xf32>
    %40 = vector.broadcast %29 : vector<1x16xf32> to vector<32x16xf32>
    %41 = arith.mulf %39, %40 : vector<32x16xf32>
    %42 = vector.extract_strided_slice %38 {offsets = [0, 12], sizes = [32, 84], strides = [1, 1]} : vector<32x96xf32> to vector<32x84xf32>
    %43 = arith.truncf %42 : vector<32x84xf32> to vector<32x84xbf16>
    %44 = vector.extract_strided_slice %43 {offsets = [0, 0], sizes = [32, 10], strides = [1, 1]} : vector<32x84xbf16> to vector<32x10xbf16>
    %45 = vector.shape_cast %44 : vector<32x10xbf16> to vector<2x16x10xbf16>
    %46 = vector.extract_strided_slice %43 {offsets = [0, 40], sizes = [32, 10], strides = [1, 1]} : vector<32x84xbf16> to vector<32x10xbf16>
    %47 = vector.shape_cast %46 : vector<32x10xbf16> to vector<2x16x10xbf16>
    %48 = vector.extract_strided_slice %43 {offsets = [0, 80], sizes = [32, 1], strides = [1, 1]} : vector<32x84xbf16> to vector<32x1xbf16>
    %49 = vector.shape_cast %48 : vector<32x1xbf16> to vector<2x16x1xbf16>
    "tpu.trace_start"() <{level = 10 : i32, message = "bqd,bkd->bqk"}> : () -> ()
    %cst_14 = arith.constant dense<0.000000e+00> : vector<2x16x16xf32>
    %50 = tpu.matmul %45, %47, %cst_14 {dimension_numbers = #tpu.dot_dimension_numbers<[2], [2], [1], [1], [0, 0, 0, 1, 1, 1], [0], [0]>} : vector<2x16x10xbf16>, vector<2x16x10xbf16>, vector<2x16x16xf32> -> vector<2x16x16xf32>
    "tpu.trace_stop"() : () -> ()
    %cst_15 = arith.constant dense<0xFF800000> : vector<2x16xf32>
    %51 = vector.multi_reduction <maximumf>, %50, %cst_15 [2] : vector<2x16x16xf32> to vector<2x16xf32>
    %52 = vector.shape_cast %51 : vector<2x16xf32> to vector<2x16x1xf32>
    %53 = vector.broadcast %52 : vector<2x16x1xf32> to vector<2x16x16xf32>
    %54 = arith.subf %50, %53 : vector<2x16x16xf32>
    %55 = math.exp %54 : vector<2x16x16xf32>
    %cst_16 = arith.constant dense<0.000000e+00> : vector<2x16xf32>
    %56 = vector.multi_reduction <add>, %55, %cst_16 [2] : vector<2x16x16xf32> to vector<2x16xf32>
    %57 = vector.shape_cast %56 : vector<2x16xf32> to vector<2x16x1xf32>
    %58 = tpu.reciprocal %57 {approx = true} : vector<2x16x1xf32> -> vector<2x16x1xf32>
    %59 = vector.broadcast %58 : vector<2x16x1xf32> to vector<2x16x16xf32>
    %60 = arith.mulf %55, %59 : vector<2x16x16xf32>
    %61 = arith.truncf %60 : vector<2x16x16xf32> to vector<2x16x16xbf16>
    "tpu.trace_start"() <{level = 10 : i32, message = "bqk,bkv->bqv"}> : () -> ()
    %cst_17 = arith.constant dense<0.000000e+00> : vector<2x16x1xf32>
    %62 = tpu.matmul %61, %49, %cst_17 {dimension_numbers = #tpu.dot_dimension_numbers<[2], [1], [1], [2], [0, 0, 0, 1, 1, 2], [0], [0]>} : vector<2x16x16xbf16>, vector<2x16x1xbf16>, vector<2x16x1xf32> -> vector<2x16x1xf32>
    "tpu.trace_stop"() : () -> ()
    %63 = vector.shape_cast %62 : vector<2x16x1xf32> to vector<32x1xf32>
    %64 = vector.extract_strided_slice %32 {offsets = [0, 0], sizes = [1, 16], strides = [1, 1]} : vector<4x16xf32> to vector<1x16xf32>
    %65 = vector.broadcast %63 : vector<32x1xf32> to vector<32x16xf32>
    %66 = vector.broadcast %64 : vector<1x16xf32> to vector<32x16xf32>
    %67 = arith.mulf %65, %66 : vector<32x16xf32>
    %68 = vector.broadcast %33 : vector<1x16xf32> to vector<32x16xf32>
    %69 = arith.addf %68, %67 : vector<32x16xf32>
    %70 = vector.extract_strided_slice %43 {offsets = [0, 10], sizes = [32, 10], strides = [1, 1]} : vector<32x84xbf16> to vector<32x10xbf16>
    %71 = vector.shape_cast %70 : vector<32x10xbf16> to vector<2x16x10xbf16>
    %72 = vector.extract_strided_slice %43 {offsets = [0, 50], sizes = [32, 10], strides = [1, 1]} : vector<32x84xbf16> to vector<32x10xbf16>
    %73 = vector.shape_cast %72 : vector<32x10xbf16> to vector<2x16x10xbf16>
    %74 = vector.extract_strided_slice %43 {offsets = [0, 81], sizes = [32, 1], strides = [1, 1]} : vector<32x84xbf16> to vector<32x1xbf16>
    %75 = vector.shape_cast %74 : vector<32x1xbf16> to vector<2x16x1xbf16>
    "tpu.trace_start"() <{level = 10 : i32, message = "bqd,bkd->bqk"}> : () -> ()
    %cst_18 = arith.constant dense<0.000000e+00> : vector<2x16x16xf32>
    %76 = tpu.matmul %71, %73, %cst_18 {dimension_numbers = #tpu.dot_dimension_numbers<[2], [2], [1], [1], [0, 0, 0, 1, 1, 1], [0], [0]>} : vector<2x16x10xbf16>, vector<2x16x10xbf16>, vector<2x16x16xf32> -> vector<2x16x16xf32>
    "tpu.trace_stop"() : () -> ()
    %cst_19 = arith.constant dense<0xFF800000> : vector<2x16xf32>
    %77 = vector.multi_reduction <maximumf>, %76, %cst_19 [2] : vector<2x16x16xf32> to vector<2x16xf32>
    %78 = vector.shape_cast %77 : vector<2x16xf32> to vector<2x16x1xf32>
    %79 = vector.broadcast %78 : vector<2x16x1xf32> to vector<2x16x16xf32>
    %80 = arith.subf %76, %79 : vector<2x16x16xf32>
    %81 = math.exp %80 : vector<2x16x16xf32>
    %cst_20 = arith.constant dense<0.000000e+00> : vector<2x16xf32>
    %82 = vector.multi_reduction <add>, %81, %cst_20 [2] : vector<2x16x16xf32> to vector<2x16xf32>
    %83 = vector.shape_cast %82 : vector<2x16xf32> to vector<2x16x1xf32>
    %84 = tpu.reciprocal %83 {approx = true} : vector<2x16x1xf32> -> vector<2x16x1xf32>
    %85 = vector.broadcast %84 : vector<2x16x1xf32> to vector<2x16x16xf32>
    %86 = arith.mulf %81, %85 : vector<2x16x16xf32>
    %87 = arith.truncf %86 : vector<2x16x16xf32> to vector<2x16x16xbf16>
    "tpu.trace_start"() <{level = 10 : i32, message = "bqk,bkv->bqv"}> : () -> ()
    %cst_21 = arith.constant dense<0.000000e+00> : vector<2x16x1xf32>
    %88 = tpu.matmul %87, %75, %cst_21 {dimension_numbers = #tpu.dot_dimension_numbers<[2], [1], [1], [2], [0, 0, 0, 1, 1, 2], [0], [0]>} : vector<2x16x16xbf16>, vector<2x16x1xbf16>, vector<2x16x1xf32> -> vector<2x16x1xf32>
    "tpu.trace_stop"() : () -> ()
    %89 = vector.shape_cast %88 : vector<2x16x1xf32> to vector<32x1xf32>
    %90 = vector.extract_strided_slice %32 {offsets = [1, 0], sizes = [1, 16], strides = [1, 1]} : vector<4x16xf32> to vector<1x16xf32>
    %91 = vector.broadcast %89 : vector<32x1xf32> to vector<32x16xf32>
    %92 = vector.broadcast %90 : vector<1x16xf32> to vector<32x16xf32>
    %93 = arith.mulf %91, %92 : vector<32x16xf32>
    %94 = arith.addf %69, %93 : vector<32x16xf32>
    %95 = vector.extract_strided_slice %43 {offsets = [0, 20], sizes = [32, 10], strides = [1, 1]} : vector<32x84xbf16> to vector<32x10xbf16>
    %96 = vector.shape_cast %95 : vector<32x10xbf16> to vector<2x16x10xbf16>
    %97 = vector.extract_strided_slice %43 {offsets = [0, 60], sizes = [32, 10], strides = [1, 1]} : vector<32x84xbf16> to vector<32x10xbf16>
    %98 = vector.shape_cast %97 : vector<32x10xbf16> to vector<2x16x10xbf16>
    %99 = vector.extract_strided_slice %43 {offsets = [0, 82], sizes = [32, 1], strides = [1, 1]} : vector<32x84xbf16> to vector<32x1xbf16>
    %100 = vector.shape_cast %99 : vector<32x1xbf16> to vector<2x16x1xbf16>
    "tpu.trace_start"() <{level = 10 : i32, message = "bqd,bkd->bqk"}> : () -> ()
    %cst_22 = arith.constant dense<0.000000e+00> : vector<2x16x16xf32>
    %101 = tpu.matmul %96, %98, %cst_22 {dimension_numbers = #tpu.dot_dimension_numbers<[2], [2], [1], [1], [0, 0, 0, 1, 1, 1], [0], [0]>} : vector<2x16x10xbf16>, vector<2x16x10xbf16>, vector<2x16x16xf32> -> vector<2x16x16xf32>
    "tpu.trace_stop"() : () -> ()
    %cst_23 = arith.constant dense<0xFF800000> : vector<2x16xf32>
    %102 = vector.multi_reduction <maximumf>, %101, %cst_23 [2] : vector<2x16x16xf32> to vector<2x16xf32>
    %103 = vector.shape_cast %102 : vector<2x16xf32> to vector<2x16x1xf32>
    %104 = vector.broadcast %103 : vector<2x16x1xf32> to vector<2x16x16xf32>
    %105 = arith.subf %101, %104 : vector<2x16x16xf32>
    %106 = math.exp %105 : vector<2x16x16xf32>
    %cst_24 = arith.constant dense<0.000000e+00> : vector<2x16xf32>
    %107 = vector.multi_reduction <add>, %106, %cst_24 [2] : vector<2x16x16xf32> to vector<2x16xf32>
    %108 = vector.shape_cast %107 : vector<2x16xf32> to vector<2x16x1xf32>
    %109 = tpu.reciprocal %108 {approx = true} : vector<2x16x1xf32> -> vector<2x16x1xf32>
    %110 = vector.broadcast %109 : vector<2x16x1xf32> to vector<2x16x16xf32>
    %111 = arith.mulf %106, %110 : vector<2x16x16xf32>
    %112 = arith.truncf %111 : vector<2x16x16xf32> to vector<2x16x16xbf16>
    "tpu.trace_start"() <{level = 10 : i32, message = "bqk,bkv->bqv"}> : () -> ()
    %cst_25 = arith.constant dense<0.000000e+00> : vector<2x16x1xf32>
    %113 = tpu.matmul %112, %100, %cst_25 {dimension_numbers = #tpu.dot_dimension_numbers<[2], [1], [1], [2], [0, 0, 0, 1, 1, 2], [0], [0]>} : vector<2x16x16xbf16>, vector<2x16x1xbf16>, vector<2x16x1xf32> -> vector<2x16x1xf32>
    "tpu.trace_stop"() : () -> ()
    %114 = vector.shape_cast %113 : vector<2x16x1xf32> to vector<32x1xf32>
    %115 = vector.extract_strided_slice %32 {offsets = [2, 0], sizes = [1, 16], strides = [1, 1]} : vector<4x16xf32> to vector<1x16xf32>
    %116 = vector.broadcast %114 : vector<32x1xf32> to vector<32x16xf32>
    %117 = vector.broadcast %115 : vector<1x16xf32> to vector<32x16xf32>
    %118 = arith.mulf %116, %117 : vector<32x16xf32>
    %119 = arith.addf %94, %118 : vector<32x16xf32>
    %120 = vector.extract_strided_slice %43 {offsets = [0, 30], sizes = [32, 10], strides = [1, 1]} : vector<32x84xbf16> to vector<32x10xbf16>
    %121 = vector.shape_cast %120 : vector<32x10xbf16> to vector<2x16x10xbf16>
    %122 = vector.extract_strided_slice %43 {offsets = [0, 70], sizes = [32, 10], strides = [1, 1]} : vector<32x84xbf16> to vector<32x10xbf16>
    %123 = vector.shape_cast %122 : vector<32x10xbf16> to vector<2x16x10xbf16>
    %124 = vector.extract_strided_slice %43 {offsets = [0, 83], sizes = [32, 1], strides = [1, 1]} : vector<32x84xbf16> to vector<32x1xbf16>
    %125 = vector.shape_cast %124 : vector<32x1xbf16> to vector<2x16x1xbf16>
    "tpu.trace_start"() <{level = 10 : i32, message = "bqd,bkd->bqk"}> : () -> ()
    %cst_26 = arith.constant dense<0.000000e+00> : vector<2x16x16xf32>
    %126 = tpu.matmul %121, %123, %cst_26 {dimension_numbers = #tpu.dot_dimension_numbers<[2], [2], [1], [1], [0, 0, 0, 1, 1, 1], [0], [0]>} : vector<2x16x10xbf16>, vector<2x16x10xbf16>, vector<2x16x16xf32> -> vector<2x16x16xf32>
    "tpu.trace_stop"() : () -> ()
    %cst_27 = arith.constant dense<0xFF800000> : vector<2x16xf32>
    %127 = vector.multi_reduction <maximumf>, %126, %cst_27 [2] : vector<2x16x16xf32> to vector<2x16xf32>
    %128 = vector.shape_cast %127 : vector<2x16xf32> to vector<2x16x1xf32>
    %129 = vector.broadcast %128 : vector<2x16x1xf32> to vector<2x16x16xf32>
    %130 = arith.subf %126, %129 : vector<2x16x16xf32>
    %131 = math.exp %130 : vector<2x16x16xf32>
    %cst_28 = arith.constant dense<0.000000e+00> : vector<2x16xf32>
    %132 = vector.multi_reduction <add>, %131, %cst_28 [2] : vector<2x16x16xf32> to vector<2x16xf32>
    %133 = vector.shape_cast %132 : vector<2x16xf32> to vector<2x16x1xf32>
    %134 = tpu.reciprocal %133 {approx = true} : vector<2x16x1xf32> -> vector<2x16x1xf32>
    %135 = vector.broadcast %134 : vector<2x16x1xf32> to vector<2x16x16xf32>
    %136 = arith.mulf %131, %135 : vector<2x16x16xf32>
    %137 = arith.truncf %136 : vector<2x16x16xf32> to vector<2x16x16xbf16>
    "tpu.trace_start"() <{level = 10 : i32, message = "bqk,bkv->bqv"}> : () -> ()
    %cst_29 = arith.constant dense<0.000000e+00> : vector<2x16x1xf32>
    %138 = tpu.matmul %137, %125, %cst_29 {dimension_numbers = #tpu.dot_dimension_numbers<[2], [1], [1], [2], [0, 0, 0, 1, 1, 2], [0], [0]>} : vector<2x16x16xbf16>, vector<2x16x1xbf16>, vector<2x16x1xf32> -> vector<2x16x1xf32>
    "tpu.trace_stop"() : () -> ()
    %139 = vector.shape_cast %138 : vector<2x16x1xf32> to vector<32x1xf32>
    %140 = vector.extract_strided_slice %32 {offsets = [3, 0], sizes = [1, 16], strides = [1, 1]} : vector<4x16xf32> to vector<1x16xf32>
    %141 = vector.broadcast %139 : vector<32x1xf32> to vector<32x16xf32>
    %142 = vector.broadcast %140 : vector<1x16xf32> to vector<32x16xf32>
    %143 = arith.mulf %141, %142 : vector<32x16xf32>
    %144 = arith.addf %119, %143 : vector<32x16xf32>
    %145 = arith.addf %41, %144 : vector<32x16xf32>
    %cst_30 = arith.constant 0.000000e+00 : f32
    %146 = vector.broadcast %cst_30 : f32 to vector<32x16xf32>
    %147 = arith.maximumf %145, %146 : vector<32x16xf32>
    %c0_31 = arith.constant 0 : index
    %c0_32 = arith.constant 0 : index
    %c0_33 = arith.constant 0 : index
    %148 = vector.load %arg6[%c0_31, %c0_32, %c0_33] : memref<3x16x96xbf16, #tpu.memory_space<vmem>>, vector<3x16x96xbf16>
    %c0_34 = arith.constant 0 : index
    %c0_35 = arith.constant 0 : index
    %149 = vector.load %arg7[%c0_34, %c0_35] : memref<1x96xf32, #tpu.memory_space<vmem>>, vector<1x96xf32>
    %c0_36 = arith.constant 0 : index
    %c0_37 = arith.constant 0 : index
    %150 = vector.load %arg8[%c0_36, %c0_37] : memref<4x16xf32, #tpu.memory_space<vmem>>, vector<4x16xf32>
    %c0_38 = arith.constant 0 : index
    %c0_39 = arith.constant 0 : index
    %151 = vector.load %arg9[%c0_38, %c0_39] : memref<1x16xf32, #tpu.memory_space<vmem>>, vector<1x16xf32>
    %c1_i32_40 = arith.constant 1 : i32
    %152 = tpu.dynamic_rotate %147 by %c1_i32_40 dim 0 : vector<32x16xf32>, i32 -> vector<32x16xf32>
    %c31_i32 = arith.constant 31 : i32
    %153 = tpu.dynamic_rotate %147 by %c31_i32 dim 0 : vector<32x16xf32>, i32 -> vector<32x16xf32>
    %154 = vector.broadcast %20 : vector<32x1xf32> to vector<32x16xf32>
    %155 = arith.mulf %152, %154 : vector<32x16xf32>
    %156 = arith.truncf %155 : vector<32x16xf32> to vector<32x16xbf16>
    %157 = vector.broadcast %24 : vector<32x1xf32> to vector<32x16xf32>
    %158 = arith.mulf %153, %157 : vector<32x16xf32>
    %159 = arith.truncf %158 : vector<32x16xf32> to vector<32x16xbf16>
    %160 = arith.truncf %147 : vector<32x16xf32> to vector<32x16xbf16>
    %161 = vector.extract_strided_slice %148 {offsets = [0, 0, 0], sizes = [1, 16, 96], strides = [1, 1, 1]} : vector<3x16x96xbf16> to vector<1x16x96xbf16>
    %162 = vector.shape_cast %161 : vector<1x16x96xbf16> to vector<16x96xbf16>
    %cst_41 = arith.constant dense<0.000000e+00> : vector<32x96xf32>
    %163 = tpu.matmul %156, %162, %cst_41 {dimension_numbers = #tpu.dot_dimension_numbers<[1], [0], [0], [1], [0, 0, 1, 1], [], []>} : vector<32x16xbf16>, vector<16x96xbf16>, vector<32x96xf32> -> vector<32x96xf32>
    %164 = vector.extract_strided_slice %148 {offsets = [1, 0, 0], sizes = [1, 16, 96], strides = [1, 1, 1]} : vector<3x16x96xbf16> to vector<1x16x96xbf16>
    %165 = vector.shape_cast %164 : vector<1x16x96xbf16> to vector<16x96xbf16>
    %cst_42 = arith.constant dense<0.000000e+00> : vector<32x96xf32>
    %166 = tpu.matmul %160, %165, %cst_42 {dimension_numbers = #tpu.dot_dimension_numbers<[1], [0], [0], [1], [0, 0, 1, 1], [], []>} : vector<32x16xbf16>, vector<16x96xbf16>, vector<32x96xf32> -> vector<32x96xf32>
    %167 = arith.addf %163, %166 : vector<32x96xf32>
    %168 = vector.extract_strided_slice %148 {offsets = [2, 0, 0], sizes = [1, 16, 96], strides = [1, 1, 1]} : vector<3x16x96xbf16> to vector<1x16x96xbf16>
    %169 = vector.shape_cast %168 : vector<1x16x96xbf16> to vector<16x96xbf16>
    %cst_43 = arith.constant dense<0.000000e+00> : vector<32x96xf32>
    %170 = tpu.matmul %159, %169, %cst_43 {dimension_numbers = #tpu.dot_dimension_numbers<[1], [0], [0], [1], [0, 0, 1, 1], [], []>} : vector<32x16xbf16>, vector<16x96xbf16>, vector<32x96xf32> -> vector<32x96xf32>
    %171 = arith.addf %167, %170 : vector<32x96xf32>
    %172 = vector.broadcast %149 : vector<1x96xf32> to vector<32x96xf32>
    %173 = arith.addf %171, %172 : vector<32x96xf32>
    %174 = vector.extract_strided_slice %173 {offsets = [0, 0], sizes = [32, 16], strides = [1, 1]} : vector<32x96xf32> to vector<32x16xf32>
    %175 = vector.broadcast %29 : vector<1x16xf32> to vector<32x16xf32>
    %176 = arith.mulf %174, %175 : vector<32x16xf32>
    %177 = vector.extract_strided_slice %173 {offsets = [0, 12], sizes = [32, 84], strides = [1, 1]} : vector<32x96xf32> to vector<32x84xf32>
    %178 = arith.truncf %177 : vector<32x84xf32> to vector<32x84xbf16>
    %179 = vector.extract_strided_slice %178 {offsets = [0, 0], sizes = [32, 10], strides = [1, 1]} : vector<32x84xbf16> to vector<32x10xbf16>
    %180 = vector.shape_cast %179 : vector<32x10xbf16> to vector<2x16x10xbf16>
    %181 = vector.extract_strided_slice %178 {offsets = [0, 40], sizes = [32, 10], strides = [1, 1]} : vector<32x84xbf16> to vector<32x10xbf16>
    %182 = vector.shape_cast %181 : vector<32x10xbf16> to vector<2x16x10xbf16>
    %183 = vector.extract_strided_slice %178 {offsets = [0, 80], sizes = [32, 1], strides = [1, 1]} : vector<32x84xbf16> to vector<32x1xbf16>
    %184 = vector.shape_cast %183 : vector<32x1xbf16> to vector<2x16x1xbf16>
    "tpu.trace_start"() <{level = 10 : i32, message = "bqd,bkd->bqk"}> : () -> ()
    %cst_44 = arith.constant dense<0.000000e+00> : vector<2x16x16xf32>
    %185 = tpu.matmul %180, %182, %cst_44 {dimension_numbers = #tpu.dot_dimension_numbers<[2], [2], [1], [1], [0, 0, 0, 1, 1, 1], [0], [0]>} : vector<2x16x10xbf16>, vector<2x16x10xbf16>, vector<2x16x16xf32> -> vector<2x16x16xf32>
    "tpu.trace_stop"() : () -> ()
    %cst_45 = arith.constant dense<0xFF800000> : vector<2x16xf32>
    %186 = vector.multi_reduction <maximumf>, %185, %cst_45 [2] : vector<2x16x16xf32> to vector<2x16xf32>
    %187 = vector.shape_cast %186 : vector<2x16xf32> to vector<2x16x1xf32>
    %188 = vector.broadcast %187 : vector<2x16x1xf32> to vector<2x16x16xf32>
    %189 = arith.subf %185, %188 : vector<2x16x16xf32>
    %190 = math.exp %189 : vector<2x16x16xf32>
    %cst_46 = arith.constant dense<0.000000e+00> : vector<2x16xf32>
    %191 = vector.multi_reduction <add>, %190, %cst_46 [2] : vector<2x16x16xf32> to vector<2x16xf32>
    %192 = vector.shape_cast %191 : vector<2x16xf32> to vector<2x16x1xf32>
    %193 = tpu.reciprocal %192 {approx = true} : vector<2x16x1xf32> -> vector<2x16x1xf32>
    %194 = vector.broadcast %193 : vector<2x16x1xf32> to vector<2x16x16xf32>
    %195 = arith.mulf %190, %194 : vector<2x16x16xf32>
    %196 = arith.truncf %195 : vector<2x16x16xf32> to vector<2x16x16xbf16>
    "tpu.trace_start"() <{level = 10 : i32, message = "bqk,bkv->bqv"}> : () -> ()
    %cst_47 = arith.constant dense<0.000000e+00> : vector<2x16x1xf32>
    %197 = tpu.matmul %196, %184, %cst_47 {dimension_numbers = #tpu.dot_dimension_numbers<[2], [1], [1], [2], [0, 0, 0, 1, 1, 2], [0], [0]>} : vector<2x16x16xbf16>, vector<2x16x1xbf16>, vector<2x16x1xf32> -> vector<2x16x1xf32>
    "tpu.trace_stop"() : () -> ()
    %198 = vector.shape_cast %197 : vector<2x16x1xf32> to vector<32x1xf32>
    %199 = vector.extract_strided_slice %150 {offsets = [0, 0], sizes = [1, 16], strides = [1, 1]} : vector<4x16xf32> to vector<1x16xf32>
    %200 = vector.broadcast %198 : vector<32x1xf32> to vector<32x16xf32>
    %201 = vector.broadcast %199 : vector<1x16xf32> to vector<32x16xf32>
    %202 = arith.mulf %200, %201 : vector<32x16xf32>
    %203 = vector.broadcast %151 : vector<1x16xf32> to vector<32x16xf32>
    %204 = arith.addf %203, %202 : vector<32x16xf32>
    %205 = vector.extract_strided_slice %178 {offsets = [0, 10], sizes = [32, 10], strides = [1, 1]} : vector<32x84xbf16> to vector<32x10xbf16>
    %206 = vector.shape_cast %205 : vector<32x10xbf16> to vector<2x16x10xbf16>
    %207 = vector.extract_strided_slice %178 {offsets = [0, 50], sizes = [32, 10], strides = [1, 1]} : vector<32x84xbf16> to vector<32x10xbf16>
    %208 = vector.shape_cast %207 : vector<32x10xbf16> to vector<2x16x10xbf16>
    %209 = vector.extract_strided_slice %178 {offsets = [0, 81], sizes = [32, 1], strides = [1, 1]} : vector<32x84xbf16> to vector<32x1xbf16>
    %210 = vector.shape_cast %209 : vector<32x1xbf16> to vector<2x16x1xbf16>
    "tpu.trace_start"() <{level = 10 : i32, message = "bqd,bkd->bqk"}> : () -> ()
    %cst_48 = arith.constant dense<0.000000e+00> : vector<2x16x16xf32>
    %211 = tpu.matmul %206, %208, %cst_48 {dimension_numbers = #tpu.dot_dimension_numbers<[2], [2], [1], [1], [0, 0, 0, 1, 1, 1], [0], [0]>} : vector<2x16x10xbf16>, vector<2x16x10xbf16>, vector<2x16x16xf32> -> vector<2x16x16xf32>
    "tpu.trace_stop"() : () -> ()
    %cst_49 = arith.constant dense<0xFF800000> : vector<2x16xf32>
    %212 = vector.multi_reduction <maximumf>, %211, %cst_49 [2] : vector<2x16x16xf32> to vector<2x16xf32>
    %213 = vector.shape_cast %212 : vector<2x16xf32> to vector<2x16x1xf32>
    %214 = vector.broadcast %213 : vector<2x16x1xf32> to vector<2x16x16xf32>
    %215 = arith.subf %211, %214 : vector<2x16x16xf32>
    %216 = math.exp %215 : vector<2x16x16xf32>
    %cst_50 = arith.constant dense<0.000000e+00> : vector<2x16xf32>
    %217 = vector.multi_reduction <add>, %216, %cst_50 [2] : vector<2x16x16xf32> to vector<2x16xf32>
    %218 = vector.shape_cast %217 : vector<2x16xf32> to vector<2x16x1xf32>
    %219 = tpu.reciprocal %218 {approx = true} : vector<2x16x1xf32> -> vector<2x16x1xf32>
    %220 = vector.broadcast %219 : vector<2x16x1xf32> to vector<2x16x16xf32>
    %221 = arith.mulf %216, %220 : vector<2x16x16xf32>
    %222 = arith.truncf %221 : vector<2x16x16xf32> to vector<2x16x16xbf16>
    "tpu.trace_start"() <{level = 10 : i32, message = "bqk,bkv->bqv"}> : () -> ()
    %cst_51 = arith.constant dense<0.000000e+00> : vector<2x16x1xf32>
    %223 = tpu.matmul %222, %210, %cst_51 {dimension_numbers = #tpu.dot_dimension_numbers<[2], [1], [1], [2], [0, 0, 0, 1, 1, 2], [0], [0]>} : vector<2x16x16xbf16>, vector<2x16x1xbf16>, vector<2x16x1xf32> -> vector<2x16x1xf32>
    "tpu.trace_stop"() : () -> ()
    %224 = vector.shape_cast %223 : vector<2x16x1xf32> to vector<32x1xf32>
    %225 = vector.extract_strided_slice %150 {offsets = [1, 0], sizes = [1, 16], strides = [1, 1]} : vector<4x16xf32> to vector<1x16xf32>
    %226 = vector.broadcast %224 : vector<32x1xf32> to vector<32x16xf32>
    %227 = vector.broadcast %225 : vector<1x16xf32> to vector<32x16xf32>
    %228 = arith.mulf %226, %227 : vector<32x16xf32>
    %229 = arith.addf %204, %228 : vector<32x16xf32>
    %230 = vector.extract_strided_slice %178 {offsets = [0, 20], sizes = [32, 10], strides = [1, 1]} : vector<32x84xbf16> to vector<32x10xbf16>
    %231 = vector.shape_cast %230 : vector<32x10xbf16> to vector<2x16x10xbf16>
    %232 = vector.extract_strided_slice %178 {offsets = [0, 60], sizes = [32, 10], strides = [1, 1]} : vector<32x84xbf16> to vector<32x10xbf16>
    %233 = vector.shape_cast %232 : vector<32x10xbf16> to vector<2x16x10xbf16>
    %234 = vector.extract_strided_slice %178 {offsets = [0, 82], sizes = [32, 1], strides = [1, 1]} : vector<32x84xbf16> to vector<32x1xbf16>
    %235 = vector.shape_cast %234 : vector<32x1xbf16> to vector<2x16x1xbf16>
    "tpu.trace_start"() <{level = 10 : i32, message = "bqd,bkd->bqk"}> : () -> ()
    %cst_52 = arith.constant dense<0.000000e+00> : vector<2x16x16xf32>
    %236 = tpu.matmul %231, %233, %cst_52 {dimension_numbers = #tpu.dot_dimension_numbers<[2], [2], [1], [1], [0, 0, 0, 1, 1, 1], [0], [0]>} : vector<2x16x10xbf16>, vector<2x16x10xbf16>, vector<2x16x16xf32> -> vector<2x16x16xf32>
    "tpu.trace_stop"() : () -> ()
    %cst_53 = arith.constant dense<0xFF800000> : vector<2x16xf32>
    %237 = vector.multi_reduction <maximumf>, %236, %cst_53 [2] : vector<2x16x16xf32> to vector<2x16xf32>
    %238 = vector.shape_cast %237 : vector<2x16xf32> to vector<2x16x1xf32>
    %239 = vector.broadcast %238 : vector<2x16x1xf32> to vector<2x16x16xf32>
    %240 = arith.subf %236, %239 : vector<2x16x16xf32>
    %241 = math.exp %240 : vector<2x16x16xf32>
    %cst_54 = arith.constant dense<0.000000e+00> : vector<2x16xf32>
    %242 = vector.multi_reduction <add>, %241, %cst_54 [2] : vector<2x16x16xf32> to vector<2x16xf32>
    %243 = vector.shape_cast %242 : vector<2x16xf32> to vector<2x16x1xf32>
    %244 = tpu.reciprocal %243 {approx = true} : vector<2x16x1xf32> -> vector<2x16x1xf32>
    %245 = vector.broadcast %244 : vector<2x16x1xf32> to vector<2x16x16xf32>
    %246 = arith.mulf %241, %245 : vector<2x16x16xf32>
    %247 = arith.truncf %246 : vector<2x16x16xf32> to vector<2x16x16xbf16>
    "tpu.trace_start"() <{level = 10 : i32, message = "bqk,bkv->bqv"}> : () -> ()
    %cst_55 = arith.constant dense<0.000000e+00> : vector<2x16x1xf32>
    %248 = tpu.matmul %247, %235, %cst_55 {dimension_numbers = #tpu.dot_dimension_numbers<[2], [1], [1], [2], [0, 0, 0, 1, 1, 2], [0], [0]>} : vector<2x16x16xbf16>, vector<2x16x1xbf16>, vector<2x16x1xf32> -> vector<2x16x1xf32>
    "tpu.trace_stop"() : () -> ()
    %249 = vector.shape_cast %248 : vector<2x16x1xf32> to vector<32x1xf32>
    %250 = vector.extract_strided_slice %150 {offsets = [2, 0], sizes = [1, 16], strides = [1, 1]} : vector<4x16xf32> to vector<1x16xf32>
    %251 = vector.broadcast %249 : vector<32x1xf32> to vector<32x16xf32>
    %252 = vector.broadcast %250 : vector<1x16xf32> to vector<32x16xf32>
    %253 = arith.mulf %251, %252 : vector<32x16xf32>
    %254 = arith.addf %229, %253 : vector<32x16xf32>
    %255 = vector.extract_strided_slice %178 {offsets = [0, 30], sizes = [32, 10], strides = [1, 1]} : vector<32x84xbf16> to vector<32x10xbf16>
    %256 = vector.shape_cast %255 : vector<32x10xbf16> to vector<2x16x10xbf16>
    %257 = vector.extract_strided_slice %178 {offsets = [0, 70], sizes = [32, 10], strides = [1, 1]} : vector<32x84xbf16> to vector<32x10xbf16>
    %258 = vector.shape_cast %257 : vector<32x10xbf16> to vector<2x16x10xbf16>
    %259 = vector.extract_strided_slice %178 {offsets = [0, 83], sizes = [32, 1], strides = [1, 1]} : vector<32x84xbf16> to vector<32x1xbf16>
    %260 = vector.shape_cast %259 : vector<32x1xbf16> to vector<2x16x1xbf16>
    "tpu.trace_start"() <{level = 10 : i32, message = "bqd,bkd->bqk"}> : () -> ()
    %cst_56 = arith.constant dense<0.000000e+00> : vector<2x16x16xf32>
    %261 = tpu.matmul %256, %258, %cst_56 {dimension_numbers = #tpu.dot_dimension_numbers<[2], [2], [1], [1], [0, 0, 0, 1, 1, 1], [0], [0]>} : vector<2x16x10xbf16>, vector<2x16x10xbf16>, vector<2x16x16xf32> -> vector<2x16x16xf32>
    "tpu.trace_stop"() : () -> ()
    %cst_57 = arith.constant dense<0xFF800000> : vector<2x16xf32>
    %262 = vector.multi_reduction <maximumf>, %261, %cst_57 [2] : vector<2x16x16xf32> to vector<2x16xf32>
    %263 = vector.shape_cast %262 : vector<2x16xf32> to vector<2x16x1xf32>
    %264 = vector.broadcast %263 : vector<2x16x1xf32> to vector<2x16x16xf32>
    %265 = arith.subf %261, %264 : vector<2x16x16xf32>
    %266 = math.exp %265 : vector<2x16x16xf32>
    %cst_58 = arith.constant dense<0.000000e+00> : vector<2x16xf32>
    %267 = vector.multi_reduction <add>, %266, %cst_58 [2] : vector<2x16x16xf32> to vector<2x16xf32>
    %268 = vector.shape_cast %267 : vector<2x16xf32> to vector<2x16x1xf32>
    %269 = tpu.reciprocal %268 {approx = true} : vector<2x16x1xf32> -> vector<2x16x1xf32>
    %270 = vector.broadcast %269 : vector<2x16x1xf32> to vector<2x16x16xf32>
    %271 = arith.mulf %266, %270 : vector<2x16x16xf32>
    %272 = arith.truncf %271 : vector<2x16x16xf32> to vector<2x16x16xbf16>
    "tpu.trace_start"() <{level = 10 : i32, message = "bqk,bkv->bqv"}> : () -> ()
    %cst_59 = arith.constant dense<0.000000e+00> : vector<2x16x1xf32>
    %273 = tpu.matmul %272, %260, %cst_59 {dimension_numbers = #tpu.dot_dimension_numbers<[2], [1], [1], [2], [0, 0, 0, 1, 1, 2], [0], [0]>} : vector<2x16x16xbf16>, vector<2x16x1xbf16>, vector<2x16x1xf32> -> vector<2x16x1xf32>
    "tpu.trace_stop"() : () -> ()
    %274 = vector.shape_cast %273 : vector<2x16x1xf32> to vector<32x1xf32>
    %275 = vector.extract_strided_slice %150 {offsets = [3, 0], sizes = [1, 16], strides = [1, 1]} : vector<4x16xf32> to vector<1x16xf32>
    %276 = vector.broadcast %274 : vector<32x1xf32> to vector<32x16xf32>
    %277 = vector.broadcast %275 : vector<1x16xf32> to vector<32x16xf32>
    %278 = arith.mulf %276, %277 : vector<32x16xf32>
    %279 = arith.addf %254, %278 : vector<32x16xf32>
    %280 = arith.addf %176, %279 : vector<32x16xf32>
    %cst_60 = arith.constant 0.000000e+00 : f32
    %281 = vector.broadcast %cst_60 : f32 to vector<32x16xf32>
    %282 = arith.maximumf %280, %281 : vector<32x16xf32>
    %283 = arith.addf %282, %147 : vector<32x16xf32>
    %284 = vector.shape_cast %283 : vector<32x16xf32> to vector<2x256xf32>
    %285 = arith.truncf %284 : vector<2x256xf32> to vector<2x256xbf16>
    %c0_61 = arith.constant 0 : index
    %c0_62 = arith.constant 0 : index
    %c0_63 = arith.constant 0 : index
    %286 = vector.load %arg10[%c0_61, %c0_62, %c0_63] : memref<16x16x32xbf16, #tpu.memory_space<vmem>>, vector<16x16x32xbf16>
    %287 = vector.shape_cast %286 : vector<16x16x32xbf16> to vector<256x32xbf16>
    %cst_64 = arith.constant dense<0.000000e+00> : vector<2x32xf32>
    %288 = tpu.matmul %285, %287, %cst_64 {dimension_numbers = #tpu.dot_dimension_numbers<[1], [0], [0], [1], [0, 0, 1, 1], [], []>} : vector<2x256xbf16>, vector<256x32xbf16>, vector<2x32xf32> -> vector<2x32xf32>
    %c0_65 = arith.constant 0 : index
    %c0_66 = arith.constant 0 : index
    %289 = vector.load %arg11[%c0_65, %c0_66] : memref<1x32xf32, #tpu.memory_space<vmem>>, vector<1x32xf32>
    %290 = vector.broadcast %289 : vector<1x32xf32> to vector<2x32xf32>
    %291 = arith.addf %288, %290 : vector<2x32xf32>
    %cst_67 = arith.constant 0.000000e+00 : f32
    %292 = vector.broadcast %cst_67 : f32 to vector<2x32xf32>
    %293 = arith.maximumf %291, %292 : vector<2x32xf32>
    %294 = arith.truncf %293 : vector<2x32xf32> to vector<2x32xbf16>
    %c0_68 = arith.constant 0 : index
    %c0_69 = arith.constant 0 : index
    %295 = vector.load %arg12[%c0_68, %c0_69] : memref<32x32xbf16, #tpu.memory_space<vmem>>, vector<32x32xbf16>
    %cst_70 = arith.constant dense<0.000000e+00> : vector<2x32xf32>
    %296 = tpu.matmul %294, %295, %cst_70 {dimension_numbers = #tpu.dot_dimension_numbers<[1], [0], [0], [1], [0, 0, 1, 1], [], []>} : vector<2x32xbf16>, vector<32x32xbf16>, vector<2x32xf32> -> vector<2x32xf32>
    %c0_71 = arith.constant 0 : index
    %c0_72 = arith.constant 0 : index
    %297 = vector.load %arg13[%c0_71, %c0_72] : memref<1x32xf32, #tpu.memory_space<vmem>>, vector<1x32xf32>
    %298 = vector.broadcast %297 : vector<1x32xf32> to vector<2x32xf32>
    %299 = arith.addf %296, %298 : vector<2x32xf32>
    %cst_73 = arith.constant 0.000000e+00 : f32
    %300 = vector.broadcast %cst_73 : f32 to vector<2x32xf32>
    %301 = arith.maximumf %299, %300 : vector<2x32xf32>
    %302 = arith.truncf %301 : vector<2x32xf32> to vector<2x32xbf16>
    %c0_74 = arith.constant 0 : index
    %c0_75 = arith.constant 0 : index
    %303 = vector.load %arg14[%c0_74, %c0_75] : memref<32x1xbf16, #tpu.memory_space<vmem>>, vector<32x1xbf16>
    %cst_76 = arith.constant dense<0.000000e+00> : vector<2x1xf32>
    %304 = tpu.matmul %302, %303, %cst_76 {dimension_numbers = #tpu.dot_dimension_numbers<[1], [0], [0], [1], [0, 0, 1, 1], [], []>} : vector<2x32xbf16>, vector<32x1xbf16>, vector<2x1xf32> -> vector<2x1xf32>
    %c0_77 = arith.constant 0 : index
    %c0_78 = arith.constant 0 : index
    %305 = vector.load %arg15[%c0_77, %c0_78] : memref<1x1xf32, #tpu.memory_space<vmem>>, vector<1x1xf32>
    %306 = vector.broadcast %305 : vector<1x1xf32> to vector<2x1xf32>
    %307 = arith.addf %304, %306 : vector<2x1xf32>
    %cst_79 = arith.constant 0.000000e+00 : f32
    %308 = vector.broadcast %cst_79 : f32 to vector<2x1xf32>
    %309 = arith.subf %308, %307 : vector<2x1xf32>
    %310 = math.exp %309 : vector<2x1xf32>
    %cst_80 = arith.constant 1.000000e+00 : f32
    %311 = vector.broadcast %cst_80 : f32 to vector<2x1xf32>
    %312 = arith.addf %311, %310 : vector<2x1xf32>
    %cst_81 = arith.constant 1.000000e+00 : f32
    %313 = vector.broadcast %cst_81 : f32 to vector<2x1xf32>
    %314 = arith.divf %313, %312 : vector<2x1xf32>
    %315 = vector.shape_cast %314 : vector<2x1xf32> to vector<1x1x2xf32>
    %c0_82 = arith.constant 0 : index
    %c0_83 = arith.constant 0 : index
    %c0_84 = arith.constant 0 : index
    %316 = vector.load %arg16[%c0_82, %c0_83, %c0_84] : memref<1x1x2xf32, #tpu.memory_space<vmem>>, vector<1x1x2xf32>
    tpu.vector_store %arg16[%c0_82, %c0_83, %c0_84], %315 {strides = array<i32>} : memref<1x1x2xf32, #tpu.memory_space<vmem>>, vector<1x1x2xf32>,
    return
  }
  func.func @transform_0(%arg0: i32) -> (i32, i32, i32) {
    %c0_i32 = arith.constant 0 : i32
    %c0_i32_0 = arith.constant 0 : i32
    %c0_i32_1 = arith.constant 0 : i32
    return %arg0, %c0_i32, %c0_i32_0 : i32, i32, i32
  }
  func.func @transform_1(%arg0: i32) -> (i32, i32) {
    %c0_i32 = arith.constant 0 : i32
    %c0_i32_0 = arith.constant 0 : i32
    %c0_i32_1 = arith.constant 0 : i32
    return %c0_i32, %c0_i32_0 : i32, i32
  }
  func.func @transform_2(%arg0: i32) -> (i32, i32) {
    %c0_i32 = arith.constant 0 : i32
    %c0_i32_0 = arith.constant 0 : i32
    %c0_i32_1 = arith.constant 0 : i32
    return %c0_i32, %c0_i32_0 : i32, i32
  }
  func.func @transform_3(%arg0: i32) -> (i32, i32) {
    %c0_i32 = arith.constant 0 : i32
    %c0_i32_0 = arith.constant 0 : i32
    %c0_i32_1 = arith.constant 0 : i32
    return %c0_i32, %c0_i32_0 : i32, i32
  }
  func.func @transform_4(%arg0: i32) -> (i32, i32) {
    %c0_i32 = arith.constant 0 : i32
    %c0_i32_0 = arith.constant 0 : i32
    %c0_i32_1 = arith.constant 0 : i32
    return %c0_i32, %c0_i32_0 : i32, i32
  }
  func.func @transform_5(%arg0: i32) -> (i32, i32, i32) {
    %c0_i32 = arith.constant 0 : i32
    %c0_i32_0 = arith.constant 0 : i32
    %c0_i32_1 = arith.constant 0 : i32
    %c0_i32_2 = arith.constant 0 : i32
    return %c0_i32, %c0_i32_0, %c0_i32_1 : i32, i32, i32
  }
  func.func @transform_6(%arg0: i32) -> (i32, i32) {
    %c0_i32 = arith.constant 0 : i32
    %c0_i32_0 = arith.constant 0 : i32
    %c0_i32_1 = arith.constant 0 : i32
    return %c0_i32, %c0_i32_0 : i32, i32
  }
  func.func @transform_7(%arg0: i32) -> (i32, i32) {
    %c0_i32 = arith.constant 0 : i32
    %c0_i32_0 = arith.constant 0 : i32
    %c0_i32_1 = arith.constant 0 : i32
    return %c0_i32, %c0_i32_0 : i32, i32
  }
  func.func @transform_8(%arg0: i32) -> (i32, i32) {
    %c0_i32 = arith.constant 0 : i32
    %c0_i32_0 = arith.constant 0 : i32
    %c0_i32_1 = arith.constant 0 : i32
    return %c0_i32, %c0_i32_0 : i32, i32
  }
  func.func @transform_9(%arg0: i32) -> (i32, i32, i32) {
    %c0_i32 = arith.constant 0 : i32
    %c0_i32_0 = arith.constant 0 : i32
    %c0_i32_1 = arith.constant 0 : i32
    %c0_i32_2 = arith.constant 0 : i32
    return %c0_i32, %c0_i32_0, %c0_i32_1 : i32, i32, i32
  }
  func.func @transform_10(%arg0: i32) -> (i32, i32) {
    %c0_i32 = arith.constant 0 : i32
    %c0_i32_0 = arith.constant 0 : i32
    %c0_i32_1 = arith.constant 0 : i32
    return %c0_i32, %c0_i32_0 : i32, i32
  }
  func.func @transform_11(%arg0: i32) -> (i32, i32) {
    %c0_i32 = arith.constant 0 : i32
    %c0_i32_0 = arith.constant 0 : i32
    %c0_i32_1 = arith.constant 0 : i32
    return %c0_i32, %c0_i32_0 : i32, i32
  }
  func.func @transform_12(%arg0: i32) -> (i32, i32) {
    %c0_i32 = arith.constant 0 : i32
    %c0_i32_0 = arith.constant 0 : i32
    %c0_i32_1 = arith.constant 0 : i32
    return %c0_i32, %c0_i32_0 : i32, i32
  }
  func.func @transform_13(%arg0: i32) -> (i32, i32) {
    %c0_i32 = arith.constant 0 : i32
    %c0_i32_0 = arith.constant 0 : i32
    %c0_i32_1 = arith.constant 0 : i32
    return %c0_i32, %c0_i32_0 : i32, i32
  }
  func.func @transform_14(%arg0: i32) -> (i32, i32) {
    %c0_i32 = arith.constant 0 : i32
    %c0_i32_0 = arith.constant 0 : i32
    %c0_i32_1 = arith.constant 0 : i32
    return %c0_i32, %c0_i32_0 : i32, i32
  }
  func.func @transform_15(%arg0: i32) -> (i32, i32, i32) {
    %c0_i32 = arith.constant 0 : i32
    %c0_i32_0 = arith.constant 0 : i32
    %c0_i32_1 = arith.constant 0 : i32
    return %arg0, %c0_i32, %c0_i32_0 : i32, i32, i32
  }
}

module attributes {stable_mosaic.version = 11 : i64} {
  func.func @kernel(%arg0: i32, %arg1: memref<2x16x4xbf16, #tpu.memory_space<vmem>>, %arg2: memref<4x96xbf16, #tpu.memory_space<vmem>>, %arg3: memref<1x96xf32, #tpu.memory_space<vmem>>, %arg4: memref<4x16xf32, #tpu.memory_space<vmem>>, %arg5: memref<1x16xf32, #tpu.memory_space<vmem>>, %arg6: memref<3x16x96xbf16, #tpu.memory_space<vmem>>, %arg7: memref<1x96xf32, #tpu.memory_space<vmem>>, %arg8: memref<4x16xf32, #tpu.memory_space<vmem>>, %arg9: memref<1x16xf32, #tpu.memory_space<vmem>>, %arg10: memref<16x16x32xbf16, #tpu.memory_space<vmem>>, %arg11: memref<1x32xf32, #tpu.memory_space<vmem>>, %arg12: memref<32x32xbf16, #tpu.memory_space<vmem>>, %arg13: memref<1x32xf32, #tpu.memory_space<vmem>>, %arg14: memref<32x1xbf16, #tpu.memory_space<vmem>>, %arg15: memref<1x1xf32, #tpu.memory_space<vmem>>, %arg16: memref<2x1xf32, #tpu.memory_space<vmem>>) attributes {dimension_semantics = [#tpu.dimension_semantics<parallel>], iteration_bounds = array<i64: 1>, scalar_prefetch = 0 : i64, scratch_operands = 0 : i64, tpu.core_type = #tpu.core_type<tc>, window_params = [{transform_indices = @transform_0, window_bounds = array<i64: 2, 16, 4>}, {pipeline_mode = #tpu.pipeline_mode<synchronous>, transform_indices = @transform_1, window_bounds = array<i64: 4, 96>}, {pipeline_mode = #tpu.pipeline_mode<synchronous>, transform_indices = @transform_2, window_bounds = array<i64: 1, 96>}, {pipeline_mode = #tpu.pipeline_mode<synchronous>, transform_indices = @transform_3, window_bounds = array<i64: 4, 16>}, {pipeline_mode = #tpu.pipeline_mode<synchronous>, transform_indices = @transform_4, window_bounds = array<i64: 1, 16>}, {pipeline_mode = #tpu.pipeline_mode<synchronous>, transform_indices = @transform_5, window_bounds = array<i64: 3, 16, 96>}, {pipeline_mode = #tpu.pipeline_mode<synchronous>, transform_indices = @transform_6, window_bounds = array<i64: 1, 96>}, {pipeline_mode = #tpu.pipeline_mode<synchronous>, transform_indices = @transform_7, window_bounds = array<i64: 4, 16>}, {pipeline_mode = #tpu.pipeline_mode<synchronous>, transform_indices = @transform_8, window_bounds = array<i64: 1, 16>}, {pipeline_mode = #tpu.pipeline_mode<synchronous>, transform_indices = @transform_9, window_bounds = array<i64: 16, 16, 32>}, {pipeline_mode = #tpu.pipeline_mode<synchronous>, transform_indices = @transform_10, window_bounds = array<i64: 1, 32>}, {pipeline_mode = #tpu.pipeline_mode<synchronous>, transform_indices = @transform_11, window_bounds = array<i64: 32, 32>}, {pipeline_mode = #tpu.pipeline_mode<synchronous>, transform_indices = @transform_12, window_bounds = array<i64: 1, 32>}, {pipeline_mode = #tpu.pipeline_mode<synchronous>, transform_indices = @transform_13, window_bounds = array<i64: 32, 1>}, {pipeline_mode = #tpu.pipeline_mode<synchronous>, transform_indices = @transform_14, window_bounds = array<i64: 1, 1>}, {transform_indices = @transform_15, window_bounds = array<i64: 2, 1>}]} {
    %0 = tpu.iota {dimensions = array<i32: 0>} : vector<32x1xi32>
    %c16_i32 = arith.constant 16 : i32
    %c0_i32 = arith.constant 0 : i32
    %1 = arith.cmpi eq, %c16_i32, %c0_i32 : i32
    %c1_i32 = arith.constant 1 : i32
    %2 = arith.select %1, %c1_i32, %c16_i32 : i32
    %3 = vector.broadcast %2 : i32 to vector<32x1xi32>
    %4 = arith.remsi %0, %3 : vector<32x1xi32>
    %c0_i32_0 = arith.constant 0 : i32
    %5 = vector.broadcast %c0_i32_0 : i32 to vector<32x1xi32>
    %6 = arith.cmpi ne, %4, %5 : vector<32x1xi32>
    %c0_i32_1 = arith.constant 0 : i32
    %7 = vector.broadcast %c0_i32_1 : i32 to vector<32x1xi32>
    %8 = arith.cmpi slt, %4, %7 : vector<32x1xi32>
    %c0_i32_2 = arith.constant 0 : i32
    %9 = arith.cmpi slt, %2, %c0_i32_2 : i32
    %10 = vector.broadcast %9 : i1 to vector<32x1xi1>
    %11 = vector.broadcast %10 : vector<32x1xi1> to vector<32x1xi1>
    %12 = arith.xori %8, %11 : vector<32x1xi1>
    %13 = arith.andi %12, %6 : vector<32x1xi1>
    %14 = vector.broadcast %2 : i32 to vector<32x1xi32>
    %15 = arith.addi %4, %14 : vector<32x1xi32>
    %16 = arith.select %13, %15, %4 : vector<32x1xi1>, vector<32x1xi32>
    %c0_i32_3 = arith.constant 0 : i32
    %17 = vector.broadcast %c0_i32_3 : i32 to vector<32x1xi32>
    %18 = arith.cmpi ne, %16, %17 : vector<32x1xi32>
    %19 = arith.extui %18 : vector<32x1xi1> to vector<32x1xi32>
    %20 = arith.sitofp %19 : vector<32x1xi32> to vector<32x1xf32>
    %c15_i32 = arith.constant 15 : i32
    %21 = vector.broadcast %c15_i32 : i32 to vector<32x1xi32>
    %22 = arith.cmpi ne, %16, %21 : vector<32x1xi32>
    %23 = arith.extui %22 : vector<32x1xi1> to vector<32x1xi32>
    %24 = arith.sitofp %23 : vector<32x1xi32> to vector<32x1xf32>
    %25 = tpu.iota {dimensions = array<i32: 1>} : vector<1x16xi32>
    %c12_i32 = arith.constant 12 : i32
    %26 = vector.broadcast %c12_i32 : i32 to vector<1x16xi32>
    %27 = arith.cmpi slt, %25, %26 : vector<1x16xi32>
    %28 = arith.extui %27 : vector<1x16xi1> to vector<1x16xi32>
    %29 = arith.sitofp %28 : vector<1x16xi32> to vector<1x16xf32>
    %c0 = arith.constant 0 : index
    %c0_4 = arith.constant 0 : index
    %30 = vector.load %arg2[%c0, %c0_4] : memref<4x96xbf16, #tpu.memory_space<vmem>>, vector<4x96xbf16>
    %c0_5 = arith.constant 0 : index
    %c0_6 = arith.constant 0 : index
    %31 = vector.load %arg3[%c0_5, %c0_6] : memref<1x96xf32, #tpu.memory_space<vmem>>, vector<1x96xf32>
    %c0_7 = arith.constant 0 : index
    %c0_8 = arith.constant 0 : index
    %32 = vector.load %arg4[%c0_7, %c0_8] : memref<4x16xf32, #tpu.memory_space<vmem>>, vector<4x16xf32>
    %c0_9 = arith.constant 0 : index
    %c0_10 = arith.constant 0 : index
    %33 = vector.load %arg5[%c0_9, %c0_10] : memref<1x16xf32, #tpu.memory_space<vmem>>, vector<1x16xf32>
    %c0_11 = arith.constant 0 : index
    %c0_12 = arith.constant 0 : index
    %c0_13 = arith.constant 0 : index
    %34 = vector.load %arg1[%c0_11, %c0_12, %c0_13] : memref<2x16x4xbf16, #tpu.memory_space<vmem>>, vector<2x16x4xbf16>
    %35 = vector.shape_cast %34 : vector<2x16x4xbf16> to vector<32x4xbf16>
    %cst = arith.constant dense<0.000000e+00> : vector<32x96xf32>
    %36 = tpu.matmul %35, %30, %cst {dimension_numbers = #tpu.dot_dimension_numbers<[1], [0], [0], [1], [0, 0, 1, 1], [], []>} : vector<32x4xbf16>, vector<4x96xbf16>, vector<32x96xf32> -> vector<32x96xf32>
    %37 = vector.broadcast %31 : vector<1x96xf32> to vector<32x96xf32>
    %38 = arith.addf %36, %37 : vector<32x96xf32>
    %39 = vector.extract_strided_slice %38 {offsets = [0, 0], sizes = [32, 16], strides = [1, 1]} : vector<32x96xf32> to vector<32x16xf32>
    %40 = vector.broadcast %29 : vector<1x16xf32> to vector<32x16xf32>
    %41 = arith.mulf %39, %40 : vector<32x16xf32>
    %42 = vector.extract_strided_slice %38 {offsets = [0, 12], sizes = [32, 84], strides = [1, 1]} : vector<32x96xf32> to vector<32x84xf32>
    %43 = arith.truncf %42 : vector<32x84xf32> to vector<32x84xbf16>
    %44 = vector.extract_strided_slice %43 {offsets = [0, 0], sizes = [32, 10], strides = [1, 1]} : vector<32x84xbf16> to vector<32x10xbf16>
    %45 = vector.shape_cast %44 : vector<32x10xbf16> to vector<2x16x10xbf16>
    %46 = vector.extract_strided_slice %43 {offsets = [0, 40], sizes = [32, 10], strides = [1, 1]} : vector<32x84xbf16> to vector<32x10xbf16>
    %47 = vector.shape_cast %46 : vector<32x10xbf16> to vector<2x16x10xbf16>
    %48 = vector.extract_strided_slice %43 {offsets = [0, 80], sizes = [32, 1], strides = [1, 1]} : vector<32x84xbf16> to vector<32x1xbf16>
    %49 = vector.shape_cast %48 : vector<32x1xbf16> to vector<2x16x1xbf16>
    "tpu.trace_start"() <{level = 10 : i32, message = "bqd,bkd->bqk"}> : () -> ()
    %cst_14 = arith.constant dense<0.000000e+00> : vector<2x16x16xf32>
    %50 = tpu.matmul %45, %47, %cst_14 {dimension_numbers = #tpu.dot_dimension_numbers<[2], [2], [1], [1], [0, 0, 0, 1, 1, 1], [0], [0]>} : vector<2x16x10xbf16>, vector<2x16x10xbf16>, vector<2x16x16xf32> -> vector<2x16x16xf32>
    "tpu.trace_stop"() : () -> ()
    %cst_15 = arith.constant dense<0xFF800000> : vector<2x16xf32>
    %51 = vector.multi_reduction <maximumf>, %50, %cst_15 [2] : vector<2x16x16xf32> to vector<2x16xf32>
    %52 = vector.shape_cast %51 : vector<2x16xf32> to vector<2x16x1xf32>
    %53 = vector.broadcast %52 : vector<2x16x1xf32> to vector<2x16x16xf32>
    %54 = arith.subf %50, %53 : vector<2x16x16xf32>
    %55 = math.exp %54 : vector<2x16x16xf32>
    %cst_16 = arith.constant dense<0.000000e+00> : vector<2x16xf32>
    %56 = vector.multi_reduction <add>, %55, %cst_16 [2] : vector<2x16x16xf32> to vector<2x16xf32>
    %57 = vector.shape_cast %56 : vector<2x16xf32> to vector<2x16x1xf32>
    %58 = tpu.reciprocal %57 {approx = true} : vector<2x16x1xf32> -> vector<2x16x1xf32>
    %59 = vector.broadcast %58 : vector<2x16x1xf32> to vector<2x16x16xf32>
    %60 = arith.mulf %55, %59 : vector<2x16x16xf32>
    %61 = arith.truncf %60 : vector<2x16x16xf32> to vector<2x16x16xbf16>
    "tpu.trace_start"() <{level = 10 : i32, message = "bqk,bkv->bqv"}> : () -> ()
    %cst_17 = arith.constant dense<0.000000e+00> : vector<2x16x1xf32>
    %62 = tpu.matmul %61, %49, %cst_17 {dimension_numbers = #tpu.dot_dimension_numbers<[2], [1], [1], [2], [0, 0, 0, 1, 1, 2], [0], [0]>} : vector<2x16x16xbf16>, vector<2x16x1xbf16>, vector<2x16x1xf32> -> vector<2x16x1xf32>
    "tpu.trace_stop"() : () -> ()
    %63 = vector.shape_cast %62 : vector<2x16x1xf32> to vector<32x1xf32>
    %64 = vector.extract_strided_slice %32 {offsets = [0, 0], sizes = [1, 16], strides = [1, 1]} : vector<4x16xf32> to vector<1x16xf32>
    %65 = vector.broadcast %63 : vector<32x1xf32> to vector<32x16xf32>
    %66 = vector.broadcast %64 : vector<1x16xf32> to vector<32x16xf32>
    %67 = arith.mulf %65, %66 : vector<32x16xf32>
    %68 = vector.broadcast %33 : vector<1x16xf32> to vector<32x16xf32>
    %69 = arith.addf %68, %67 : vector<32x16xf32>
    %70 = vector.extract_strided_slice %43 {offsets = [0, 10], sizes = [32, 10], strides = [1, 1]} : vector<32x84xbf16> to vector<32x10xbf16>
    %71 = vector.shape_cast %70 : vector<32x10xbf16> to vector<2x16x10xbf16>
    %72 = vector.extract_strided_slice %43 {offsets = [0, 50], sizes = [32, 10], strides = [1, 1]} : vector<32x84xbf16> to vector<32x10xbf16>
    %73 = vector.shape_cast %72 : vector<32x10xbf16> to vector<2x16x10xbf16>
    %74 = vector.extract_strided_slice %43 {offsets = [0, 81], sizes = [32, 1], strides = [1, 1]} : vector<32x84xbf16> to vector<32x1xbf16>
    %75 = vector.shape_cast %74 : vector<32x1xbf16> to vector<2x16x1xbf16>
    "tpu.trace_start"() <{level = 10 : i32, message = "bqd,bkd->bqk"}> : () -> ()
    %cst_18 = arith.constant dense<0.000000e+00> : vector<2x16x16xf32>
    %76 = tpu.matmul %71, %73, %cst_18 {dimension_numbers = #tpu.dot_dimension_numbers<[2], [2], [1], [1], [0, 0, 0, 1, 1, 1], [0], [0]>} : vector<2x16x10xbf16>, vector<2x16x10xbf16>, vector<2x16x16xf32> -> vector<2x16x16xf32>
    "tpu.trace_stop"() : () -> ()
    %cst_19 = arith.constant dense<0xFF800000> : vector<2x16xf32>
    %77 = vector.multi_reduction <maximumf>, %76, %cst_19 [2] : vector<2x16x16xf32> to vector<2x16xf32>
    %78 = vector.shape_cast %77 : vector<2x16xf32> to vector<2x16x1xf32>
    %79 = vector.broadcast %78 : vector<2x16x1xf32> to vector<2x16x16xf32>
    %80 = arith.subf %76, %79 : vector<2x16x16xf32>
    %81 = math.exp %80 : vector<2x16x16xf32>
    %cst_20 = arith.constant dense<0.000000e+00> : vector<2x16xf32>
    %82 = vector.multi_reduction <add>, %81, %cst_20 [2] : vector<2x16x16xf32> to vector<2x16xf32>
    %83 = vector.shape_cast %82 : vector<2x16xf32> to vector<2x16x1xf32>
    %84 = tpu.reciprocal %83 {approx = true} : vector<2x16x1xf32> -> vector<2x16x1xf32>
    %85 = vector.broadcast %84 : vector<2x16x1xf32> to vector<2x16x16xf32>
    %86 = arith.mulf %81, %85 : vector<2x16x16xf32>
    %87 = arith.truncf %86 : vector<2x16x16xf32> to vector<2x16x16xbf16>
    "tpu.trace_start"() <{level = 10 : i32, message = "bqk,bkv->bqv"}> : () -> ()
    %cst_21 = arith.constant dense<0.000000e+00> : vector<2x16x1xf32>
    %88 = tpu.matmul %87, %75, %cst_21 {dimension_numbers = #tpu.dot_dimension_numbers<[2], [1], [1], [2], [0, 0, 0, 1, 1, 2], [0], [0]>} : vector<2x16x16xbf16>, vector<2x16x1xbf16>, vector<2x16x1xf32> -> vector<2x16x1xf32>
    "tpu.trace_stop"() : () -> ()
    %89 = vector.shape_cast %88 : vector<2x16x1xf32> to vector<32x1xf32>
    %90 = vector.extract_strided_slice %32 {offsets = [1, 0], sizes = [1, 16], strides = [1, 1]} : vector<4x16xf32> to vector<1x16xf32>
    %91 = vector.broadcast %89 : vector<32x1xf32> to vector<32x16xf32>
    %92 = vector.broadcast %90 : vector<1x16xf32> to vector<32x16xf32>
    %93 = arith.mulf %91, %92 : vector<32x16xf32>
    %94 = arith.addf %69, %93 : vector<32x16xf32>
    %95 = vector.extract_strided_slice %43 {offsets = [0, 20], sizes = [32, 10], strides = [1, 1]} : vector<32x84xbf16> to vector<32x10xbf16>
    %96 = vector.shape_cast %95 : vector<32x10xbf16> to vector<2x16x10xbf16>
    %97 = vector.extract_strided_slice %43 {offsets = [0, 60], sizes = [32, 10], strides = [1, 1]} : vector<32x84xbf16> to vector<32x10xbf16>
    %98 = vector.shape_cast %97 : vector<32x10xbf16> to vector<2x16x10xbf16>
    %99 = vector.extract_strided_slice %43 {offsets = [0, 82], sizes = [32, 1], strides = [1, 1]} : vector<32x84xbf16> to vector<32x1xbf16>
    %100 = vector.shape_cast %99 : vector<32x1xbf16> to vector<2x16x1xbf16>
    "tpu.trace_start"() <{level = 10 : i32, message = "bqd,bkd->bqk"}> : () -> ()
    %cst_22 = arith.constant dense<0.000000e+00> : vector<2x16x16xf32>
    %101 = tpu.matmul %96, %98, %cst_22 {dimension_numbers = #tpu.dot_dimension_numbers<[2], [2], [1], [1], [0, 0, 0, 1, 1, 1], [0], [0]>} : vector<2x16x10xbf16>, vector<2x16x10xbf16>, vector<2x16x16xf32> -> vector<2x16x16xf32>
    "tpu.trace_stop"() : () -> ()
    %cst_23 = arith.constant dense<0xFF800000> : vector<2x16xf32>
    %102 = vector.multi_reduction <maximumf>, %101, %cst_23 [2] : vector<2x16x16xf32> to vector<2x16xf32>
    %103 = vector.shape_cast %102 : vector<2x16xf32> to vector<2x16x1xf32>
    %104 = vector.broadcast %103 : vector<2x16x1xf32> to vector<2x16x16xf32>
    %105 = arith.subf %101, %104 : vector<2x16x16xf32>
    %106 = math.exp %105 : vector<2x16x16xf32>
    %cst_24 = arith.constant dense<0.000000e+00> : vector<2x16xf32>
    %107 = vector.multi_reduction <add>, %106, %cst_24 [2] : vector<2x16x16xf32> to vector<2x16xf32>
    %108 = vector.shape_cast %107 : vector<2x16xf32> to vector<2x16x1xf32>
    %109 = tpu.reciprocal %108 {approx = true} : vector<2x16x1xf32> -> vector<2x16x1xf32>
    %110 = vector.broadcast %109 : vector<2x16x1xf32> to vector<2x16x16xf32>
    %111 = arith.mulf %106, %110 : vector<2x16x16xf32>
    %112 = arith.truncf %111 : vector<2x16x16xf32> to vector<2x16x16xbf16>
    "tpu.trace_start"() <{level = 10 : i32, message = "bqk,bkv->bqv"}> : () -> ()
    %cst_25 = arith.constant dense<0.000000e+00> : vector<2x16x1xf32>
    %113 = tpu.matmul %112, %100, %cst_25 {dimension_numbers = #tpu.dot_dimension_numbers<[2], [1], [1], [2], [0, 0, 0, 1, 1, 2], [0], [0]>} : vector<2x16x16xbf16>, vector<2x16x1xbf16>, vector<2x16x1xf32> -> vector<2x16x1xf32>
    "tpu.trace_stop"() : () -> ()
    %114 = vector.shape_cast %113 : vector<2x16x1xf32> to vector<32x1xf32>
    %115 = vector.extract_strided_slice %32 {offsets = [2, 0], sizes = [1, 16], strides = [1, 1]} : vector<4x16xf32> to vector<1x16xf32>
    %116 = vector.broadcast %114 : vector<32x1xf32> to vector<32x16xf32>
    %117 = vector.broadcast %115 : vector<1x16xf32> to vector<32x16xf32>
    %118 = arith.mulf %116, %117 : vector<32x16xf32>
    %119 = arith.addf %94, %118 : vector<32x16xf32>
    %120 = vector.extract_strided_slice %43 {offsets = [0, 30], sizes = [32, 10], strides = [1, 1]} : vector<32x84xbf16> to vector<32x10xbf16>
    %121 = vector.shape_cast %120 : vector<32x10xbf16> to vector<2x16x10xbf16>
    %122 = vector.extract_strided_slice %43 {offsets = [0, 70], sizes = [32, 10], strides = [1, 1]} : vector<32x84xbf16> to vector<32x10xbf16>
    %123 = vector.shape_cast %122 : vector<32x10xbf16> to vector<2x16x10xbf16>
    %124 = vector.extract_strided_slice %43 {offsets = [0, 83], sizes = [32, 1], strides = [1, 1]} : vector<32x84xbf16> to vector<32x1xbf16>
    %125 = vector.shape_cast %124 : vector<32x1xbf16> to vector<2x16x1xbf16>
    "tpu.trace_start"() <{level = 10 : i32, message = "bqd,bkd->bqk"}> : () -> ()
    %cst_26 = arith.constant dense<0.000000e+00> : vector<2x16x16xf32>
    %126 = tpu.matmul %121, %123, %cst_26 {dimension_numbers = #tpu.dot_dimension_numbers<[2], [2], [1], [1], [0, 0, 0, 1, 1, 1], [0], [0]>} : vector<2x16x10xbf16>, vector<2x16x10xbf16>, vector<2x16x16xf32> -> vector<2x16x16xf32>
    "tpu.trace_stop"() : () -> ()
    %cst_27 = arith.constant dense<0xFF800000> : vector<2x16xf32>
    %127 = vector.multi_reduction <maximumf>, %126, %cst_27 [2] : vector<2x16x16xf32> to vector<2x16xf32>
    %128 = vector.shape_cast %127 : vector<2x16xf32> to vector<2x16x1xf32>
    %129 = vector.broadcast %128 : vector<2x16x1xf32> to vector<2x16x16xf32>
    %130 = arith.subf %126, %129 : vector<2x16x16xf32>
    %131 = math.exp %130 : vector<2x16x16xf32>
    %cst_28 = arith.constant dense<0.000000e+00> : vector<2x16xf32>
    %132 = vector.multi_reduction <add>, %131, %cst_28 [2] : vector<2x16x16xf32> to vector<2x16xf32>
    %133 = vector.shape_cast %132 : vector<2x16xf32> to vector<2x16x1xf32>
    %134 = tpu.reciprocal %133 {approx = true} : vector<2x16x1xf32> -> vector<2x16x1xf32>
    %135 = vector.broadcast %134 : vector<2x16x1xf32> to vector<2x16x16xf32>
    %136 = arith.mulf %131, %135 : vector<2x16x16xf32>
    %137 = arith.truncf %136 : vector<2x16x16xf32> to vector<2x16x16xbf16>
    "tpu.trace_start"() <{level = 10 : i32, message = "bqk,bkv->bqv"}> : () -> ()
    %cst_29 = arith.constant dense<0.000000e+00> : vector<2x16x1xf32>
    %138 = tpu.matmul %137, %125, %cst_29 {dimension_numbers = #tpu.dot_dimension_numbers<[2], [1], [1], [2], [0, 0, 0, 1, 1, 2], [0], [0]>} : vector<2x16x16xbf16>, vector<2x16x1xbf16>, vector<2x16x1xf32> -> vector<2x16x1xf32>
    "tpu.trace_stop"() : () -> ()
    %139 = vector.shape_cast %138 : vector<2x16x1xf32> to vector<32x1xf32>
    %140 = vector.extract_strided_slice %32 {offsets = [3, 0], sizes = [1, 16], strides = [1, 1]} : vector<4x16xf32> to vector<1x16xf32>
    %141 = vector.broadcast %139 : vector<32x1xf32> to vector<32x16xf32>
    %142 = vector.broadcast %140 : vector<1x16xf32> to vector<32x16xf32>
    %143 = arith.mulf %141, %142 : vector<32x16xf32>
    %144 = arith.addf %119, %143 : vector<32x16xf32>
    %145 = arith.addf %41, %144 : vector<32x16xf32>
    %cst_30 = arith.constant 0.000000e+00 : f32
    %146 = vector.broadcast %cst_30 : f32 to vector<32x16xf32>
    %147 = arith.maximumf %145, %146 : vector<32x16xf32>
    %c0_31 = arith.constant 0 : index
    %c0_32 = arith.constant 0 : index
    %c0_33 = arith.constant 0 : index
    %148 = vector.load %arg6[%c0_31, %c0_32, %c0_33] : memref<3x16x96xbf16, #tpu.memory_space<vmem>>, vector<3x16x96xbf16>
    %c0_34 = arith.constant 0 : index
    %c0_35 = arith.constant 0 : index
    %149 = vector.load %arg7[%c0_34, %c0_35] : memref<1x96xf32, #tpu.memory_space<vmem>>, vector<1x96xf32>
    %c0_36 = arith.constant 0 : index
    %c0_37 = arith.constant 0 : index
    %150 = vector.load %arg8[%c0_36, %c0_37] : memref<4x16xf32, #tpu.memory_space<vmem>>, vector<4x16xf32>
    %c0_38 = arith.constant 0 : index
    %c0_39 = arith.constant 0 : index
    %151 = vector.load %arg9[%c0_38, %c0_39] : memref<1x16xf32, #tpu.memory_space<vmem>>, vector<1x16xf32>
    %cst_40 = arith.constant 0.000000e+00 : f32
    %152 = vector.broadcast %cst_40 : f32 to vector<1x16xf32>
    %153 = vector.extract_strided_slice %147 {offsets = [0, 0], sizes = [31, 16], strides = [1, 1]} : vector<32x16xf32> to vector<31x16xf32>
    %154 = tpu.concatenate %152, %153 in 0 : vector<1x16xf32>, vector<31x16xf32> -> vector<32x16xf32>
    %155 = vector.extract_strided_slice %147 {offsets = [1, 0], sizes = [31, 16], strides = [1, 1]} : vector<32x16xf32> to vector<31x16xf32>
    %156 = tpu.concatenate %155, %152 in 0 : vector<31x16xf32>, vector<1x16xf32> -> vector<32x16xf32>
    %157 = vector.broadcast %20 : vector<32x1xf32> to vector<32x16xf32>
    %158 = arith.mulf %154, %157 : vector<32x16xf32>
    %159 = arith.truncf %158 : vector<32x16xf32> to vector<32x16xbf16>
    %160 = vector.broadcast %24 : vector<32x1xf32> to vector<32x16xf32>
    %161 = arith.mulf %156, %160 : vector<32x16xf32>
    %162 = arith.truncf %161 : vector<32x16xf32> to vector<32x16xbf16>
    %163 = arith.truncf %147 : vector<32x16xf32> to vector<32x16xbf16>
    %164 = vector.extract_strided_slice %148 {offsets = [0, 0, 0], sizes = [1, 16, 96], strides = [1, 1, 1]} : vector<3x16x96xbf16> to vector<1x16x96xbf16>
    %165 = vector.shape_cast %164 : vector<1x16x96xbf16> to vector<16x96xbf16>
    %cst_41 = arith.constant dense<0.000000e+00> : vector<32x96xf32>
    %166 = tpu.matmul %159, %165, %cst_41 {dimension_numbers = #tpu.dot_dimension_numbers<[1], [0], [0], [1], [0, 0, 1, 1], [], []>} : vector<32x16xbf16>, vector<16x96xbf16>, vector<32x96xf32> -> vector<32x96xf32>
    %167 = vector.extract_strided_slice %148 {offsets = [1, 0, 0], sizes = [1, 16, 96], strides = [1, 1, 1]} : vector<3x16x96xbf16> to vector<1x16x96xbf16>
    %168 = vector.shape_cast %167 : vector<1x16x96xbf16> to vector<16x96xbf16>
    %cst_42 = arith.constant dense<0.000000e+00> : vector<32x96xf32>
    %169 = tpu.matmul %163, %168, %cst_42 {dimension_numbers = #tpu.dot_dimension_numbers<[1], [0], [0], [1], [0, 0, 1, 1], [], []>} : vector<32x16xbf16>, vector<16x96xbf16>, vector<32x96xf32> -> vector<32x96xf32>
    %170 = arith.addf %166, %169 : vector<32x96xf32>
    %171 = vector.extract_strided_slice %148 {offsets = [2, 0, 0], sizes = [1, 16, 96], strides = [1, 1, 1]} : vector<3x16x96xbf16> to vector<1x16x96xbf16>
    %172 = vector.shape_cast %171 : vector<1x16x96xbf16> to vector<16x96xbf16>
    %cst_43 = arith.constant dense<0.000000e+00> : vector<32x96xf32>
    %173 = tpu.matmul %162, %172, %cst_43 {dimension_numbers = #tpu.dot_dimension_numbers<[1], [0], [0], [1], [0, 0, 1, 1], [], []>} : vector<32x16xbf16>, vector<16x96xbf16>, vector<32x96xf32> -> vector<32x96xf32>
    %174 = arith.addf %170, %173 : vector<32x96xf32>
    %175 = vector.broadcast %149 : vector<1x96xf32> to vector<32x96xf32>
    %176 = arith.addf %174, %175 : vector<32x96xf32>
    %177 = vector.extract_strided_slice %176 {offsets = [0, 0], sizes = [32, 16], strides = [1, 1]} : vector<32x96xf32> to vector<32x16xf32>
    %178 = vector.broadcast %29 : vector<1x16xf32> to vector<32x16xf32>
    %179 = arith.mulf %177, %178 : vector<32x16xf32>
    %180 = vector.extract_strided_slice %176 {offsets = [0, 12], sizes = [32, 84], strides = [1, 1]} : vector<32x96xf32> to vector<32x84xf32>
    %181 = arith.truncf %180 : vector<32x84xf32> to vector<32x84xbf16>
    %182 = vector.extract_strided_slice %181 {offsets = [0, 0], sizes = [32, 10], strides = [1, 1]} : vector<32x84xbf16> to vector<32x10xbf16>
    %183 = vector.shape_cast %182 : vector<32x10xbf16> to vector<2x16x10xbf16>
    %184 = vector.extract_strided_slice %181 {offsets = [0, 40], sizes = [32, 10], strides = [1, 1]} : vector<32x84xbf16> to vector<32x10xbf16>
    %185 = vector.shape_cast %184 : vector<32x10xbf16> to vector<2x16x10xbf16>
    %186 = vector.extract_strided_slice %181 {offsets = [0, 80], sizes = [32, 1], strides = [1, 1]} : vector<32x84xbf16> to vector<32x1xbf16>
    %187 = vector.shape_cast %186 : vector<32x1xbf16> to vector<2x16x1xbf16>
    "tpu.trace_start"() <{level = 10 : i32, message = "bqd,bkd->bqk"}> : () -> ()
    %cst_44 = arith.constant dense<0.000000e+00> : vector<2x16x16xf32>
    %188 = tpu.matmul %183, %185, %cst_44 {dimension_numbers = #tpu.dot_dimension_numbers<[2], [2], [1], [1], [0, 0, 0, 1, 1, 1], [0], [0]>} : vector<2x16x10xbf16>, vector<2x16x10xbf16>, vector<2x16x16xf32> -> vector<2x16x16xf32>
    "tpu.trace_stop"() : () -> ()
    %cst_45 = arith.constant dense<0xFF800000> : vector<2x16xf32>
    %189 = vector.multi_reduction <maximumf>, %188, %cst_45 [2] : vector<2x16x16xf32> to vector<2x16xf32>
    %190 = vector.shape_cast %189 : vector<2x16xf32> to vector<2x16x1xf32>
    %191 = vector.broadcast %190 : vector<2x16x1xf32> to vector<2x16x16xf32>
    %192 = arith.subf %188, %191 : vector<2x16x16xf32>
    %193 = math.exp %192 : vector<2x16x16xf32>
    %cst_46 = arith.constant dense<0.000000e+00> : vector<2x16xf32>
    %194 = vector.multi_reduction <add>, %193, %cst_46 [2] : vector<2x16x16xf32> to vector<2x16xf32>
    %195 = vector.shape_cast %194 : vector<2x16xf32> to vector<2x16x1xf32>
    %196 = tpu.reciprocal %195 {approx = true} : vector<2x16x1xf32> -> vector<2x16x1xf32>
    %197 = vector.broadcast %196 : vector<2x16x1xf32> to vector<2x16x16xf32>
    %198 = arith.mulf %193, %197 : vector<2x16x16xf32>
    %199 = arith.truncf %198 : vector<2x16x16xf32> to vector<2x16x16xbf16>
    "tpu.trace_start"() <{level = 10 : i32, message = "bqk,bkv->bqv"}> : () -> ()
    %cst_47 = arith.constant dense<0.000000e+00> : vector<2x16x1xf32>
    %200 = tpu.matmul %199, %187, %cst_47 {dimension_numbers = #tpu.dot_dimension_numbers<[2], [1], [1], [2], [0, 0, 0, 1, 1, 2], [0], [0]>} : vector<2x16x16xbf16>, vector<2x16x1xbf16>, vector<2x16x1xf32> -> vector<2x16x1xf32>
    "tpu.trace_stop"() : () -> ()
    %201 = vector.shape_cast %200 : vector<2x16x1xf32> to vector<32x1xf32>
    %202 = vector.extract_strided_slice %150 {offsets = [0, 0], sizes = [1, 16], strides = [1, 1]} : vector<4x16xf32> to vector<1x16xf32>
    %203 = vector.broadcast %201 : vector<32x1xf32> to vector<32x16xf32>
    %204 = vector.broadcast %202 : vector<1x16xf32> to vector<32x16xf32>
    %205 = arith.mulf %203, %204 : vector<32x16xf32>
    %206 = vector.broadcast %151 : vector<1x16xf32> to vector<32x16xf32>
    %207 = arith.addf %206, %205 : vector<32x16xf32>
    %208 = vector.extract_strided_slice %181 {offsets = [0, 10], sizes = [32, 10], strides = [1, 1]} : vector<32x84xbf16> to vector<32x10xbf16>
    %209 = vector.shape_cast %208 : vector<32x10xbf16> to vector<2x16x10xbf16>
    %210 = vector.extract_strided_slice %181 {offsets = [0, 50], sizes = [32, 10], strides = [1, 1]} : vector<32x84xbf16> to vector<32x10xbf16>
    %211 = vector.shape_cast %210 : vector<32x10xbf16> to vector<2x16x10xbf16>
    %212 = vector.extract_strided_slice %181 {offsets = [0, 81], sizes = [32, 1], strides = [1, 1]} : vector<32x84xbf16> to vector<32x1xbf16>
    %213 = vector.shape_cast %212 : vector<32x1xbf16> to vector<2x16x1xbf16>
    "tpu.trace_start"() <{level = 10 : i32, message = "bqd,bkd->bqk"}> : () -> ()
    %cst_48 = arith.constant dense<0.000000e+00> : vector<2x16x16xf32>
    %214 = tpu.matmul %209, %211, %cst_48 {dimension_numbers = #tpu.dot_dimension_numbers<[2], [2], [1], [1], [0, 0, 0, 1, 1, 1], [0], [0]>} : vector<2x16x10xbf16>, vector<2x16x10xbf16>, vector<2x16x16xf32> -> vector<2x16x16xf32>
    "tpu.trace_stop"() : () -> ()
    %cst_49 = arith.constant dense<0xFF800000> : vector<2x16xf32>
    %215 = vector.multi_reduction <maximumf>, %214, %cst_49 [2] : vector<2x16x16xf32> to vector<2x16xf32>
    %216 = vector.shape_cast %215 : vector<2x16xf32> to vector<2x16x1xf32>
    %217 = vector.broadcast %216 : vector<2x16x1xf32> to vector<2x16x16xf32>
    %218 = arith.subf %214, %217 : vector<2x16x16xf32>
    %219 = math.exp %218 : vector<2x16x16xf32>
    %cst_50 = arith.constant dense<0.000000e+00> : vector<2x16xf32>
    %220 = vector.multi_reduction <add>, %219, %cst_50 [2] : vector<2x16x16xf32> to vector<2x16xf32>
    %221 = vector.shape_cast %220 : vector<2x16xf32> to vector<2x16x1xf32>
    %222 = tpu.reciprocal %221 {approx = true} : vector<2x16x1xf32> -> vector<2x16x1xf32>
    %223 = vector.broadcast %222 : vector<2x16x1xf32> to vector<2x16x16xf32>
    %224 = arith.mulf %219, %223 : vector<2x16x16xf32>
    %225 = arith.truncf %224 : vector<2x16x16xf32> to vector<2x16x16xbf16>
    "tpu.trace_start"() <{level = 10 : i32, message = "bqk,bkv->bqv"}> : () -> ()
    %cst_51 = arith.constant dense<0.000000e+00> : vector<2x16x1xf32>
    %226 = tpu.matmul %225, %213, %cst_51 {dimension_numbers = #tpu.dot_dimension_numbers<[2], [1], [1], [2], [0, 0, 0, 1, 1, 2], [0], [0]>} : vector<2x16x16xbf16>, vector<2x16x1xbf16>, vector<2x16x1xf32> -> vector<2x16x1xf32>
    "tpu.trace_stop"() : () -> ()
    %227 = vector.shape_cast %226 : vector<2x16x1xf32> to vector<32x1xf32>
    %228 = vector.extract_strided_slice %150 {offsets = [1, 0], sizes = [1, 16], strides = [1, 1]} : vector<4x16xf32> to vector<1x16xf32>
    %229 = vector.broadcast %227 : vector<32x1xf32> to vector<32x16xf32>
    %230 = vector.broadcast %228 : vector<1x16xf32> to vector<32x16xf32>
    %231 = arith.mulf %229, %230 : vector<32x16xf32>
    %232 = arith.addf %207, %231 : vector<32x16xf32>
    %233 = vector.extract_strided_slice %181 {offsets = [0, 20], sizes = [32, 10], strides = [1, 1]} : vector<32x84xbf16> to vector<32x10xbf16>
    %234 = vector.shape_cast %233 : vector<32x10xbf16> to vector<2x16x10xbf16>
    %235 = vector.extract_strided_slice %181 {offsets = [0, 60], sizes = [32, 10], strides = [1, 1]} : vector<32x84xbf16> to vector<32x10xbf16>
    %236 = vector.shape_cast %235 : vector<32x10xbf16> to vector<2x16x10xbf16>
    %237 = vector.extract_strided_slice %181 {offsets = [0, 82], sizes = [32, 1], strides = [1, 1]} : vector<32x84xbf16> to vector<32x1xbf16>
    %238 = vector.shape_cast %237 : vector<32x1xbf16> to vector<2x16x1xbf16>
    "tpu.trace_start"() <{level = 10 : i32, message = "bqd,bkd->bqk"}> : () -> ()
    %cst_52 = arith.constant dense<0.000000e+00> : vector<2x16x16xf32>
    %239 = tpu.matmul %234, %236, %cst_52 {dimension_numbers = #tpu.dot_dimension_numbers<[2], [2], [1], [1], [0, 0, 0, 1, 1, 1], [0], [0]>} : vector<2x16x10xbf16>, vector<2x16x10xbf16>, vector<2x16x16xf32> -> vector<2x16x16xf32>
    "tpu.trace_stop"() : () -> ()
    %cst_53 = arith.constant dense<0xFF800000> : vector<2x16xf32>
    %240 = vector.multi_reduction <maximumf>, %239, %cst_53 [2] : vector<2x16x16xf32> to vector<2x16xf32>
    %241 = vector.shape_cast %240 : vector<2x16xf32> to vector<2x16x1xf32>
    %242 = vector.broadcast %241 : vector<2x16x1xf32> to vector<2x16x16xf32>
    %243 = arith.subf %239, %242 : vector<2x16x16xf32>
    %244 = math.exp %243 : vector<2x16x16xf32>
    %cst_54 = arith.constant dense<0.000000e+00> : vector<2x16xf32>
    %245 = vector.multi_reduction <add>, %244, %cst_54 [2] : vector<2x16x16xf32> to vector<2x16xf32>
    %246 = vector.shape_cast %245 : vector<2x16xf32> to vector<2x16x1xf32>
    %247 = tpu.reciprocal %246 {approx = true} : vector<2x16x1xf32> -> vector<2x16x1xf32>
    %248 = vector.broadcast %247 : vector<2x16x1xf32> to vector<2x16x16xf32>
    %249 = arith.mulf %244, %248 : vector<2x16x16xf32>
    %250 = arith.truncf %249 : vector<2x16x16xf32> to vector<2x16x16xbf16>
    "tpu.trace_start"() <{level = 10 : i32, message = "bqk,bkv->bqv"}> : () -> ()
    %cst_55 = arith.constant dense<0.000000e+00> : vector<2x16x1xf32>
    %251 = tpu.matmul %250, %238, %cst_55 {dimension_numbers = #tpu.dot_dimension_numbers<[2], [1], [1], [2], [0, 0, 0, 1, 1, 2], [0], [0]>} : vector<2x16x16xbf16>, vector<2x16x1xbf16>, vector<2x16x1xf32> -> vector<2x16x1xf32>
    "tpu.trace_stop"() : () -> ()
    %252 = vector.shape_cast %251 : vector<2x16x1xf32> to vector<32x1xf32>
    %253 = vector.extract_strided_slice %150 {offsets = [2, 0], sizes = [1, 16], strides = [1, 1]} : vector<4x16xf32> to vector<1x16xf32>
    %254 = vector.broadcast %252 : vector<32x1xf32> to vector<32x16xf32>
    %255 = vector.broadcast %253 : vector<1x16xf32> to vector<32x16xf32>
    %256 = arith.mulf %254, %255 : vector<32x16xf32>
    %257 = arith.addf %232, %256 : vector<32x16xf32>
    %258 = vector.extract_strided_slice %181 {offsets = [0, 30], sizes = [32, 10], strides = [1, 1]} : vector<32x84xbf16> to vector<32x10xbf16>
    %259 = vector.shape_cast %258 : vector<32x10xbf16> to vector<2x16x10xbf16>
    %260 = vector.extract_strided_slice %181 {offsets = [0, 70], sizes = [32, 10], strides = [1, 1]} : vector<32x84xbf16> to vector<32x10xbf16>
    %261 = vector.shape_cast %260 : vector<32x10xbf16> to vector<2x16x10xbf16>
    %262 = vector.extract_strided_slice %181 {offsets = [0, 83], sizes = [32, 1], strides = [1, 1]} : vector<32x84xbf16> to vector<32x1xbf16>
    %263 = vector.shape_cast %262 : vector<32x1xbf16> to vector<2x16x1xbf16>
    "tpu.trace_start"() <{level = 10 : i32, message = "bqd,bkd->bqk"}> : () -> ()
    %cst_56 = arith.constant dense<0.000000e+00> : vector<2x16x16xf32>
    %264 = tpu.matmul %259, %261, %cst_56 {dimension_numbers = #tpu.dot_dimension_numbers<[2], [2], [1], [1], [0, 0, 0, 1, 1, 1], [0], [0]>} : vector<2x16x10xbf16>, vector<2x16x10xbf16>, vector<2x16x16xf32> -> vector<2x16x16xf32>
    "tpu.trace_stop"() : () -> ()
    %cst_57 = arith.constant dense<0xFF800000> : vector<2x16xf32>
    %265 = vector.multi_reduction <maximumf>, %264, %cst_57 [2] : vector<2x16x16xf32> to vector<2x16xf32>
    %266 = vector.shape_cast %265 : vector<2x16xf32> to vector<2x16x1xf32>
    %267 = vector.broadcast %266 : vector<2x16x1xf32> to vector<2x16x16xf32>
    %268 = arith.subf %264, %267 : vector<2x16x16xf32>
    %269 = math.exp %268 : vector<2x16x16xf32>
    %cst_58 = arith.constant dense<0.000000e+00> : vector<2x16xf32>
    %270 = vector.multi_reduction <add>, %269, %cst_58 [2] : vector<2x16x16xf32> to vector<2x16xf32>
    %271 = vector.shape_cast %270 : vector<2x16xf32> to vector<2x16x1xf32>
    %272 = tpu.reciprocal %271 {approx = true} : vector<2x16x1xf32> -> vector<2x16x1xf32>
    %273 = vector.broadcast %272 : vector<2x16x1xf32> to vector<2x16x16xf32>
    %274 = arith.mulf %269, %273 : vector<2x16x16xf32>
    %275 = arith.truncf %274 : vector<2x16x16xf32> to vector<2x16x16xbf16>
    "tpu.trace_start"() <{level = 10 : i32, message = "bqk,bkv->bqv"}> : () -> ()
    %cst_59 = arith.constant dense<0.000000e+00> : vector<2x16x1xf32>
    %276 = tpu.matmul %275, %263, %cst_59 {dimension_numbers = #tpu.dot_dimension_numbers<[2], [1], [1], [2], [0, 0, 0, 1, 1, 2], [0], [0]>} : vector<2x16x16xbf16>, vector<2x16x1xbf16>, vector<2x16x1xf32> -> vector<2x16x1xf32>
    "tpu.trace_stop"() : () -> ()
    %277 = vector.shape_cast %276 : vector<2x16x1xf32> to vector<32x1xf32>
    %278 = vector.extract_strided_slice %150 {offsets = [3, 0], sizes = [1, 16], strides = [1, 1]} : vector<4x16xf32> to vector<1x16xf32>
    %279 = vector.broadcast %277 : vector<32x1xf32> to vector<32x16xf32>
    %280 = vector.broadcast %278 : vector<1x16xf32> to vector<32x16xf32>
    %281 = arith.mulf %279, %280 : vector<32x16xf32>
    %282 = arith.addf %257, %281 : vector<32x16xf32>
    %283 = arith.addf %179, %282 : vector<32x16xf32>
    %cst_60 = arith.constant 0.000000e+00 : f32
    %284 = vector.broadcast %cst_60 : f32 to vector<32x16xf32>
    %285 = arith.maximumf %283, %284 : vector<32x16xf32>
    %286 = arith.addf %285, %147 : vector<32x16xf32>
    %287 = vector.shape_cast %286 : vector<32x16xf32> to vector<2x16x16xf32>
    %288 = arith.truncf %287 : vector<2x16x16xf32> to vector<2x16x16xbf16>
    %c0_61 = arith.constant 0 : index
    %c0_62 = arith.constant 0 : index
    %c0_63 = arith.constant 0 : index
    %289 = vector.load %arg10[%c0_61, %c0_62, %c0_63] : memref<16x16x32xbf16, #tpu.memory_space<vmem>>, vector<16x16x32xbf16>
    %cst_64 = arith.constant 0.000000e+00 : f32
    %290 = vector.broadcast %cst_64 : f32 to vector<2x32xf32>
    %291 = vector.extract_strided_slice %288 {offsets = [0, 0, 0], sizes = [2, 1, 16], strides = [1, 1, 1]} : vector<2x16x16xbf16> to vector<2x1x16xbf16>
    %292 = vector.shape_cast %291 : vector<2x1x16xbf16> to vector<2x16xbf16>
    %293 = vector.extract_strided_slice %289 {offsets = [0, 0, 0], sizes = [1, 16, 32], strides = [1, 1, 1]} : vector<16x16x32xbf16> to vector<1x16x32xbf16>
    %294 = vector.shape_cast %293 : vector<1x16x32xbf16> to vector<16x32xbf16>
    %cst_65 = arith.constant dense<0.000000e+00> : vector<2x32xf32>
    %295 = tpu.matmul %292, %294, %cst_65 {dimension_numbers = #tpu.dot_dimension_numbers<[1], [0], [0], [1], [0, 0, 1, 1], [], []>} : vector<2x16xbf16>, vector<16x32xbf16>, vector<2x32xf32> -> vector<2x32xf32>
    %296 = arith.addf %290, %295 : vector<2x32xf32>
    %297 = vector.extract_strided_slice %288 {offsets = [0, 1, 0], sizes = [2, 1, 16], strides = [1, 1, 1]} : vector<2x16x16xbf16> to vector<2x1x16xbf16>
    %298 = vector.shape_cast %297 : vector<2x1x16xbf16> to vector<2x16xbf16>
    %299 = vector.extract_strided_slice %289 {offsets = [1, 0, 0], sizes = [1, 16, 32], strides = [1, 1, 1]} : vector<16x16x32xbf16> to vector<1x16x32xbf16>
    %300 = vector.shape_cast %299 : vector<1x16x32xbf16> to vector<16x32xbf16>
    %cst_66 = arith.constant dense<0.000000e+00> : vector<2x32xf32>
    %301 = tpu.matmul %298, %300, %cst_66 {dimension_numbers = #tpu.dot_dimension_numbers<[1], [0], [0], [1], [0, 0, 1, 1], [], []>} : vector<2x16xbf16>, vector<16x32xbf16>, vector<2x32xf32> -> vector<2x32xf32>
    %302 = arith.addf %296, %301 : vector<2x32xf32>
    %303 = vector.extract_strided_slice %288 {offsets = [0, 2, 0], sizes = [2, 1, 16], strides = [1, 1, 1]} : vector<2x16x16xbf16> to vector<2x1x16xbf16>
    %304 = vector.shape_cast %303 : vector<2x1x16xbf16> to vector<2x16xbf16>
    %305 = vector.extract_strided_slice %289 {offsets = [2, 0, 0], sizes = [1, 16, 32], strides = [1, 1, 1]} : vector<16x16x32xbf16> to vector<1x16x32xbf16>
    %306 = vector.shape_cast %305 : vector<1x16x32xbf16> to vector<16x32xbf16>
    %cst_67 = arith.constant dense<0.000000e+00> : vector<2x32xf32>
    %307 = tpu.matmul %304, %306, %cst_67 {dimension_numbers = #tpu.dot_dimension_numbers<[1], [0], [0], [1], [0, 0, 1, 1], [], []>} : vector<2x16xbf16>, vector<16x32xbf16>, vector<2x32xf32> -> vector<2x32xf32>
    %308 = arith.addf %302, %307 : vector<2x32xf32>
    %309 = vector.extract_strided_slice %288 {offsets = [0, 3, 0], sizes = [2, 1, 16], strides = [1, 1, 1]} : vector<2x16x16xbf16> to vector<2x1x16xbf16>
    %310 = vector.shape_cast %309 : vector<2x1x16xbf16> to vector<2x16xbf16>
    %311 = vector.extract_strided_slice %289 {offsets = [3, 0, 0], sizes = [1, 16, 32], strides = [1, 1, 1]} : vector<16x16x32xbf16> to vector<1x16x32xbf16>
    %312 = vector.shape_cast %311 : vector<1x16x32xbf16> to vector<16x32xbf16>
    %cst_68 = arith.constant dense<0.000000e+00> : vector<2x32xf32>
    %313 = tpu.matmul %310, %312, %cst_68 {dimension_numbers = #tpu.dot_dimension_numbers<[1], [0], [0], [1], [0, 0, 1, 1], [], []>} : vector<2x16xbf16>, vector<16x32xbf16>, vector<2x32xf32> -> vector<2x32xf32>
    %314 = arith.addf %308, %313 : vector<2x32xf32>
    %315 = vector.extract_strided_slice %288 {offsets = [0, 4, 0], sizes = [2, 1, 16], strides = [1, 1, 1]} : vector<2x16x16xbf16> to vector<2x1x16xbf16>
    %316 = vector.shape_cast %315 : vector<2x1x16xbf16> to vector<2x16xbf16>
    %317 = vector.extract_strided_slice %289 {offsets = [4, 0, 0], sizes = [1, 16, 32], strides = [1, 1, 1]} : vector<16x16x32xbf16> to vector<1x16x32xbf16>
    %318 = vector.shape_cast %317 : vector<1x16x32xbf16> to vector<16x32xbf16>
    %cst_69 = arith.constant dense<0.000000e+00> : vector<2x32xf32>
    %319 = tpu.matmul %316, %318, %cst_69 {dimension_numbers = #tpu.dot_dimension_numbers<[1], [0], [0], [1], [0, 0, 1, 1], [], []>} : vector<2x16xbf16>, vector<16x32xbf16>, vector<2x32xf32> -> vector<2x32xf32>
    %320 = arith.addf %314, %319 : vector<2x32xf32>
    %321 = vector.extract_strided_slice %288 {offsets = [0, 5, 0], sizes = [2, 1, 16], strides = [1, 1, 1]} : vector<2x16x16xbf16> to vector<2x1x16xbf16>
    %322 = vector.shape_cast %321 : vector<2x1x16xbf16> to vector<2x16xbf16>
    %323 = vector.extract_strided_slice %289 {offsets = [5, 0, 0], sizes = [1, 16, 32], strides = [1, 1, 1]} : vector<16x16x32xbf16> to vector<1x16x32xbf16>
    %324 = vector.shape_cast %323 : vector<1x16x32xbf16> to vector<16x32xbf16>
    %cst_70 = arith.constant dense<0.000000e+00> : vector<2x32xf32>
    %325 = tpu.matmul %322, %324, %cst_70 {dimension_numbers = #tpu.dot_dimension_numbers<[1], [0], [0], [1], [0, 0, 1, 1], [], []>} : vector<2x16xbf16>, vector<16x32xbf16>, vector<2x32xf32> -> vector<2x32xf32>
    %326 = arith.addf %320, %325 : vector<2x32xf32>
    %327 = vector.extract_strided_slice %288 {offsets = [0, 6, 0], sizes = [2, 1, 16], strides = [1, 1, 1]} : vector<2x16x16xbf16> to vector<2x1x16xbf16>
    %328 = vector.shape_cast %327 : vector<2x1x16xbf16> to vector<2x16xbf16>
    %329 = vector.extract_strided_slice %289 {offsets = [6, 0, 0], sizes = [1, 16, 32], strides = [1, 1, 1]} : vector<16x16x32xbf16> to vector<1x16x32xbf16>
    %330 = vector.shape_cast %329 : vector<1x16x32xbf16> to vector<16x32xbf16>
    %cst_71 = arith.constant dense<0.000000e+00> : vector<2x32xf32>
    %331 = tpu.matmul %328, %330, %cst_71 {dimension_numbers = #tpu.dot_dimension_numbers<[1], [0], [0], [1], [0, 0, 1, 1], [], []>} : vector<2x16xbf16>, vector<16x32xbf16>, vector<2x32xf32> -> vector<2x32xf32>
    %332 = arith.addf %326, %331 : vector<2x32xf32>
    %333 = vector.extract_strided_slice %288 {offsets = [0, 7, 0], sizes = [2, 1, 16], strides = [1, 1, 1]} : vector<2x16x16xbf16> to vector<2x1x16xbf16>
    %334 = vector.shape_cast %333 : vector<2x1x16xbf16> to vector<2x16xbf16>
    %335 = vector.extract_strided_slice %289 {offsets = [7, 0, 0], sizes = [1, 16, 32], strides = [1, 1, 1]} : vector<16x16x32xbf16> to vector<1x16x32xbf16>
    %336 = vector.shape_cast %335 : vector<1x16x32xbf16> to vector<16x32xbf16>
    %cst_72 = arith.constant dense<0.000000e+00> : vector<2x32xf32>
    %337 = tpu.matmul %334, %336, %cst_72 {dimension_numbers = #tpu.dot_dimension_numbers<[1], [0], [0], [1], [0, 0, 1, 1], [], []>} : vector<2x16xbf16>, vector<16x32xbf16>, vector<2x32xf32> -> vector<2x32xf32>
    %338 = arith.addf %332, %337 : vector<2x32xf32>
    %339 = vector.extract_strided_slice %288 {offsets = [0, 8, 0], sizes = [2, 1, 16], strides = [1, 1, 1]} : vector<2x16x16xbf16> to vector<2x1x16xbf16>
    %340 = vector.shape_cast %339 : vector<2x1x16xbf16> to vector<2x16xbf16>
    %341 = vector.extract_strided_slice %289 {offsets = [8, 0, 0], sizes = [1, 16, 32], strides = [1, 1, 1]} : vector<16x16x32xbf16> to vector<1x16x32xbf16>
    %342 = vector.shape_cast %341 : vector<1x16x32xbf16> to vector<16x32xbf16>
    %cst_73 = arith.constant dense<0.000000e+00> : vector<2x32xf32>
    %343 = tpu.matmul %340, %342, %cst_73 {dimension_numbers = #tpu.dot_dimension_numbers<[1], [0], [0], [1], [0, 0, 1, 1], [], []>} : vector<2x16xbf16>, vector<16x32xbf16>, vector<2x32xf32> -> vector<2x32xf32>
    %344 = arith.addf %338, %343 : vector<2x32xf32>
    %345 = vector.extract_strided_slice %288 {offsets = [0, 9, 0], sizes = [2, 1, 16], strides = [1, 1, 1]} : vector<2x16x16xbf16> to vector<2x1x16xbf16>
    %346 = vector.shape_cast %345 : vector<2x1x16xbf16> to vector<2x16xbf16>
    %347 = vector.extract_strided_slice %289 {offsets = [9, 0, 0], sizes = [1, 16, 32], strides = [1, 1, 1]} : vector<16x16x32xbf16> to vector<1x16x32xbf16>
    %348 = vector.shape_cast %347 : vector<1x16x32xbf16> to vector<16x32xbf16>
    %cst_74 = arith.constant dense<0.000000e+00> : vector<2x32xf32>
    %349 = tpu.matmul %346, %348, %cst_74 {dimension_numbers = #tpu.dot_dimension_numbers<[1], [0], [0], [1], [0, 0, 1, 1], [], []>} : vector<2x16xbf16>, vector<16x32xbf16>, vector<2x32xf32> -> vector<2x32xf32>
    %350 = arith.addf %344, %349 : vector<2x32xf32>
    %351 = vector.extract_strided_slice %288 {offsets = [0, 10, 0], sizes = [2, 1, 16], strides = [1, 1, 1]} : vector<2x16x16xbf16> to vector<2x1x16xbf16>
    %352 = vector.shape_cast %351 : vector<2x1x16xbf16> to vector<2x16xbf16>
    %353 = vector.extract_strided_slice %289 {offsets = [10, 0, 0], sizes = [1, 16, 32], strides = [1, 1, 1]} : vector<16x16x32xbf16> to vector<1x16x32xbf16>
    %354 = vector.shape_cast %353 : vector<1x16x32xbf16> to vector<16x32xbf16>
    %cst_75 = arith.constant dense<0.000000e+00> : vector<2x32xf32>
    %355 = tpu.matmul %352, %354, %cst_75 {dimension_numbers = #tpu.dot_dimension_numbers<[1], [0], [0], [1], [0, 0, 1, 1], [], []>} : vector<2x16xbf16>, vector<16x32xbf16>, vector<2x32xf32> -> vector<2x32xf32>
    %356 = arith.addf %350, %355 : vector<2x32xf32>
    %357 = vector.extract_strided_slice %288 {offsets = [0, 11, 0], sizes = [2, 1, 16], strides = [1, 1, 1]} : vector<2x16x16xbf16> to vector<2x1x16xbf16>
    %358 = vector.shape_cast %357 : vector<2x1x16xbf16> to vector<2x16xbf16>
    %359 = vector.extract_strided_slice %289 {offsets = [11, 0, 0], sizes = [1, 16, 32], strides = [1, 1, 1]} : vector<16x16x32xbf16> to vector<1x16x32xbf16>
    %360 = vector.shape_cast %359 : vector<1x16x32xbf16> to vector<16x32xbf16>
    %cst_76 = arith.constant dense<0.000000e+00> : vector<2x32xf32>
    %361 = tpu.matmul %358, %360, %cst_76 {dimension_numbers = #tpu.dot_dimension_numbers<[1], [0], [0], [1], [0, 0, 1, 1], [], []>} : vector<2x16xbf16>, vector<16x32xbf16>, vector<2x32xf32> -> vector<2x32xf32>
    %362 = arith.addf %356, %361 : vector<2x32xf32>
    %363 = vector.extract_strided_slice %288 {offsets = [0, 12, 0], sizes = [2, 1, 16], strides = [1, 1, 1]} : vector<2x16x16xbf16> to vector<2x1x16xbf16>
    %364 = vector.shape_cast %363 : vector<2x1x16xbf16> to vector<2x16xbf16>
    %365 = vector.extract_strided_slice %289 {offsets = [12, 0, 0], sizes = [1, 16, 32], strides = [1, 1, 1]} : vector<16x16x32xbf16> to vector<1x16x32xbf16>
    %366 = vector.shape_cast %365 : vector<1x16x32xbf16> to vector<16x32xbf16>
    %cst_77 = arith.constant dense<0.000000e+00> : vector<2x32xf32>
    %367 = tpu.matmul %364, %366, %cst_77 {dimension_numbers = #tpu.dot_dimension_numbers<[1], [0], [0], [1], [0, 0, 1, 1], [], []>} : vector<2x16xbf16>, vector<16x32xbf16>, vector<2x32xf32> -> vector<2x32xf32>
    %368 = arith.addf %362, %367 : vector<2x32xf32>
    %369 = vector.extract_strided_slice %288 {offsets = [0, 13, 0], sizes = [2, 1, 16], strides = [1, 1, 1]} : vector<2x16x16xbf16> to vector<2x1x16xbf16>
    %370 = vector.shape_cast %369 : vector<2x1x16xbf16> to vector<2x16xbf16>
    %371 = vector.extract_strided_slice %289 {offsets = [13, 0, 0], sizes = [1, 16, 32], strides = [1, 1, 1]} : vector<16x16x32xbf16> to vector<1x16x32xbf16>
    %372 = vector.shape_cast %371 : vector<1x16x32xbf16> to vector<16x32xbf16>
    %cst_78 = arith.constant dense<0.000000e+00> : vector<2x32xf32>
    %373 = tpu.matmul %370, %372, %cst_78 {dimension_numbers = #tpu.dot_dimension_numbers<[1], [0], [0], [1], [0, 0, 1, 1], [], []>} : vector<2x16xbf16>, vector<16x32xbf16>, vector<2x32xf32> -> vector<2x32xf32>
    %374 = arith.addf %368, %373 : vector<2x32xf32>
    %375 = vector.extract_strided_slice %288 {offsets = [0, 14, 0], sizes = [2, 1, 16], strides = [1, 1, 1]} : vector<2x16x16xbf16> to vector<2x1x16xbf16>
    %376 = vector.shape_cast %375 : vector<2x1x16xbf16> to vector<2x16xbf16>
    %377 = vector.extract_strided_slice %289 {offsets = [14, 0, 0], sizes = [1, 16, 32], strides = [1, 1, 1]} : vector<16x16x32xbf16> to vector<1x16x32xbf16>
    %378 = vector.shape_cast %377 : vector<1x16x32xbf16> to vector<16x32xbf16>
    %cst_79 = arith.constant dense<0.000000e+00> : vector<2x32xf32>
    %379 = tpu.matmul %376, %378, %cst_79 {dimension_numbers = #tpu.dot_dimension_numbers<[1], [0], [0], [1], [0, 0, 1, 1], [], []>} : vector<2x16xbf16>, vector<16x32xbf16>, vector<2x32xf32> -> vector<2x32xf32>
    %380 = arith.addf %374, %379 : vector<2x32xf32>
    %381 = vector.extract_strided_slice %288 {offsets = [0, 15, 0], sizes = [2, 1, 16], strides = [1, 1, 1]} : vector<2x16x16xbf16> to vector<2x1x16xbf16>
    %382 = vector.shape_cast %381 : vector<2x1x16xbf16> to vector<2x16xbf16>
    %383 = vector.extract_strided_slice %289 {offsets = [15, 0, 0], sizes = [1, 16, 32], strides = [1, 1, 1]} : vector<16x16x32xbf16> to vector<1x16x32xbf16>
    %384 = vector.shape_cast %383 : vector<1x16x32xbf16> to vector<16x32xbf16>
    %cst_80 = arith.constant dense<0.000000e+00> : vector<2x32xf32>
    %385 = tpu.matmul %382, %384, %cst_80 {dimension_numbers = #tpu.dot_dimension_numbers<[1], [0], [0], [1], [0, 0, 1, 1], [], []>} : vector<2x16xbf16>, vector<16x32xbf16>, vector<2x32xf32> -> vector<2x32xf32>
    %386 = arith.addf %380, %385 : vector<2x32xf32>
    %c0_81 = arith.constant 0 : index
    %c0_82 = arith.constant 0 : index
    %387 = vector.load %arg11[%c0_81, %c0_82] : memref<1x32xf32, #tpu.memory_space<vmem>>, vector<1x32xf32>
    %388 = vector.broadcast %387 : vector<1x32xf32> to vector<2x32xf32>
    %389 = arith.addf %386, %388 : vector<2x32xf32>
    %cst_83 = arith.constant 0.000000e+00 : f32
    %390 = vector.broadcast %cst_83 : f32 to vector<2x32xf32>
    %391 = arith.maximumf %389, %390 : vector<2x32xf32>
    %392 = arith.truncf %391 : vector<2x32xf32> to vector<2x32xbf16>
    %c0_84 = arith.constant 0 : index
    %c0_85 = arith.constant 0 : index
    %393 = vector.load %arg12[%c0_84, %c0_85] : memref<32x32xbf16, #tpu.memory_space<vmem>>, vector<32x32xbf16>
    %cst_86 = arith.constant dense<0.000000e+00> : vector<2x32xf32>
    %394 = tpu.matmul %392, %393, %cst_86 {dimension_numbers = #tpu.dot_dimension_numbers<[1], [0], [0], [1], [0, 0, 1, 1], [], []>} : vector<2x32xbf16>, vector<32x32xbf16>, vector<2x32xf32> -> vector<2x32xf32>
    %c0_87 = arith.constant 0 : index
    %c0_88 = arith.constant 0 : index
    %395 = vector.load %arg13[%c0_87, %c0_88] : memref<1x32xf32, #tpu.memory_space<vmem>>, vector<1x32xf32>
    %396 = vector.broadcast %395 : vector<1x32xf32> to vector<2x32xf32>
    %397 = arith.addf %394, %396 : vector<2x32xf32>
    %cst_89 = arith.constant 0.000000e+00 : f32
    %398 = vector.broadcast %cst_89 : f32 to vector<2x32xf32>
    %399 = arith.maximumf %397, %398 : vector<2x32xf32>
    %400 = arith.truncf %399 : vector<2x32xf32> to vector<2x32xbf16>
    %c0_90 = arith.constant 0 : index
    %c0_91 = arith.constant 0 : index
    %401 = vector.load %arg14[%c0_90, %c0_91] : memref<32x1xbf16, #tpu.memory_space<vmem>>, vector<32x1xbf16>
    %cst_92 = arith.constant dense<0.000000e+00> : vector<2x1xf32>
    %402 = tpu.matmul %400, %401, %cst_92 {dimension_numbers = #tpu.dot_dimension_numbers<[1], [0], [0], [1], [0, 0, 1, 1], [], []>} : vector<2x32xbf16>, vector<32x1xbf16>, vector<2x1xf32> -> vector<2x1xf32>
    %c0_93 = arith.constant 0 : index
    %c0_94 = arith.constant 0 : index
    %403 = vector.load %arg15[%c0_93, %c0_94] : memref<1x1xf32, #tpu.memory_space<vmem>>, vector<1x1xf32>
    %404 = vector.broadcast %403 : vector<1x1xf32> to vector<2x1xf32>
    %405 = arith.addf %402, %404 : vector<2x1xf32>
    %cst_95 = arith.constant 0.000000e+00 : f32
    %406 = vector.broadcast %cst_95 : f32 to vector<2x1xf32>
    %407 = arith.subf %406, %405 : vector<2x1xf32>
    %408 = math.exp %407 : vector<2x1xf32>
    %cst_96 = arith.constant 1.000000e+00 : f32
    %409 = vector.broadcast %cst_96 : f32 to vector<2x1xf32>
    %410 = arith.addf %409, %408 : vector<2x1xf32>
    %cst_97 = arith.constant 1.000000e+00 : f32
    %411 = vector.broadcast %cst_97 : f32 to vector<2x1xf32>
    %412 = arith.divf %411, %410 : vector<2x1xf32>
    %c0_98 = arith.constant 0 : index
    %c0_99 = arith.constant 0 : index
    %413 = vector.load %arg16[%c0_98, %c0_99] : memref<2x1xf32, #tpu.memory_space<vmem>>, vector<2x1xf32>
    tpu.vector_store %arg16[%c0_98, %c0_99], %412 {strides = array<i32>} : memref<2x1xf32, #tpu.memory_space<vmem>>, vector<2x1xf32>,
    return
  }
  func.func @transform_0(%arg0: i32) -> (i32, i32, i32) {
    %c0_i32 = arith.constant 0 : i32
    %c0_i32_0 = arith.constant 0 : i32
    %c0_i32_1 = arith.constant 0 : i32
    return %arg0, %c0_i32, %c0_i32_0 : i32, i32, i32
  }
  func.func @transform_1(%arg0: i32) -> (i32, i32) {
    %c0_i32 = arith.constant 0 : i32
    %c0_i32_0 = arith.constant 0 : i32
    %c0_i32_1 = arith.constant 0 : i32
    return %c0_i32, %c0_i32_0 : i32, i32
  }
  func.func @transform_2(%arg0: i32) -> (i32, i32) {
    %c0_i32 = arith.constant 0 : i32
    %c0_i32_0 = arith.constant 0 : i32
    %c0_i32_1 = arith.constant 0 : i32
    return %c0_i32, %c0_i32_0 : i32, i32
  }
  func.func @transform_3(%arg0: i32) -> (i32, i32) {
    %c0_i32 = arith.constant 0 : i32
    %c0_i32_0 = arith.constant 0 : i32
    %c0_i32_1 = arith.constant 0 : i32
    return %c0_i32, %c0_i32_0 : i32, i32
  }
  func.func @transform_4(%arg0: i32) -> (i32, i32) {
    %c0_i32 = arith.constant 0 : i32
    %c0_i32_0 = arith.constant 0 : i32
    %c0_i32_1 = arith.constant 0 : i32
    return %c0_i32, %c0_i32_0 : i32, i32
  }
  func.func @transform_5(%arg0: i32) -> (i32, i32, i32) {
    %c0_i32 = arith.constant 0 : i32
    %c0_i32_0 = arith.constant 0 : i32
    %c0_i32_1 = arith.constant 0 : i32
    %c0_i32_2 = arith.constant 0 : i32
    return %c0_i32, %c0_i32_0, %c0_i32_1 : i32, i32, i32
  }
  func.func @transform_6(%arg0: i32) -> (i32, i32) {
    %c0_i32 = arith.constant 0 : i32
    %c0_i32_0 = arith.constant 0 : i32
    %c0_i32_1 = arith.constant 0 : i32
    return %c0_i32, %c0_i32_0 : i32, i32
  }
  func.func @transform_7(%arg0: i32) -> (i32, i32) {
    %c0_i32 = arith.constant 0 : i32
    %c0_i32_0 = arith.constant 0 : i32
    %c0_i32_1 = arith.constant 0 : i32
    return %c0_i32, %c0_i32_0 : i32, i32
  }
  func.func @transform_8(%arg0: i32) -> (i32, i32) {
    %c0_i32 = arith.constant 0 : i32
    %c0_i32_0 = arith.constant 0 : i32
    %c0_i32_1 = arith.constant 0 : i32
    return %c0_i32, %c0_i32_0 : i32, i32
  }
  func.func @transform_9(%arg0: i32) -> (i32, i32, i32) {
    %c0_i32 = arith.constant 0 : i32
    %c0_i32_0 = arith.constant 0 : i32
    %c0_i32_1 = arith.constant 0 : i32
    %c0_i32_2 = arith.constant 0 : i32
    return %c0_i32, %c0_i32_0, %c0_i32_1 : i32, i32, i32
  }
  func.func @transform_10(%arg0: i32) -> (i32, i32) {
    %c0_i32 = arith.constant 0 : i32
    %c0_i32_0 = arith.constant 0 : i32
    %c0_i32_1 = arith.constant 0 : i32
    return %c0_i32, %c0_i32_0 : i32, i32
  }
  func.func @transform_11(%arg0: i32) -> (i32, i32) {
    %c0_i32 = arith.constant 0 : i32
    %c0_i32_0 = arith.constant 0 : i32
    %c0_i32_1 = arith.constant 0 : i32
    return %c0_i32, %c0_i32_0 : i32, i32
  }
  func.func @transform_12(%arg0: i32) -> (i32, i32) {
    %c0_i32 = arith.constant 0 : i32
    %c0_i32_0 = arith.constant 0 : i32
    %c0_i32_1 = arith.constant 0 : i32
    return %c0_i32, %c0_i32_0 : i32, i32
  }
  func.func @transform_13(%arg0: i32) -> (i32, i32) {
    %c0_i32 = arith.constant 0 : i32
    %c0_i32_0 = arith.constant 0 : i32
    %c0_i32_1 = arith.constant 0 : i32
    return %c0_i32, %c0_i32_0 : i32, i32
  }
  func.func @transform_14(%arg0: i32) -> (i32, i32) {
    %c0_i32 = arith.constant 0 : i32
    %c0_i32_0 = arith.constant 0 : i32
    %c0_i32_1 = arith.constant 0 : i32
    return %c0_i32, %c0_i32_0 : i32, i32
  }
  func.func @transform_15(%arg0: i32) -> (i32, i32) {
    %c0_i32 = arith.constant 0 : i32
    %c0_i32_0 = arith.constant 0 : i32
    return %arg0, %c0_i32 : i32, i32
  }
}

</mosaic_0001>

<bundles_post_ra>
// kernel: forward.1
= control target key start
LH: loop header
LB: loop body
LE: loop exit
PB: predicated region body
PF: predicated region fallthrough
CT: control target
= control target key end

     0   :  { %s5352_s0 = inlined_call_operand.vmem [shape: bf16[2,16,4], index: 0, kind: input, shape index: {}]   ;;  %s5353_s1 = inlined_call_operand.vmem [shape: bf16[4,96], index: 1, kind: input, shape index: {}]   ;;  %s5354_s2 = inlined_call_operand.vmem [shape: f32[1,96], index: 2, kind: input, shape index: {}]   ;;  %s5355_s3 = inlined_call_operand.vmem [shape: f32[4,16], index: 3, kind: input, shape index: {}]   ;;  %s5356_s4 = inlined_call_operand.vmem [shape: f32[1,16], index: 4, kind: input, shape index: {}]   ;;  %s5357_s5 = inlined_call_operand.vmem [shape: bf16[3,16,96], index: 5, kind: input, shape index: {}]   ;;  %s5358_s6 = inlined_call_operand.vmem [shape: f32[1,96], index: 6, kind: input, shape index: {}]   ;;  %s5359_s7 = inlined_call_operand.vmem [shape: f32[4,16], index: 7, kind: input, shape index: {}]   ;;  %s5360_s8 = inlined_call_operand.vmem [shape: f32[1,16], index: 8, kind: input, shape index: {}]   ;;  %s5361_s9 = inlined_call_operand.hbm [shape: bf16[16,16,32], index: 9, kind: input, shape index: {}]   ;;  %s5362_s10 = inlined_call_operand.hbm [shape: f32[1,32], index: 10, kind: input, shape index: {}]   ;;  %s5363_s11 = inlined_call_operand.vmem [shape: bf16[32,32], index: 11, kind: input, shape index: {}]   ;;  %s5364_s12 = inlined_call_operand.vmem [shape: f32[1,32], index: 12, kind: input, shape index: {}]   ;;  %s5365_s13 = inlined_call_operand.vmem [shape: bf16[32,1], index: 13, kind: input, shape index: {}]   ;;  %s5366_s14 = inlined_call_operand.<no memory space> [shape: f32[1,1], index: 14, kind: input, shape index: {}]   ;;  %s5367_s15 = inlined_call_operand.vmem [shape: f32[2,1], index: 15, kind: output, shape index: {}]  }
   0x1   :  { %v20_v0 = vstv %s5366_s14 }
   0x2   :  { %21 = vst [vmem:[#allocation2] sm:$0x1] %v20_v0 }
   0x3   :  { %22 = vsyncpa [#allocation4], 0 }
   0x4   :  { %23 = vsyncpa [#allocation6], 0  ;;  %s4567_s20 = smov [#allocation3]   ;;  %s4519_s24 = scalar_lea.hbm %s5361_s9, 2048 }
   0x5   :  { %s47_s21 = sshll.u32 %s4567_s20, 4  ;;  %p4520_p0 = scmp.ne.s32.totalorder %s5361_s9, %s4519_s24  ;;  %s48_s21 = int_to_ptr.vmem [resolvable:$true] %s47_s21 }
   0x6   :  { %p4523_p1 = scmp.lt.u32.totalorder %s4519_s24, %s5361_s9 }
   0x8   :  { %p4525_p2 = pnand %p4523_p1, %p4520_p0 }
   0xa   :  { %4528 = shalt.err (!%p4525_p2)
}
   0xb   :  { %s4529_s14 = scalar_lea.vmem %s48_s21, 2048  ;;  %p4534_p4 = scmp.lt.s32.totalorder %s48_s21, %s48_s21 }
   0xc   :  { %p4530_p3 = scmp.ne.s32.totalorder %s48_s21, %s4529_s14  ;;  %p4535_p5 = scmp.lt.s32.totalorder %s4529_s14, %s4529_s14 }
   0xe   :  { %p4536_p6 = por %p4535_p5, %p4534_p4 }
  0x10   :  { %p4537_p7 = pnand %p4536_p6, %p4530_p3 }
  0x12   :  { %4540 = shalt.err (!%p4537_p7)
}
  0x13   :  { %s4568_s29 = smov 64   ;;  %s4569_s30 = smov 4  }
  0x14   :  { %53 = dma.hbm_to_vmem [thread:$0]  %s5361_s9, 2048, %s48_s21, [#allocation4], %s4568_s29, %s4568_s29, %s4569_s30  }
  0x15   :  { %s4570_s18 = smov [#allocation5]   ;;  %s4541_s23 = scalar_lea.hbm %s5362_s10, 16 }
  0x16   :  { %s60_s19 = sshll.u32 %s4570_s18, 4  ;;  %p4542_p8 = scmp.ne.s32.totalorder %s5362_s10, %s4541_s23  ;;  %s61_s19 = int_to_ptr.vmem [resolvable:$true] %s60_s19 }
  0x17   :  { %p4545_p9 = scmp.lt.u32.totalorder %s4541_s23, %s5362_s10 }
  0x19   :  { %p4547_p10 = pnand %p4545_p9, %p4542_p8 }
  0x1b   :  { %4550 = shalt.err (!%p4547_p10)
}
  0x1c   :  { %s4551_s28 = scalar_lea.vmem %s61_s19, 16  ;;  %s4555_s9 = scalar_lea.vmem %s61_s19, 32 }
  0x1d   :  { %p4552_p11 = scmp.ne.s32.totalorder %s61_s19, %s4551_s28  ;;  %p4556_p12 = scmp.lt.s32.totalorder %s61_s19, %s61_s19 }
  0x1e   :  { %p4557_p13 = scmp.lt.s32.totalorder %s4555_s9, %s4551_s28 }
  0x20   :  { %p4558_p0 = por %p4557_p13, %p4556_p12 }
  0x22   :  { %p4559_p1 = pnand %p4558_p0, %p4552_p11 }
  0x24   :  { %4562 = shalt.err (!%p4559_p1)
}
  0x25   :  { %63 = dma.hbm_to_vmem [thread:$0]  %s5362_s10, 16, %s61_s19, [#allocation6]  }
  0x26   :  { %4563 = dma.done.wait [#allocation4], 2048  }
  0x27   :  { %4564 = vsyncadd [#allocation4], 4294965248 }
  0x28   :  { %4565 = dma.done.wait [#allocation6], 16  }
  0x29   :  { %4566 = vsyncadd [#allocation6], 4294967280  ;;  %v4571_v1 = vmov 0.0   ;;  %vm192_vm0 = vcmask 1041408   ;;  %vm185_vm1 = vcmask 31744   ;;  %v4362_v4 = vld [vmem:[%s5352_s0] sm:$0xff]  }
  0x2a   :  { %4010 = vmatprep.subr.bf16.mxu1 %v4571_v1  ;;  %v161_v2 = vld [vmem:[%s5353_s1] sm:$0x3]  ;;  %v4363_v5 = vld [vmem:[%s5352_s0 + $0x8] sm:$0xff]   ;;  %4006 = vmatprep.mubr.msk.bf16.mxu0 %vm185_vm1, %v4362_v4  ;;  %vm4572_vm2 = vmmov 0   ;;  %s4573_s0 = smov 116   ;;  %s4574_s1 = smov 76  }
  0x2b   :  { %4340 = vmatprep.subr.msk.bf16.mxu0 %vm192_vm0, %v161_v2  ;;  %v194_v3 = vsel %vm192_vm0, %v161_v2, 0  ;;  %v3800_v7 = vld [vmem:[%s5354_s2] ss:$0 sm:$0xff]  ;;  %4012 = vmatprep.mubr.msk.bf16.mxu1 %vm4572_vm2, %v4571_v1  ;;  %vm256_vm3 = vcmask 80896   ;;  %vm356_vm4 = vcmask 130048   ;;  %s4575_s2 = smov 36  }
  0x2c   :  { %4005 = vmatpush3.bf16.msra.mxu0 %v194_v3  ;;  %s4576_s22 = smov 66   ;;  %s4577_s23 = smov 106   ;;  %vm1378_vm7 = vcmask 1040384   ;;  %vm1391_vm10 = vcmask 1046528   ;;  %vm2776_vm12 = vcmask 1041409   ;;  %vm3669_vm13 = vcmask 261120  }
  0x2d   :  { %4016 = vmatprep.subr.bf16.mxu0 %v4571_v1  ;;  %s4578_s24 = smov 35   ;;  %s4579_s25 = smov 56   ;;  %vm3787_vm14 = vcmask 1024  }
  0x2e   :  { %s4580_s26 = smov 96   ;;  %s4581_s27 = smov 34  }
  0x2f   :  { %4007 = vmatmul.mubr.msk.bf16.vlgmr.msra.gmra.mrb[0].mxu0 %vm185_vm1, %v4363_v5  ;;  %s4582_s28 = smov 46   ;;  %s4583_s9 = smov 86  }
  0x30   :  { %4018 = vmatprep.mubr.msk.bf16.mxu0 %vm4572_vm2, %v4571_v1  ;;  %s4585_s21 = smov 33  }
 0x102   :  { %v4008_v6 = vpop.f32.mrb[0].mxu0 }
 0x103   :  { %v230_v8 = vpop.f32.mrb[1].mxu0  ;;  %v4711_v10 = vadd.f32 %v4008_v6, %v3800_v7 }
 0x104   :  { %v4009_v9 = vpop.f32.mrb[2].mxu0  ;;  %v4715_v13 = vadd.f32 %v3800_v7, %v230_v8 }
 0x105   :  { %v4713_v11 = vadd.f32 %v4009_v9, %v3800_v7  ;;  %v233_v12 = vpop.f32.mrb[3].mxu0 }
 0x106   :  { %v4717_v14 = vadd.f32 %v3800_v7, %v233_v12 }
 0x107   :  { %v4721_v15 = vpack.c.bf16 %v4713_v11, %v4711_v10 }
 0x108   :  { %v4725_v16 = vpack.c.bf16 %v4717_v14, %v4715_v13 }
 0x10a   :  { %252 = vrot.lane.b32.xlu1 %v4725_v16, %s4573_s0  ;;  %254 = vrot.lane.b32.xlu0 %v4725_v16, %s4574_s1 }
 0x10e   :  { %305 = vrot.lane.b32.xlu1 %v4721_v15, %s4573_s0  ;;  %307 = vrot.lane.b32.xlu0 %v4721_v15, %s4574_s1 }
 0x17c   :  { %v255_v17 = vpop.permute.xlu0 %254  ;;  %v253_v21 = vpop.permute.xlu1 %252 }
 0x17d   :  { %v261_v18 = vsel %vm256_vm3, %v255_v17, 0 }
 0x17e   :  { %4011 = vmatpush3.bf16.xpose.msra.mxu1 %v261_v18 }
 0x17f   :  { %4022 = vmatprep.subr.bf16.mxu1 %v4571_v1 }
 0x180   :  { %v308_v19 = vpop.permute.xlu0 %307  ;;  %v306_v22 = vpop.permute.xlu1 %305 }
 0x181   :  { %v313_v20 = vsel %vm256_vm3, %v308_v19, 0 }
 0x182   :  { %4017 = vmatpush3.bf16.xpose.msra.mxu0 %v313_v20 }
 0x183   :  { %4028 = vmatprep.subr.bf16.mxu0 %v4571_v1 }
 0x185   :  { %4013 = vmatmul.mubr.msk.bf16.vlgmr.msra.gmra.mrb[0].mxu1 %vm256_vm3, %v253_v21 }
 0x186   :  { %4024 = vmatprep.mubr.msk.bf16.mxu1 %vm4572_vm2, %v4571_v1 }
 0x189   :  { %4019 = vmatmul.mubr.msk.bf16.vlgmr.msra.gmra.mrb[4].mxu0 %vm256_vm3, %v306_v22 }
 0x18a   :  { %4030 = vmatprep.mubr.msk.bf16.mxu0 %vm4572_vm2, %v4571_v1 }
 0x258   :  { %v297_v23 = vpop.f32.mrb[0].mxu1 }
 0x259   :  { %v4014_v24 = vpop.f32.mrb[1].mxu1  ;;  %v357_v25 = vsel %vm356_vm4, %v297_v23, -inf }
 0x25a   :  { %358 = vmax.xlane.f32.xlu0 %v357_v25  ;;  %v300_v26 = vpop.f32.mrb[2].mxu1 }
 0x25b   :  { %v4015_v27 = vpop.f32.mrb[3].mxu1  ;;  %v360_v28 = vsel %vm356_vm4, %v300_v26, -inf }
 0x25c   :  { %361 = vmax.xlane.f32.xlu1 %v360_v28  ;;  %v349_v29 = vpop.f32.mrb[4].mxu0 }
 0x25d   :  { %v4020_v30 = vpop.f32.mrb[5].mxu0  ;;  %v363_v31 = vsel %vm356_vm4, %v349_v29, -inf }
 0x25e   :  { %364 = vmax.xlane.f32.xlu0 %v363_v31  ;;  %v352_v32 = vpop.f32.mrb[6].mxu0 }
 0x25f   :  { %v4021_v33 = vpop.f32.mrb[7].mxu0  ;;  %v366_v34 = vsel %vm356_vm4, %v352_v32, -inf }
 0x262   :  { %367 = vmax.xlane.f32.xlu0 %v366_v34 }
 0x26d   :  { %403 = vrot.lane.b32.xlu1 %v4725_v16, %s4575_s2 }
 0x2e7   :  { %v359_v35 = vpop.xlane.xlu0 %358 }
 0x2e8   :  { %v369_v37 = vsub.f32 %v297_v23, %v359_v35 }
 0x2e9   :  { %v362_v36 = vpop.xlane.xlu1 %361 }
 0x2ea   :  { %v373_v41 = vmul.f32 1.442695, %v369_v37  ;;  %v370_v42 = vsub.f32 %v300_v26, %v362_v36 }
 0x2eb   :  { %v365_v38 = vpop.xlane.xlu0 %364 }
 0x2ec   :  { %v371_v39 = vsub.f32 %v349_v29, %v365_v38  ;;  %v375_v46 = vmul.f32 1.442695, %v370_v42 }
 0x2ed   :  { %v404_v40 = vpop.permute.xlu1 %403 }
 0x2ee   :  { %v377_v43 = vmul.f32 1.442695, %v371_v39  ;;  %4023 = vmatpush3.bf16.msra.mxu1 %v404_v40 }
 0x2ef   :  { %v368_v44 = vpop.xlane.xlu0 %367  ;;  %4034 = vmatprep.subr.bf16.mxu1 %v4571_v1 }
 0x2f0   :  { %4387 = vpow2.f32 %v377_v43  ;;  %v372_v45 = vsub.f32 %v352_v32, %v368_v44 }
 0x2f1   :  { %4389 = vpow2.f32 %v373_v41 }
 0x2f2   :  { %v379_v47 = vmul.f32 1.442695, %v372_v45 }
 0x2f4   :  { %4391 = vpow2.f32 %v379_v47 }
 0x2f5   :  { %4393 = vpow2.f32 %v375_v46 }
 0x2fa   :  { %v4388_v48 = vpop.eup %4387 }
 0x2fb   :  { %v387_v49 = vsel %vm356_vm4, %v4388_v48, 0.0  ;;  %v4390_v50 = vpop.eup %4389 }
 0x2fc   :  { %388 = vadd.xlane.f32.xlu1 %v387_v49  ;;  %v381_v52 = vsel %vm356_vm4, %v4390_v50, 0.0 }
 0x2fe   :  { %v4392_v51 = vpop.eup %4391 }
 0x2ff   :  { %v390_v53 = vsel %vm356_vm4, %v4392_v51, 0.0  ;;  %v4394_v54 = vpop.eup %4393 }
 0x300   :  { %382 = vadd.xlane.f32.xlu1 %v381_v52  ;;  %391 = vadd.xlane.f32.xlu0 %v390_v53  ;;  %v384_v55 = vsel %vm356_vm4, %v4394_v54, 0.0 }
 0x304   :  { %385 = vadd.xlane.f32.xlu0 %v384_v55 }
 0x311   :  { %537 = vrot.lane.b32.xlu1 %v4725_v16, %s4576_s22 }
 0x315   :  { %588 = vrot.lane.b32.xlu1 %v4721_v15, %s4576_s22 }
 0x319   :  { %586 = vrot.lane.b32.xlu1 %v4721_v15, %s4577_s23 }
 0x31a   :  { %450 = vrot.lane.b32.xlu0 %v4721_v15, %s4575_s2 }
 0x31e   :  { %535 = vrot.lane.b32.xlu0 %v4725_v16, %s4577_s23 }
 0x389   :  { %v389_v56 = vpop.xlane.xlu1 %388 }
 0x38a   :  { %4395 = vrcp.f32 %v389_v56 }
 0x38d   :  { %v383_v57 = vpop.xlane.xlu1 %382  ;;  %v392_v58 = vpop.xlane.xlu0 %391 }
 0x38e   :  { %4397 = vrcp.f32 %v392_v58 }
 0x38f   :  { %4399 = vrcp.f32 %v383_v57 }
 0x391   :  { %v386_v59 = vpop.xlane.xlu0 %385  ;;  %v538_v60 = vpop.permute.xlu1 %537 }
 0x392   :  { %4401 = vrcp.f32 %v386_v59  ;;  %v543_v17 = vsel %vm256_vm3, %v538_v60, 0 }
 0x394   :  { %v4396_v62 = vpop.eup %4395 }
 0x395   :  { %v451_v61 = vpop.permute.xlu0 %450  ;;  %v399_v2 = vmul.f32 %v4396_v62, %v4388_v48  ;;  %v589_v4 = vpop.permute.xlu1 %588 }
 0x396   :  { %4029 = vmatpush3.bf16.msra.mxu0 %v451_v61  ;;  %v594_v9 = vsel %vm256_vm3, %v589_v4, 0 }
 0x397   :  { %4040 = vmatprep.subr.bf16.mxu0 %v4571_v1 }
 0x398   :  { %v4398_v63 = vpop.eup %4397 }
 0x399   :  { %v4400_v0 = vpop.eup %4399  ;;  %v400_v3 = vmul.f32 %v4398_v63, %v4392_v51  ;;  %v587_v18 = vpop.permute.xlu1 %586 }
 0x39a   :  { %v397_v7 = vmul.f32 %v4400_v0, %v4390_v50  ;;  %v536_v19 = vpop.permute.xlu0 %535 }
 0x39b   :  { %v402_v6 = vpack.c.bf16 %v400_v3, %v399_v2 }
 0x39c   :  { %v4402_v5 = vpop.eup %4401 }
 0x39d   :  { %v398_v8 = vmul.f32 %v4402_v5, %v4394_v54  ;;  %4031 = vmatmul.mubr.msk.bf16.vlgmr.msra.gmra.mrb[8].mxu0 %vm356_vm4, %v402_v6 }
 0x39e   :  { %4042 = vmatprep.mubr.msk.bf16.mxu0 %vm4572_vm2, %v4571_v1 }
 0x39f   :  { %4041 = vmatpush3.bf16.xpose.msra.mxu0 %v594_v9  ;;  %v401_v12 = vpack.c.bf16 %v398_v8, %v397_v7 }
 0x3a0   :  { %4052 = vmatprep.subr.bf16.mxu0 %v4571_v1 }
 0x3a1   :  { %4025 = vmatmul.mubr.msk.bf16.vlgmr.msra.gmra.mrb[4].mxu1 %vm356_vm4, %v401_v12 }
 0x3a2   :  { %4035 = vmatpush3.bf16.xpose.msra.mxu1 %v543_v17  ;;  %4036 = vmatprep.mubr.msk.bf16.mxu1 %vm4572_vm2, %v4571_v1 }
 0x3a3   :  { %4046 = vmatprep.subr.bf16.mxu1 %v4571_v1 }
 0x3a6   :  { %4043 = vmatmul.mubr.msk.bf16.vlgmr.msra.gmra.mrb[12].mxu0 %vm256_vm3, %v587_v18 }
 0x3a7   :  { %4054 = vmatprep.mubr.msk.bf16.mxu0 %vm4572_vm2, %v4571_v1 }
 0x3a9   :  { %4037 = vmatmul.mubr.msk.bf16.vlgmr.msra.gmra.mrb[8].mxu1 %vm256_vm3, %v536_v19 }
 0x3aa   :  { %4048 = vmatprep.mubr.msk.bf16.mxu1 %vm4572_vm2, %v4571_v1 }
 0x470   :  { %v4783_v20 = vpop.f32.mrb[8].mxu0 }
 0x471   :  { %v4032_v21 = vpop.f32.mrb[9].mxu0 }
 0x472   :  { %v4785_v22 = vpop.f32.mrb[10].mxu0 }
 0x473   :  { %v4033_v23 = vpop.f32.mrb[11].mxu0 }
 0x474   :  { %v4787_v24 = vpop.f32.mrb[4].mxu1 }
 0x475   :  { %v4026_v25 = vpop.f32.mrb[5].mxu1 }
 0x476   :  { %v4789_v26 = vpop.f32.mrb[6].mxu1 }
 0x477   :  { %v4027_v27 = vpop.f32.mrb[7].mxu1 }
 0x479   :  { %v630_v28 = vpop.f32.mrb[12].mxu0 }
 0x47a   :  { %v4044_v29 = vpop.f32.mrb[13].mxu0  ;;  %v643_v38 = vsel %vm356_vm4, %v630_v28, -inf }
 0x47b   :  { %v633_v30 = vpop.f32.mrb[14].mxu0 }
 0x47c   :  { %v579_v31 = vpop.f32.mrb[8].mxu1  ;;  %v4045_v32 = vpop.f32.mrb[15].mxu0  ;;  %v646_v39 = vsel %vm356_vm4, %v633_v30, -inf }
 0x47d   :  { %v4038_v33 = vpop.f32.mrb[9].mxu1  ;;  %v637_v34 = vsel %vm356_vm4, %v579_v31, -inf }
 0x47e   :  { %638 = vmax.xlane.f32.xlu0 %v637_v34  ;;  %v582_v35 = vpop.f32.mrb[10].mxu1 }
 0x47f   :  { %v4039_v36 = vpop.f32.mrb[11].mxu1  ;;  %v640_v37 = vsel %vm356_vm4, %v582_v35, -inf }
 0x480   :  { %641 = vmax.xlane.f32.xlu1 %v640_v37 }
 0x482   :  { %644 = vmax.xlane.f32.xlu0 %v643_v38 }
 0x486   :  { %647 = vmax.xlane.f32.xlu0 %v646_v39 }
 0x491   :  { %683 = vrot.lane.b32.xlu1 %v4725_v16, %s4578_s24 }
 0x50b   :  { %v639_v40 = vpop.xlane.xlu0 %638 }
 0x50c   :  { %v649_v42 = vsub.f32 %v579_v31, %v639_v40 }
 0x50d   :  { %v642_v41 = vpop.xlane.xlu1 %641 }
 0x50e   :  { %v653_v46 = vmul.f32 1.442695, %v649_v42  ;;  %v650_v47 = vsub.f32 %v582_v35, %v642_v41 }
 0x50f   :  { %v645_v43 = vpop.xlane.xlu0 %644 }
 0x510   :  { %v651_v44 = vsub.f32 %v630_v28, %v645_v43  ;;  %v655_v51 = vmul.f32 1.442695, %v650_v47 }
 0x511   :  { %v684_v45 = vpop.permute.xlu1 %683 }
 0x512   :  { %v657_v48 = vmul.f32 1.442695, %v651_v44  ;;  %4047 = vmatpush3.bf16.msra.mxu1 %v684_v45 }
 0x513   :  { %v648_v49 = vpop.xlane.xlu0 %647  ;;  %4058 = vmatprep.subr.bf16.mxu1 %v4571_v1 }
 0x514   :  { %4403 = vpow2.f32 %v657_v48  ;;  %v652_v50 = vsub.f32 %v633_v30, %v648_v49 }
 0x515   :  { %4405 = vpow2.f32 %v653_v46 }
 0x516   :  { %v659_v52 = vmul.f32 1.442695, %v652_v50 }
 0x518   :  { %4407 = vpow2.f32 %v659_v52 }
 0x519   :  { %4409 = vpow2.f32 %v655_v51 }
 0x51e   :  { %v4404_v53 = vpop.eup %4403 }
 0x51f   :  { %v667_v54 = vsel %vm356_vm4, %v4404_v53, 0.0  ;;  %v4406_v55 = vpop.eup %4405 }
 0x520   :  { %668 = vadd.xlane.f32.xlu1 %v667_v54  ;;  %v661_v58 = vsel %vm356_vm4, %v4406_v55, 0.0 }
 0x522   :  { %v4408_v56 = vpop.eup %4407 }
 0x523   :  { %v670_v57 = vsel %vm356_vm4, %v4408_v56, 0.0  ;;  %v4410_v59 = vpop.eup %4409 }
 0x524   :  { %671 = vadd.xlane.f32.xlu0 %v670_v57  ;;  %662 = vadd.xlane.f32.xlu1 %v661_v58  ;;  %v664_v60 = vsel %vm356_vm4, %v4410_v59, 0.0 }
 0x528   :  { %665 = vadd.xlane.f32.xlu0 %v664_v60 }
 0x535   :  { %811 = vrot.lane.b32.xlu1 %v4725_v16, %s4579_s25 }
 0x539   :  { %862 = vrot.lane.b32.xlu1 %v4721_v15, %s4579_s25 }
 0x53d   :  { %860 = vrot.lane.b32.xlu1 %v4721_v15, %s4580_s26 }
 0x53e   :  { %730 = vrot.lane.b32.xlu0 %v4721_v15, %s4578_s24 }
 0x542   :  { %809 = vrot.lane.b32.xlu0 %v4725_v16, %s4580_s26 }
 0x5ad   :  { %v669_v61 = vpop.xlane.xlu1 %668 }
 0x5ae   :  { %4411 = vrcp.f32 %v669_v61 }
 0x5b1   :  { %v672_v62 = vpop.xlane.xlu0 %671  ;;  %v663_v63 = vpop.xlane.xlu1 %662 }
 0x5b2   :  { %4413 = vrcp.f32 %v672_v62 }
 0x5b3   :  { %4415 = vrcp.f32 %v663_v63 }
 0x5b5   :  { %v666_v0 = vpop.xlane.xlu0 %665  ;;  %v812_v2 = vpop.permute.xlu1 %811 }
 0x5b6   :  { %4417 = vrcp.f32 %v666_v0  ;;  %v817_v25 = vsel %vm256_vm3, %v812_v2, 0 }
 0x5b8   :  { %v4412_v4 = vpop.eup %4411 }
 0x5b9   :  { %v731_v3 = vpop.permute.xlu0 %730  ;;  %v679_v6 = vmul.f32 %v4412_v4, %v4404_v53  ;;  %v863_v9 = vpop.permute.xlu1 %862 }
 0x5ba   :  { %4053 = vmatpush3.bf16.msra.mxu0 %v731_v3  ;;  %v868_v21 = vsel %vm256_vm3, %v863_v9, 0 }
 0x5bb   :  { %4064 = vmatprep.subr.bf16.mxu0 %v4571_v1 }
 0x5bc   :  { %v4414_v5 = vpop.eup %4413 }
 0x5bd   :  { %v680_v7 = vmul.f32 %v4414_v5, %v4408_v56  ;;  %v4416_v8 = vpop.eup %4415  ;;  %v861_v27 = vpop.permute.xlu1 %860 }
 0x5be   :  { %v677_v18 = vmul.f32 %v4416_v8, %v4406_v55  ;;  %v810_v28 = vpop.permute.xlu0 %809 }
 0x5bf   :  { %v682_v12 = vpack.c.bf16 %v680_v7, %v679_v6 }
 0x5c0   :  { %v4418_v17 = vpop.eup %4417 }
 0x5c1   :  { %v678_v19 = vmul.f32 %v4418_v17, %v4410_v59  ;;  %4055 = vmatmul.mubr.msk.bf16.vlgmr.msra.gmra.mrb[16].mxu0 %vm356_vm4, %v682_v12 }
 0x5c2   :  { %4066 = vmatprep.mubr.msk.bf16.mxu0 %vm4572_vm2, %v4571_v1 }
 0x5c3   :  { %4065 = vmatpush3.bf16.xpose.msra.mxu0 %v868_v21  ;;  %v681_v23 = vpack.c.bf16 %v678_v19, %v677_v18 }
 0x5c4   :  { %4076 = vmatprep.subr.bf16.mxu0 %v4571_v1 }
 0x5c5   :  { %4049 = vmatmul.mubr.msk.bf16.vlgmr.msra.gmra.mrb[12].mxu1 %vm356_vm4, %v681_v23 }
 0x5c6   :  { %4059 = vmatpush3.bf16.xpose.msra.mxu1 %v817_v25  ;;  %4060 = vmatprep.mubr.msk.bf16.mxu1 %vm4572_vm2, %v4571_v1 }
 0x5c7   :  { %4070 = vmatprep.subr.bf16.mxu1 %v4571_v1 }
 0x5ca   :  { %4067 = vmatmul.mubr.msk.bf16.vlgmr.msra.gmra.mrb[20].mxu0 %vm256_vm3, %v861_v27 }
 0x5cb   :  { %4078 = vmatprep.mubr.msk.bf16.mxu0 %vm4572_vm2, %v4571_v1 }
 0x5cd   :  { %4061 = vmatmul.mubr.msk.bf16.vlgmr.msra.gmra.mrb[16].mxu1 %vm256_vm3, %v810_v28 }
 0x5ce   :  { %4072 = vmatprep.mubr.msk.bf16.mxu1 %vm4572_vm2, %v4571_v1 }
 0x694   :  { %v4829_v29 = vpop.f32.mrb[16].mxu0 }
 0x695   :  { %v4056_v30 = vpop.f32.mrb[17].mxu0 }
 0x696   :  { %v4831_v31 = vpop.f32.mrb[18].mxu0 }
 0x697   :  { %v4057_v32 = vpop.f32.mrb[19].mxu0 }
 0x698   :  { %v4833_v33 = vpop.f32.mrb[12].mxu1 }
 0x699   :  { %v4050_v34 = vpop.f32.mrb[13].mxu1 }
 0x69a   :  { %v4835_v35 = vpop.f32.mrb[14].mxu1 }
 0x69b   :  { %v4051_v36 = vpop.f32.mrb[15].mxu1 }
 0x69d   :  { %v904_v37 = vpop.f32.mrb[20].mxu0 }
 0x69e   :  { %v4068_v38 = vpop.f32.mrb[21].mxu0  ;;  %v917_v47 = vsel %vm356_vm4, %v904_v37, -inf }
 0x69f   :  { %v907_v39 = vpop.f32.mrb[22].mxu0 }
 0x6a0   :  { %v853_v40 = vpop.f32.mrb[16].mxu1  ;;  %v4069_v41 = vpop.f32.mrb[23].mxu0  ;;  %v920_v48 = vsel %vm356_vm4, %v907_v39, -inf }
 0x6a1   :  { %v4062_v42 = vpop.f32.mrb[17].mxu1  ;;  %v911_v43 = vsel %vm356_vm4, %v853_v40, -inf }
 0x6a2   :  { %912 = vmax.xlane.f32.xlu0 %v911_v43  ;;  %v856_v44 = vpop.f32.mrb[18].mxu1 }
 0x6a3   :  { %v4063_v45 = vpop.f32.mrb[19].mxu1  ;;  %v914_v46 = vsel %vm356_vm4, %v856_v44, -inf }
 0x6a4   :  { %915 = vmax.xlane.f32.xlu1 %v914_v46 }
 0x6a6   :  { %918 = vmax.xlane.f32.xlu0 %v917_v47 }
 0x6aa   :  { %921 = vmax.xlane.f32.xlu0 %v920_v48 }
 0x6b5   :  { %957 = vrot.lane.b32.xlu1 %v4725_v16, %s4581_s27 }
 0x72f   :  { %v913_v49 = vpop.xlane.xlu0 %912 }
 0x730   :  { %v923_v51 = vsub.f32 %v853_v40, %v913_v49 }
 0x731   :  { %v916_v50 = vpop.xlane.xlu1 %915 }
 0x732   :  { %v927_v55 = vmul.f32 1.442695, %v923_v51  ;;  %v924_v56 = vsub.f32 %v856_v44, %v916_v50 }
 0x733   :  { %v919_v52 = vpop.xlane.xlu0 %918 }
 0x734   :  { %v925_v53 = vsub.f32 %v904_v37, %v919_v52  ;;  %v929_v60 = vmul.f32 1.442695, %v924_v56 }
 0x735   :  { %v958_v54 = vpop.permute.xlu1 %957 }
 0x736   :  { %v931_v57 = vmul.f32 1.442695, %v925_v53  ;;  %4071 = vmatpush3.bf16.msra.mxu1 %v958_v54 }
 0x737   :  { %v922_v58 = vpop.xlane.xlu0 %921  ;;  %4082 = vmatprep.subr.bf16.mxu1 %v4571_v1 }
 0x738   :  { %4419 = vpow2.f32 %v931_v57  ;;  %v926_v59 = vsub.f32 %v907_v39, %v922_v58 }
 0x739   :  { %4421 = vpow2.f32 %v927_v55 }
 0x73a   :  { %v933_v61 = vmul.f32 1.442695, %v926_v59 }
 0x73c   :  { %4423 = vpow2.f32 %v933_v61 }
 0x73d   :  { %4425 = vpow2.f32 %v929_v60 }
 0x742   :  { %v4420_v62 = vpop.eup %4419 }
 0x743   :  { %v941_v63 = vsel %vm356_vm4, %v4420_v62, 0.0  ;;  %v4422_v0 = vpop.eup %4421 }
 0x744   :  { %942 = vadd.xlane.f32.xlu1 %v941_v63  ;;  %v935_v4 = vsel %vm356_vm4, %v4422_v0, 0.0 }
 0x746   :  { %v4424_v2 = vpop.eup %4423 }
 0x747   :  { %v944_v3 = vsel %vm356_vm4, %v4424_v2, 0.0  ;;  %v4426_v5 = vpop.eup %4425 }
 0x748   :  { %945 = vadd.xlane.f32.xlu0 %v944_v3  ;;  %936 = vadd.xlane.f32.xlu1 %v935_v4  ;;  %v938_v6 = vsel %vm356_vm4, %v4426_v5, 0.0 }
 0x74c   :  { %939 = vadd.xlane.f32.xlu0 %v938_v6 }
 0x759   :  { %1085 = vrot.lane.b32.xlu1 %v4725_v16, %s4582_s28 }
 0x75d   :  { %1136 = vrot.lane.b32.xlu1 %v4721_v15, %s4582_s28 }
 0x761   :  { %1134 = vrot.lane.b32.xlu1 %v4721_v15, %s4583_s9 }
 0x762   :  { %1004 = vrot.lane.b32.xlu0 %v4721_v15, %s4581_s27 }
 0x766   :  { %1083 = vrot.lane.b32.xlu0 %v4725_v16, %s4583_s9 }
 0x7d1   :  { %v943_v7 = vpop.xlane.xlu1 %942 }
 0x7d2   :  { %4427 = vrcp.f32 %v943_v7 }
 0x7d5   :  { %v946_v8 = vpop.xlane.xlu0 %945  ;;  %v937_v9 = vpop.xlane.xlu1 %936 }
 0x7d6   :  { %4429 = vrcp.f32 %v946_v8 }
 0x7d7   :  { %4431 = vrcp.f32 %v937_v9 }
 0x7d9   :  { %v940_v12 = vpop.xlane.xlu0 %939  ;;  %v1086_v17 = vpop.permute.xlu1 %1085 }
 0x7da   :  { %4433 = vrcp.f32 %v940_v12  ;;  %v1091_v39 = vsel %vm256_vm3, %v1086_v17, 0 }
 0x7dc   :  { %v4428_v19 = vpop.eup %4427 }
 0x7dd   :  { %v1005_v18 = vpop.permute.xlu0 %1004  ;;  %v953_v23 = vmul.f32 %v4428_v19, %v4420_v62  ;;  %v1137_v28 = vpop.permute.xlu1 %1136  ;;  %v4584_v62 = vmov 0  }
 0x7de   :  { %4077 = vmatpush3.bf16.msra.mxu0 %v1005_v18  ;;  %v1142_v37 = vsel %vm256_vm3, %v1137_v28, 0  ;;  %4360 = vset.pattern.permute.xlu1 %v4584_v62 }
 0x7df   :  { %4088 = vmatprep.subr.bf16.mxu0 %v4571_v1  ;;  %4361 = vset.pattern.permute.xlu0 %v4584_v62 }
 0x7e0   :  { %v4430_v21 = vpop.eup %4429 }
 0x7e1   :  { %v954_v25 = vmul.f32 %v4430_v21, %v4424_v2  ;;  %v4432_v27 = vpop.eup %4431  ;;  %v1135_v40 = vpop.permute.xlu1 %1134 }
 0x7e2   :  { %v951_v34 = vmul.f32 %v4432_v27, %v4422_v0  ;;  %v1084_v41 = vpop.permute.xlu0 %1083 }
 0x7e3   :  { %v956_v30 = vpack.c.bf16 %v954_v25, %v953_v23 }
 0x7e4   :  { %v4434_v32 = vpop.eup %4433 }
 0x7e5   :  { %v952_v36 = vmul.f32 %v4434_v32, %v4426_v5  ;;  %4079 = vmatmul.mubr.msk.bf16.vlgmr.msra.gmra.mrb[24].mxu0 %vm356_vm4, %v956_v30 }
 0x7e6   :  { %4090 = vmatprep.mubr.msk.bf16.mxu0 %vm4572_vm2, %v4571_v1 }
 0x7e7   :  { %4089 = vmatpush3.bf16.xpose.msra.mxu0 %v1142_v37  ;;  %v955_v38 = vpack.c.bf16 %v952_v36, %v951_v34 }
 0x7e8   :  { %4100 = vmatprep.subr.bf16.mxu0 %v4571_v1 }
 0x7e9   :  { %4073 = vmatmul.mubr.msk.bf16.vlgmr.msra.gmra.mrb[20].mxu1 %vm356_vm4, %v955_v38 }
 0x7ea   :  { %4083 = vmatpush3.bf16.xpose.msra.mxu1 %v1091_v39  ;;  %4084 = vmatprep.mubr.msk.bf16.mxu1 %vm4572_vm2, %v4571_v1 }
 0x7eb   :  { %4094 = vmatprep.subr.bf16.mxu1 %v4571_v1 }
 0x7ee   :  { %4091 = vmatmul.mubr.msk.bf16.vlgmr.msra.gmra.mrb[28].mxu0 %vm256_vm3, %v1135_v40 }
 0x7ef   :  { %4102 = vmatprep.mubr.msk.bf16.mxu0 %vm4572_vm2, %v4571_v1 }
 0x7f1   :  { %4085 = vmatmul.mubr.msk.bf16.vlgmr.msra.gmra.mrb[24].mxu1 %vm256_vm3, %v1084_v41 }
 0x7f2   :  { %4096 = vmatprep.mubr.msk.bf16.mxu1 %vm4572_vm2, %v4571_v1 }
 0x8b8   :  { %v4875_v42 = vpop.f32.mrb[24].mxu0 }
 0x8b9   :  { %v4080_v43 = vpop.f32.mrb[25].mxu0 }
 0x8ba   :  { %v4877_v44 = vpop.f32.mrb[26].mxu0 }
 0x8bb   :  { %v4081_v45 = vpop.f32.mrb[27].mxu0 }
 0x8bc   :  { %v997_v46 = vpop.f32.mrb[20].mxu1 }
 0x8bd   :  { %v4074_v47 = vpop.f32.mrb[21].mxu1 }
 0x8be   :  { %v1000_v48 = vpop.f32.mrb[22].mxu1 }
 0x8bf   :  { %v4075_v49 = vpop.f32.mrb[23].mxu1 }
 0x8c0   :  { %v4912_v49 = vld [vmem:[%s5357_s5] sm:$0xff]  }
 0x8c1   :  { %v1178_v50 = vpop.f32.mrb[28].mxu0 }
 0x8c2   :  { %v4092_v51 = vpop.f32.mrb[29].mxu0  ;;  %v1191_v60 = vsel %vm356_vm4, %v1178_v50, -inf }
 0x8c3   :  { %v1181_v52 = vpop.f32.mrb[30].mxu0 }
 0x8c4   :  { %v1127_v53 = vpop.f32.mrb[24].mxu1  ;;  %v4093_v54 = vpop.f32.mrb[31].mxu0  ;;  %v1194_v61 = vsel %vm356_vm4, %v1181_v52, -inf }
 0x8c5   :  { %v4086_v55 = vpop.f32.mrb[25].mxu1  ;;  %v1185_v56 = vsel %vm356_vm4, %v1127_v53, -inf }
 0x8c6   :  { %1186 = vmax.xlane.f32.xlu0 %v1185_v56  ;;  %v1130_v57 = vpop.f32.mrb[26].mxu1  ;;  %v79_v55 = vlaneseq }
 0x8c7   :  { %v4087_v58 = vpop.f32.mrb[27].mxu1  ;;  %v1188_v59 = vsel %vm356_vm4, %v1130_v57, -inf }
 0x8c8   :  { %1189 = vmax.xlane.f32.xlu1 %v1188_v59 }
 0x8ca   :  { %1192 = vmax.xlane.f32.xlu0 %v1191_v60  ;;  %v163_v60 = vld [vmem:[%s5355_s3] sm:$0xf] }
 0x8ce   :  { %1195 = vmax.xlane.f32.xlu0 %v1194_v61 }
 0x953   :  { %v1187_v63 = vpop.xlane.xlu0 %1186 }
 0x954   :  { %v1197_v0 = vsub.f32 %v1127_v53, %v1187_v63 }
 0x955   :  { %v1190_v2 = vpop.xlane.xlu1 %1189 }
 0x956   :  { %v1201_v5 = vmul.f32 1.442695, %v1197_v0  ;;  %v1198_v6 = vsub.f32 %v1130_v57, %v1190_v2  ;;  %v4915_v57 = vshrl.u32 %v79_v55, 7 }
 0x957   :  { %v1193_v3 = vpop.xlane.xlu0 %1192 }
 0x958   :  { %v1199_v4 = vsub.f32 %v1178_v50, %v1193_v3  ;;  %v1203_v12 = vmul.f32 1.442695, %v1198_v6  ;;  %v519_v59 = vsub.s32 0, %v4915_v57  ;;  %v799_v62 = vsub.s32 1, %v4915_v57 }
 0x959   :  { %v1073_v0 = vsub.s32 2, %v4915_v57  ;;  %v157_v3 = vand.u32 127, %v79_v55 }
 0x95a   :  { %v1205_v7 = vmul.f32 1.442695, %v1199_v4  ;;  %v520_v63 = vrot.slane %v163_v60, %v519_v59  ;;  %v800_v4 = vrot.slane %v163_v60, %v799_v62 }
 0x95b   :  { %v1196_v8 = vpop.xlane.xlu0 %1195  ;;  %vm158_vm5 = vcmp.lt.s32.totalorder %v157_v3, 12 }
 0x95c   :  { %4435 = vpow2.f32 %v1205_v7  ;;  %v1200_v9 = vsub.f32 %v1181_v52, %v1196_v8  ;;  %v1074_v7 = vrot.slane %v163_v60, %v1073_v0  ;;  %v1347_v8 = vsub.s32 3, %v4915_v57 }
 0x95d   :  { %4437 = vpow2.f32 %v1201_v5 }
 0x95e   :  { %v1207_v17 = vmul.f32 1.442695, %v1200_v9  ;;  %v3809_v9 = vld [vmem:[%s5356_s4] ss:$0 sm:$0xff] }
 0x960   :  { %4439 = vpow2.f32 %v1207_v17 }
 0x961   :  { %4441 = vpow2.f32 %v1203_v12 }
 0x966   :  { %v4436_v18 = vpop.eup %4435 }
 0x967   :  { %v1215_v19 = vsel %vm356_vm4, %v4436_v18, 0.0  ;;  %v4438_v21 = vpop.eup %4437 }
 0x968   :  { %1216 = vadd.xlane.f32.xlu1 %v1215_v19  ;;  %v1209_v27 = vsel %vm356_vm4, %v4438_v21, 0.0 }
 0x96a   :  { %v4440_v23 = vpop.eup %4439 }
 0x96b   :  { %v1218_v25 = vsel %vm356_vm4, %v4440_v23, 0.0  ;;  %v4442_v28 = vpop.eup %4441 }
 0x96c   :  { %1219 = vadd.xlane.f32.xlu0 %v1218_v25  ;;  %1210 = vadd.xlane.f32.xlu1 %v1209_v27  ;;  %v1212_v30 = vsel %vm356_vm4, %v4442_v28, 0.0  ;;  %v1348_v27 = vrot.slane %v163_v60, %v1347_v8 }
 0x970   :  { %1213 = vadd.xlane.f32.xlu0 %v1212_v30 }
 0x97d   :  { %1231 = vrot.lane.b32.xlu1 %v4725_v16, %s4585_s21 }
 0x981   :  { %499 = vperm.xlu1 %4360, %v4787_v24  }
 0x985   :  { %504 = vperm.xlu1 %4360, %v4789_v26  }
 0x986   :  { %1278 = vrot.lane.b32.xlu0 %v4721_v15, %s4585_s21 }
 0x989   :  { %514 = vperm.xlu1 %4360, %v4785_v22  }
 0x98a   :  { %509 = vperm.xlu0 %4361, %v4783_v20  }
 0x98d   :  { %779 = vperm.xlu1 %4360, %v4833_v33  }
 0x98e   :  { %784 = vperm.xlu0 %4361, %v4835_v35  }
 0x991   :  { %789 = vperm.xlu1 %4360, %v4829_v29  }
 0x992   :  { %794 = vperm.xlu0 %4361, %v4831_v31  }
 0x995   :  { %1053 = vperm.xlu1 %4360, %v997_v46  }
 0x996   :  { %1058 = vperm.xlu0 %4361, %v1000_v48   ;;  %v4364_v48 = vld [vmem:[%s5357_s5 + $0x8] sm:$0xff]  }
 0x999   :  { %1063 = vperm.xlu1 %4360, %v4875_v42  }
 0x99a   :  { %1068 = vperm.xlu0 %4361, %v4877_v44  }
 0x9f5   :  { %v1217_v16 = vpop.xlane.xlu1 %1216 }
 0x9f6   :  { %4443 = vrcp.f32 %v1217_v16 }
 0x9f9   :  { %v1220_v15 = vpop.xlane.xlu0 %1219  ;;  %v1211_v22 = vpop.xlane.xlu1 %1210 }
 0x9fa   :  { %4445 = vrcp.f32 %v1220_v15 }
 0x9fb   :  { %4447 = vrcp.f32 %v1211_v22 }
 0x9fd   :  { %v1214_v20 = vpop.xlane.xlu0 %1213  ;;  %v1232_v24 = vpop.permute.xlu1 %1231 }
 0x9fe   :  { %4449 = vrcp.f32 %v1214_v20  ;;  %4095 = vmatpush3.bf16.msra.mxu1 %v1232_v24 }
 0x9ff   :  { %4106 = vmatprep.subr.bf16.mxu1 %v4364_v48 }
 0xa00   :  { %v4444_v29 = vpop.eup %4443 }
 0xa01   :  { %v1279_v26 = vpop.permute.xlu0 %1278  ;;  %v1227_v33 = vmul.f32 %v4444_v29, %v4436_v18  ;;  %v500_v50 = vpop.permute.xlu1 %499 }
 0xa02   :  { %4101 = vmatpush3.bf16.msra.mxu0 %v1279_v26  ;;  %v521_v6 = vmul.f32 %v520_v63, %v500_v50 }
 0xa03   :  { %4124 = vmatprep.subr.bf16.mxu0 %v4571_v1 }
 0xa04   :  { %v4446_v31 = vpop.eup %4445 }
 0xa05   :  { %v1228_v35 = vmul.f32 %v4446_v31, %v4440_v23  ;;  %v4448_v32 = vpop.eup %4447  ;;  %v505_v51 = vpop.permute.xlu1 %504 }
 0xa06   :  { %v1225_v37 = vmul.f32 %v4448_v32, %v4438_v21  ;;  %v522_v12 = vmul.f32 %v520_v63, %v505_v51  ;;  %v531_v21 = vadd.f32 %v3809_v9, %v521_v6 }
 0xa07   :  { %v1230_v34 = vpack.c.bf16 %v1228_v35, %v1227_v33 }
 0xa08   :  { %v4450_v36 = vpop.eup %4449  ;;  %v532_v15 = vadd.f32 %v3809_v9, %v522_v12 }
 0xa09   :  { %v1226_v38 = vmul.f32 %v4450_v36, %v4442_v28  ;;  %4103 = vmatmul.mubr.msk.bf16.vlgmr.msra.gmra.mrb[32].mxu0 %vm356_vm4, %v1230_v34  ;;  %v515_v52 = vpop.permute.xlu1 %514  ;;  %v510_v53 = vpop.permute.xlu0 %509  ;;  %v4936_v28 = vsel %vm158_vm5, 1.0, %v4571_v1 }
 0xa0a   :  { %4126 = vmatprep.mubr.msk.bf16.mxu0 %vm4572_vm2, %v4571_v1  ;;  %v523_v18 = vmul.f32 %v520_v63, %v510_v53  ;;  %v524_v30 = vmul.f32 %v520_v63, %v515_v52  ;;  %v245_v36 = vmul.f32 %v4936_v28, %v4715_v13  ;;  %v247_v13 = vmul.f32 %v4936_v28, %v4711_v10 }
 0xa0b   :  { %v1229_v39 = vpack.c.bf16 %v1226_v38, %v1225_v37 }
 0xa0c   :  { %v533_v26 = vadd.f32 %v3809_v9, %v523_v18  ;;  %v534_v37 = vadd.f32 %v3809_v9, %v524_v30 }
 0xa0d   :  { %4097 = vmatmul.mubr.msk.bf16.vlgmr.msra.gmra.mrb[28].mxu1 %vm356_vm4, %v1229_v39  ;;  %v780_v54 = vpop.permute.xlu1 %779  ;;  %v785_v56 = vpop.permute.xlu0 %784 }
 0xa0e   :  { %4107 = vmatpush3.bf16.msra.mxu1 %v4364_v48  ;;  %v801_v17 = vmul.f32 %v800_v4, %v780_v54  ;;  %v802_v23 = vmul.f32 %v800_v4, %v785_v56 }
 0xa0f   :  { %4112 = vmatprep.subr.bf16.mxu1 %v4912_v49 }
 0xa10   :  { %v805_v22 = vadd.f32 %v801_v17, %v531_v21  ;;  %v806_v33 = vadd.f32 %v802_v23, %v532_v15 }
 0xa11   :  { %v790_v58 = vpop.permute.xlu1 %789  ;;  %v795_v61 = vpop.permute.xlu0 %794 }
 0xa12   :  { %v803_v20 = vmul.f32 %v800_v4, %v790_v58  ;;  %v804_v29 = vmul.f32 %v800_v4, %v795_v61  ;;  %v82_v61 = vadd.s32 16, %v4915_v57  ;;  %v81_v4 = vadd.s32 8, %v4915_v57 }
 0xa14   :  { %v95_v23 = vand.u32 15, %v81_v4 }
 0xa15   :  { %v1054_v2 = vpop.permute.xlu1 %1053  ;;  %v1059_v5 = vpop.permute.xlu0 %1058 }
 0xa16   :  { %v1075_v25 = vmul.f32 %v1074_v7, %v1054_v2  ;;  %v1076_v24 = vmul.f32 %v1074_v7, %v1059_v5  ;;  %vm145_vm9 = vcmp.ne.s32.totalorder %v95_v23, 15 }
 0xa18   :  { %v1079_v35 = vadd.f32 %v1075_v25, %v805_v22 }
 0xa19   :  { %v1064_v19 = vpop.permute.xlu1 %1063  ;;  %v1069_v16 = vpop.permute.xlu0 %1068 }
 0xa1a   :  { %v1077_v32 = vmul.f32 %v1074_v7, %v1064_v19  ;;  %v1078_v38 = vmul.f32 %v1074_v7, %v1069_v16  ;;  %v102_v19 = vand.u32 15, %v82_v61 }
 0xa1c   :  { %vm134_vm8 = vcmp.ne.s32.totalorder %v102_v19, 0 }
 0xadc   :  { %v1318_v40 = vpop.f32.mrb[32].mxu0 }
 0xadd   :  { %v4104_v41 = vpop.f32.mrb[33].mxu0 }
 0xade   :  { %v1321_v42 = vpop.f32.mrb[34].mxu0  ;;  %v1080_v41 = vadd.f32 %v1076_v24, %v806_v33  ;;  %v3796_v24 = vsel %vm134_vm8, 1.0, %v4571_v1  ;;  %v83_v33 = vadd.s32 24, %v4915_v57 }
 0xadf   :  { %v4105_v43 = vpop.f32.mrb[35].mxu0 }
 0xae0   :  { %v1271_v44 = vpop.f32.mrb[28].mxu1 }
 0xae1   :  { %1327 = vperm.xlu1 %4360, %v1271_v44   ;;  %v4098_v45 = vpop.f32.mrb[29].mxu1  ;;  %v246_v44 = vmul.f32 %v4936_v28, %v4717_v14  ;;  %v248_v14 = vmul.f32 %v4936_v28, %v4713_v11 }
 0xae2   :  { %v1274_v46 = vpop.f32.mrb[30].mxu1  ;;  %v808_v45 = vadd.f32 %v804_v29, %v534_v37  ;;  %v3797_v29 = vsel %vm145_vm9, 1.0, %v4571_v1 }
 0xae3   :  { %1332 = vperm.xlu0 %4361, %v1274_v46   ;;  %v4099_v47 = vpop.f32.mrb[31].mxu1 }
 0xae4   :  { %v88_v47 = vand.u32 15, %v4915_v57  ;;  %v1082_v53 = vadd.f32 %v1078_v38, %v808_v45 }
 0xae5   :  { %1337 = vperm.xlu1 %4360, %v1318_v40   ;;  %v807_v40 = vadd.f32 %v803_v20, %v533_v26 }
 0xae6   :  { %vm132_vm6 = vcmp.ne.s32.totalorder %v88_v47, 0 }
 0xae7   :  { %1342 = vperm.xlu0 %4361, %v1321_v42   ;;  %v1081_v48 = vadd.f32 %v1077_v32, %v807_v40  ;;  %v3795_v7 = vsel %vm132_vm6, 1.0, %v4571_v1 }
 0xb60   :  { %v1328_v31 = vpop.permute.xlu1 %1327 }
 0xb61   :  { %v1349_v34 = vmul.f32 %v1348_v27, %v1328_v31 }
 0xb62   :  { %v1333_v39 = vpop.permute.xlu0 %1332 }
 0xb63   :  { %v1353_v42 = vadd.f32 %v1349_v34, %v1079_v35  ;;  %v1350_v43 = vmul.f32 %v1348_v27, %v1333_v39 }
 0xb64   :  { %v1338_v46 = vpop.permute.xlu1 %1337 }
 0xb65   :  { %v1357_v50 = vadd.f32 %v1353_v42, %v245_v36  ;;  %v1354_v51 = vadd.f32 %v1350_v43, %v1080_v41  ;;  %v1351_v52 = vmul.f32 %v1348_v27, %v1338_v46  ;;  %v109_v36 = vand.u32 15, %v83_v33  ;;  %v3831_v46 = vld [vmem:[%s5358_s6] ss:$0 sm:$0xff] }
 0xb66   :  { %v1343_v54 = vpop.permute.xlu0 %1342 }
 0xb67   :  { %v4945_v55 = vmax.f32 %v1357_v50, 0.0  ;;  %v1358_v56 = vadd.f32 %v1354_v51, %v246_v44  ;;  %v1355_v58 = vadd.f32 %v1351_v52, %v1081_v48  ;;  %v1352_v60 = vmul.f32 %v1348_v27, %v1343_v54  ;;  %v4366_v27 = vld [vmem:[%s5357_s5 + $0x10] sm:$0xff]  }
 0xb68   :  { %vm147_vm11 = vcmp.ne.s32.totalorder %v109_v36, 15 }
 0xb69   :  { %v4950_v63 = vmax.f32 %v1358_v56, 0.0  ;;  %v1359_v2 = vadd.f32 %v1355_v58, %v247_v13  ;;  %v1356_v3 = vadd.f32 %v1352_v60, %v1082_v53  ;;  %v1379_v10 = vrot.slane %v4945_v55, 7 }
 0xb6a   :  { %v1392_v34 = vrot.slane %v4945_v55, 1  ;;  %v3798_v41 = vsel %vm147_vm11, 1.0, %v4571_v1 }
 0xb6b   :  { %v1360_v5 = vadd.f32 %v1356_v3, %v248_v14  ;;  %v1416_v6 = vpack.c.bf16 %v4950_v63, %v4945_v55  ;;  %v1380_v11 = vrot.slane %v4950_v63, 7  ;;  %v4958_v9 = vmax.f32 %v1359_v2, 0.0 }
 0xb6c   :  { %v1390_v12 = vsel %vm1378_vm7, 0.0, %v1379_v10  ;;  %v1393_v22 = vrot.slane %v4950_v63, 1 }
 0xb6d   :  { %v4961_v17 = vmax.f32 %v1360_v5, 0.0  ;;  %4108 = vmatprep.mubr.msk.bf16.mxu1 %vm356_vm4, %v1416_v6  ;;  %v1381_v18 = vsel %vm1378_vm7, %v1379_v10, %v1380_v11  ;;  %v1404_v21 = vmul.f32 %v3795_v7, %v1390_v12  ;;  %v1382_v30 = vrot.slane %v4958_v9, 7 }
 0xb6e   :  { %v1395_v15 = vrot.slane %v4958_v9, 1  ;;  %v1394_v38 = vsel %vm1391_vm10, %v1392_v34, %v1393_v22 }
 0xb6f   :  { %v1417_v25 = vpack.c.bf16 %v4961_v17, %v4958_v9  ;;  %v1408_v16 = vpack.c.bf16 %v1381_v18, %v1404_v21  ;;  %v1384_v20 = vrot.slane %v4961_v17, 7  ;;  %v1383_v26 = vsel %vm1378_vm7, %v1380_v11, %v1382_v30 }
 0xb70   :  { %v1396_v31 = vsel %vm1391_vm10, %v1393_v22, %v1395_v15  ;;  %v1397_v39 = vrot.slane %v4961_v17, 1 }
 0xb71   :  { %4109 = vmatmul.mubr.msk.bf16.vlgmr.msra.gmra.mrb[32].mxu1 %vm356_vm4, %v1417_v25  ;;  %v1385_v35 = vsel %vm1378_vm7, %v1382_v30, %v1384_v20  ;;  %v1411_v32 = vmul.f32 %v3797_v29, %v1396_v31 }
 0xb72   :  { %4113 = vmatpush3.bf16.msra.mxu1 %v4912_v49  ;;  %4114 = vmatprep.mubr.msk.bf16.mxu1 %vm356_vm4, %v1408_v16  ;;  %v1406_v49 = vmul.f32 %v3796_v24, %v1383_v26  ;;  %v1403_v42 = vsel %vm1391_vm10, %v1397_v39, 0.0  ;;  %v1398_v44 = vsel %vm1391_vm10, %v1395_v15, %v1397_v39 }
 0xb73   :  { %4118 = vmatprep.subr.bf16.mxu1 %v4366_v27  ;;  %v1414_v40 = vpack.c.bf16 %v1411_v32, %v1394_v38  ;;  %v1413_v43 = vmul.f32 %v3798_v41, %v1403_v42 }
 0xb74   :  { %v1409_v37 = vpack.c.bf16 %v1385_v35, %v1406_v49 }
 0xb75   :  { %v1415_v45 = vpack.c.bf16 %v1413_v43, %v1398_v44 }
 0xb7d   :  { %4115 = vmatmul.mubr.msk.bf16.vlgmr.msra.gmra.mrb[32].mxu1 %vm356_vm4, %v1409_v37 }
 0xb7e   :  { %4119 = vmatpush3.bf16.msra.mxu1 %v4366_v27  ;;  %4120 = vmatprep.mubr.msk.bf16.mxu1 %vm356_vm4, %v1414_v40 }
 0xb7f   :  { %4142 = vmatprep.subr.bf16.mxu1 %v4571_v1 }
 0xb89   :  { %4121 = vmatmul.mubr.msk.bf16.vlgmr.msra.gmra.mrb[32].mxu1 %vm356_vm4, %v1415_v45 }
 0xb8a   :  { %4144 = vmatprep.mubr.msk.bf16.mxu1 %vm4572_vm2, %v4571_v1 }
 0xc5c   :  { %v4122_v47 = vpop.f32.mrb[32].mxu1 }
 0xc5d   :  { %v1586_v48 = vpop.f32.mrb[33].mxu1  ;;  %v4998_v51 = vadd.f32 %v4122_v47, %v3831_v46 }
 0xc5e   :  { %v4123_v50 = vpop.f32.mrb[34].mxu1  ;;  %v5002_v53 = vadd.f32 %v3831_v46, %v1586_v48 }
 0xc5f   :  { %v5000_v52 = vadd.f32 %v4123_v50, %v3831_v46  ;;  %v1589_v13 = vpop.f32.mrb[35].mxu1 }
 0xc60   :  { %v5004_v54 = vadd.f32 %v3831_v46, %v1589_v13 }
 0xc61   :  { %v5008_v56 = vpack.c.bf16 %v5000_v52, %v4998_v51 }
 0xc62   :  { %v5012_v58 = vpack.c.bf16 %v5004_v54, %v5002_v53  ;;  %v1616_v57 = vmul.f32 %v4936_v28, %v5004_v54 }
 0xc64   :  { %1622 = vrot.lane.b32.xlu0 %v5012_v58, %s4573_s0  ;;  %1624 = vrot.lane.b32.xlu1 %v5012_v58, %s4574_s1 }
 0xc68   :  { %1674 = vrot.lane.b32.xlu0 %v5008_v56, %s4573_s0  ;;  %1676 = vrot.lane.b32.xlu1 %v5008_v56, %s4574_s1 }
 0xcd6   :  { %v1625_v60 = vpop.permute.xlu1 %1624  ;;  %v1623_v2 = vpop.permute.xlu0 %1622 }
 0xcd7   :  { %v1630_v14 = vsel %vm256_vm3, %v1625_v60, 0 }
 0xcd8   :  { %4125 = vmatpush3.bf16.xpose.msra.mxu0 %v1630_v14 }
 0xcd9   :  { %4130 = vmatprep.subr.bf16.mxu0 %v4571_v1 }
 0xcda   :  { %v1677_v61 = vpop.permute.xlu1 %1676  ;;  %v1675_v10 = vpop.permute.xlu0 %1674 }
 0xcdb   :  { %v1682_v3 = vsel %vm256_vm3, %v1677_v61, 0 }
 0xcdf   :  { %4127 = vmatmul.mubr.msk.bf16.vlgmr.msra.gmra.mrb[36].mxu0 %vm256_vm3, %v1623_v2 }
 0xce0   :  { %4131 = vmatpush3.bf16.xpose.msra.mxu0 %v1682_v3  ;;  %4132 = vmatprep.mubr.msk.bf16.mxu0 %vm4572_vm2, %v4571_v1 }
 0xce1   :  { %4136 = vmatprep.subr.bf16.mxu0 %v4571_v1 }
 0xce7   :  { %4133 = vmatmul.mubr.msk.bf16.vlgmr.msra.gmra.mrb[40].mxu0 %vm256_vm3, %v1675_v10 }
 0xce8   :  { %4138 = vmatprep.mubr.msk.bf16.mxu0 %vm4572_vm2, %v4571_v1 }
 0xdb2   :  { %v1666_v4 = vpop.f32.mrb[36].mxu0 }
 0xdb3   :  { %v4128_v5 = vpop.f32.mrb[37].mxu0  ;;  %v1725_v6 = vsel %vm356_vm4, %v1666_v4, -inf }
 0xdb4   :  { %1726 = vmax.xlane.f32.xlu1 %v1725_v6  ;;  %v1669_v7 = vpop.f32.mrb[38].mxu0 }
 0xdb5   :  { %v4129_v11 = vpop.f32.mrb[39].mxu0  ;;  %v1728_v12 = vsel %vm356_vm4, %v1669_v7, -inf }
 0xdb6   :  { %1729 = vmax.xlane.f32.xlu0 %v1728_v12 }
 0xdba   :  { %v1718_v18 = vpop.f32.mrb[40].mxu0 }
 0xdbb   :  { %v4134_v19 = vpop.f32.mrb[41].mxu0  ;;  %v1731_v21 = vsel %vm356_vm4, %v1718_v18, -inf }
 0xdbc   :  { %1732 = vmax.xlane.f32.xlu0 %v1731_v21  ;;  %v1721_v23 = vpop.f32.mrb[42].mxu0 }
 0xdbd   :  { %v4135_v25 = vpop.f32.mrb[43].mxu0  ;;  %v1734_v27 = vsel %vm356_vm4, %v1721_v23, -inf }
 0xdbe   :  { %1735 = vmax.xlane.f32.xlu1 %v1734_v27 }
 0xdcf   :  { %1818 = vrot.lane.b32.xlu1 %v5008_v56, %s4575_s2 }
 0xdd2   :  { %1771 = vrot.lane.b32.xlu0 %v5012_v58, %s4575_s2 }
 0xdd3   :  { %1905 = vrot.lane.b32.xlu1 %v5012_v58, %s4576_s22 }
 0xe41   :  { %v1727_v30 = vpop.xlane.xlu1 %1726 }
 0xe42   :  { %v1737_v16 = vsub.f32 %v1666_v4, %v1727_v30 }
 0xe43   :  { %v1730_v15 = vpop.xlane.xlu0 %1729 }
 0xe44   :  { %v1741_v22 = vmul.f32 1.442695, %v1737_v16  ;;  %v1738_v20 = vsub.f32 %v1669_v7, %v1730_v15 }
 0xe46   :  { %4451 = vpow2.f32 %v1741_v22  ;;  %v1743_v24 = vmul.f32 1.442695, %v1738_v20 }
 0xe48   :  { %4453 = vpow2.f32 %v1743_v24 }
 0xe49   :  { %v1733_v26 = vpop.xlane.xlu0 %1732 }
 0xe4a   :  { %v1739_v29 = vsub.f32 %v1718_v18, %v1733_v26 }
 0xe4b   :  { %v1736_v31 = vpop.xlane.xlu1 %1735 }
 0xe4c   :  { %v1745_v33 = vmul.f32 1.442695, %v1739_v29  ;;  %v1740_v49 = vsub.f32 %v1721_v23, %v1736_v31 }
 0xe4d   :  { %v1772_v35 = vpop.permute.xlu0 %1771 }
 0xe4e   :  { %4455 = vpow2.f32 %v1745_v33  ;;  %v1747_v32 = vmul.f32 1.442695, %v1740_v49  ;;  %4137 = vmatpush3.bf16.msra.mxu0 %v1772_v35 }
 0xe4f   :  { %v1819_v34 = vpop.permute.xlu1 %1818  ;;  %4148 = vmatprep.subr.bf16.mxu0 %v4571_v1 }
 0xe50   :  { %v4452_v36 = vpop.eup %4451  ;;  %4457 = vpow2.f32 %v1747_v32  ;;  %4143 = vmatpush3.bf16.msra.mxu1 %v1819_v34 }
 0xe51   :  { %v1749_v37 = vsel %vm356_vm4, %v4452_v36, 0.0  ;;  %4154 = vmatprep.subr.bf16.mxu1 %v4571_v1 }
 0xe52   :  { %v4454_v38 = vpop.eup %4453  ;;  %1750 = vadd.xlane.f32.xlu0 %v1749_v37 }
 0xe53   :  { %v1752_v39 = vsel %vm356_vm4, %v4454_v38, 0.0  ;;  %v1906_v44 = vpop.permute.xlu1 %1905 }
 0xe54   :  { %1753 = vadd.xlane.f32.xlu1 %v1752_v39  ;;  %v1911_v2 = vsel %vm256_vm3, %v1906_v44, 0 }
 0xe58   :  { %v4456_v40 = vpop.eup %4455 }
 0xe59   :  { %v1755_v41 = vsel %vm356_vm4, %v4456_v40, 0.0 }
 0xe5a   :  { %v4458_v42 = vpop.eup %4457  ;;  %1756 = vadd.xlane.f32.xlu0 %v1755_v41 }
 0xe5b   :  { %v1758_v43 = vsel %vm356_vm4, %v4458_v42, 0.0 }
 0xe5c   :  { %1759 = vadd.xlane.f32.xlu1 %v1758_v43 }
 0xe6d   :  { %1903 = vrot.lane.b32.xlu1 %v5012_v58, %s4577_s23 }
 0xe70   :  { %1956 = vrot.lane.b32.xlu0 %v5008_v56, %s4576_s22 }
 0xe74   :  { %1954 = vrot.lane.b32.xlu0 %v5008_v56, %s4577_s23 }
 0xedf   :  { %v1751_v45 = vpop.xlane.xlu0 %1750 }
 0xee0   :  { %4459 = vrcp.f32 %v1751_v45 }
 0xee1   :  { %v1754_v46 = vpop.xlane.xlu1 %1753 }
 0xee2   :  { %4461 = vrcp.f32 %v1754_v46 }
 0xee7   :  { %v1757_v47 = vpop.xlane.xlu0 %1756 }
 0xee8   :  { %4463 = vrcp.f32 %v1757_v47 }
 0xee9   :  { %v1760_v48 = vpop.xlane.xlu1 %1759 }
 0xeea   :  { %v4460_v50 = vpop.eup %4459  ;;  %4465 = vrcp.f32 %v1760_v48 }
 0xeeb   :  { %v1765_v60 = vmul.f32 %v4460_v50, %v4452_v36  ;;  %v1957_v6 = vpop.permute.xlu0 %1956 }
 0xeec   :  { %v4462_v13 = vpop.eup %4461  ;;  %v1962_v12 = vsel %vm256_vm3, %v1957_v6, 0 }
 0xeed   :  { %v1766_v14 = vmul.f32 %v4462_v13, %v4454_v38  ;;  %v1904_v11 = vpop.permute.xlu1 %1903 }
 0xeef   :  { %v1769_v61 = vpack.c.bf16 %v1766_v14, %v1765_v60  ;;  %v1955_v18 = vpop.permute.xlu0 %1954 }
 0xef1   :  { %4139 = vmatmul.mubr.msk.bf16.vlgmr.msra.gmra.mrb[44].mxu0 %vm356_vm4, %v1769_v61 }
 0xef2   :  { %v4464_v3 = vpop.eup %4463  ;;  %4149 = vmatpush3.bf16.xpose.msra.mxu0 %v1911_v2  ;;  %4150 = vmatprep.mubr.msk.bf16.mxu0 %vm4572_vm2, %v4571_v1 }
 0xef3   :  { %4160 = vmatprep.subr.bf16.mxu0 %v4571_v1  ;;  %v1767_v4 = vmul.f32 %v4464_v3, %v4456_v40 }
 0xef4   :  { %v4466_v10 = vpop.eup %4465 }
 0xef5   :  { %v1768_v5 = vmul.f32 %v4466_v10, %v4458_v42 }
 0xef7   :  { %v1770_v7 = vpack.c.bf16 %v1768_v5, %v1767_v4 }
 0xef9   :  { %4145 = vmatmul.mubr.msk.bf16.vlgmr.msra.gmra.mrb[36].mxu1 %vm356_vm4, %v1770_v7  ;;  %4151 = vmatmul.mubr.msk.bf16.vlgmr.msra.gmra.mrb[48].mxu0 %vm256_vm3, %v1904_v11 }
 0xefa   :  { %4155 = vmatpush3.bf16.xpose.msra.mxu1 %v1962_v12  ;;  %4156 = vmatprep.mubr.msk.bf16.mxu1 %vm4572_vm2, %v4571_v1 }
 0xefb   :  { %4166 = vmatprep.subr.bf16.mxu1 %v4571_v1  ;;  %4162 = vmatprep.mubr.msk.bf16.mxu0 %vm4572_vm2, %v4571_v1 }
 0xf01   :  { %4157 = vmatmul.mubr.msk.bf16.vlgmr.msra.gmra.mrb[40].mxu1 %vm256_vm3, %v1955_v18 }
 0xf02   :  { %4168 = vmatprep.mubr.msk.bf16.mxu1 %vm4572_vm2, %v4571_v1 }
 0xfc4   :  { %v5070_v19 = vpop.f32.mrb[44].mxu0 }
 0xfc5   :  { %v4140_v21 = vpop.f32.mrb[45].mxu0 }
 0xfc6   :  { %v5072_v23 = vpop.f32.mrb[46].mxu0 }
 0xfc7   :  { %v4141_v25 = vpop.f32.mrb[47].mxu0 }
 0xfcc   :  { %v5074_v27 = vpop.f32.mrb[36].mxu1  ;;  %v1947_v30 = vpop.f32.mrb[48].mxu0 }
 0xfcd   :  { %v4146_v16 = vpop.f32.mrb[37].mxu1  ;;  %v4152_v15 = vpop.f32.mrb[49].mxu0  ;;  %v2005_v22 = vsel %vm356_vm4, %v1947_v30, -inf }
 0xfce   :  { %v5077_v20 = vpop.f32.mrb[38].mxu1  ;;  %2006 = vmax.xlane.f32.xlu1 %v2005_v22  ;;  %v1950_v24 = vpop.f32.mrb[50].mxu0 }
 0xfcf   :  { %v4147_v26 = vpop.f32.mrb[39].mxu1  ;;  %v4153_v29 = vpop.f32.mrb[51].mxu0  ;;  %v2008_v31 = vsel %vm356_vm4, %v1950_v24, -inf }
 0xfd0   :  { %2009 = vmax.xlane.f32.xlu0 %v2008_v31 }
 0xfd4   :  { %v1998_v33 = vpop.f32.mrb[40].mxu1 }
 0xfd5   :  { %v4158_v49 = vpop.f32.mrb[41].mxu1  ;;  %v2011_v35 = vsel %vm356_vm4, %v1998_v33, -inf }
 0xfd6   :  { %v2001_v32 = vpop.f32.mrb[42].mxu1  ;;  %2012 = vmax.xlane.f32.xlu0 %v2011_v35 }
 0xfd7   :  { %v4159_v34 = vpop.f32.mrb[43].mxu1  ;;  %v2014_v36 = vsel %vm356_vm4, %v2001_v32, -inf }
 0xfd8   :  { %2015 = vmax.xlane.f32.xlu1 %v2014_v36 }
 0xfe9   :  { %2098 = vrot.lane.b32.xlu1 %v5008_v56, %s4578_s24 }
 0xfec   :  { %2051 = vrot.lane.b32.xlu0 %v5012_v58, %s4578_s24 }
 0xfed   :  { %2179 = vrot.lane.b32.xlu1 %v5012_v58, %s4579_s25 }
0x105b   :  { %v2007_v37 = vpop.xlane.xlu1 %2006 }
0x105c   :  { %v2017_v38 = vsub.f32 %v1947_v30, %v2007_v37 }
0x105d   :  { %v2010_v39 = vpop.xlane.xlu0 %2009 }
0x105e   :  { %v2021_v40 = vmul.f32 1.442695, %v2017_v38  ;;  %v2018_v41 = vsub.f32 %v1950_v24, %v2010_v39 }
0x1060   :  { %4467 = vpow2.f32 %v2021_v40  ;;  %v2023_v42 = vmul.f32 1.442695, %v2018_v41 }
0x1062   :  { %4469 = vpow2.f32 %v2023_v42 }
0x1063   :  { %v2013_v43 = vpop.xlane.xlu0 %2012 }
0x1064   :  { %v2019_v44 = vsub.f32 %v1998_v33, %v2013_v43 }
0x1065   :  { %v2016_v45 = vpop.xlane.xlu1 %2015 }
0x1066   :  { %v2025_v46 = vmul.f32 1.442695, %v2019_v44  ;;  %v2020_v47 = vsub.f32 %v2001_v32, %v2016_v45 }
0x1067   :  { %v2052_v48 = vpop.permute.xlu0 %2051 }
0x1068   :  { %4471 = vpow2.f32 %v2025_v46  ;;  %v2027_v50 = vmul.f32 1.442695, %v2020_v47  ;;  %4161 = vmatpush3.bf16.msra.mxu0 %v2052_v48 }
0x1069   :  { %v2099_v13 = vpop.permute.xlu1 %2098  ;;  %4172 = vmatprep.subr.bf16.mxu0 %v4571_v1 }
0x106a   :  { %v4468_v60 = vpop.eup %4467  ;;  %4473 = vpow2.f32 %v2027_v50  ;;  %4167 = vmatpush3.bf16.msra.mxu1 %v2099_v13 }
0x106b   :  { %v2029_v14 = vsel %vm356_vm4, %v4468_v60, 0.0  ;;  %4178 = vmatprep.subr.bf16.mxu1 %v4571_v1 }
0x106c   :  { %v4470_v61 = vpop.eup %4469  ;;  %2030 = vadd.xlane.f32.xlu0 %v2029_v14 }
0x106d   :  { %v2032_v2 = vsel %vm356_vm4, %v4470_v61, 0.0  ;;  %v2180_v6 = vpop.permute.xlu1 %2179 }
0x106e   :  { %2033 = vadd.xlane.f32.xlu1 %v2032_v2  ;;  %v2185_v22 = vsel %vm256_vm3, %v2180_v6, 0 }
0x1072   :  { %v4472_v3 = vpop.eup %4471 }
0x1073   :  { %v2035_v10 = vsel %vm356_vm4, %v4472_v3, 0.0 }
0x1074   :  { %v4474_v4 = vpop.eup %4473  ;;  %2036 = vadd.xlane.f32.xlu0 %v2035_v10 }
0x1075   :  { %v2038_v5 = vsel %vm356_vm4, %v4474_v4, 0.0 }
0x1076   :  { %2039 = vadd.xlane.f32.xlu1 %v2038_v5 }
0x1087   :  { %2177 = vrot.lane.b32.xlu1 %v5012_v58, %s4580_s26 }
0x108a   :  { %2230 = vrot.lane.b32.xlu0 %v5008_v56, %s4579_s25 }
0x108e   :  { %2228 = vrot.lane.b32.xlu0 %v5008_v56, %s4580_s26 }
0x10f9   :  { %v2031_v7 = vpop.xlane.xlu0 %2030 }
0x10fa   :  { %4475 = vrcp.f32 %v2031_v7 }
0x10fb   :  { %v2034_v11 = vpop.xlane.xlu1 %2033 }
0x10fc   :  { %4477 = vrcp.f32 %v2034_v11 }
0x1101   :  { %v2037_v12 = vpop.xlane.xlu0 %2036 }
0x1102   :  { %4479 = vrcp.f32 %v2037_v12 }
0x1103   :  { %v2040_v18 = vpop.xlane.xlu1 %2039 }
0x1104   :  { %v4476_v21 = vpop.eup %4475  ;;  %4481 = vrcp.f32 %v2040_v18 }
0x1105   :  { %v2045_v30 = vmul.f32 %v4476_v21, %v4468_v60  ;;  %v2231_v33 = vpop.permute.xlu0 %2230 }
0x1106   :  { %v4478_v25 = vpop.eup %4477  ;;  %v2236_v32 = vsel %vm256_vm3, %v2231_v33, 0 }
0x1107   :  { %v2046_v16 = vmul.f32 %v4478_v25, %v4470_v61  ;;  %v2178_v35 = vpop.permute.xlu1 %2177 }
0x1109   :  { %v2049_v15 = vpack.c.bf16 %v2046_v16, %v2045_v30  ;;  %v2229_v34 = vpop.permute.xlu0 %2228 }
0x110b   :  { %4163 = vmatmul.mubr.msk.bf16.vlgmr.msra.gmra.mrb[52].mxu0 %vm356_vm4, %v2049_v15 }
0x110c   :  { %v4480_v24 = vpop.eup %4479  ;;  %4173 = vmatpush3.bf16.xpose.msra.mxu0 %v2185_v22  ;;  %4174 = vmatprep.mubr.msk.bf16.mxu0 %vm4572_vm2, %v4571_v1 }
0x110d   :  { %4184 = vmatprep.subr.bf16.mxu0 %v4571_v1  ;;  %v2047_v29 = vmul.f32 %v4480_v24, %v4472_v3 }
0x110e   :  { %v4482_v26 = vpop.eup %4481 }
0x110f   :  { %v2048_v31 = vmul.f32 %v4482_v26, %v4474_v4 }
0x1111   :  { %v2050_v49 = vpack.c.bf16 %v2048_v31, %v2047_v29 }
0x1113   :  { %4169 = vmatmul.mubr.msk.bf16.vlgmr.msra.gmra.mrb[44].mxu1 %vm356_vm4, %v2050_v49  ;;  %4175 = vmatmul.mubr.msk.bf16.vlgmr.msra.gmra.mrb[56].mxu0 %vm256_vm3, %v2178_v35 }
0x1114   :  { %4179 = vmatpush3.bf16.xpose.msra.mxu1 %v2236_v32  ;;  %4180 = vmatprep.mubr.msk.bf16.mxu1 %vm4572_vm2, %v4571_v1 }
0x1115   :  { %4190 = vmatprep.subr.bf16.mxu1 %v4571_v1  ;;  %4186 = vmatprep.mubr.msk.bf16.mxu0 %vm4572_vm2, %v4571_v1 }
0x111b   :  { %4181 = vmatmul.mubr.msk.bf16.vlgmr.msra.gmra.mrb[48].mxu1 %vm256_vm3, %v2229_v34 }
0x111c   :  { %4192 = vmatprep.mubr.msk.bf16.mxu1 %vm4572_vm2, %v4571_v1 }
0x11de   :  { %v5116_v36 = vpop.f32.mrb[52].mxu0 }
0x11df   :  { %v4164_v37 = vpop.f32.mrb[53].mxu0 }
0x11e0   :  { %v5118_v38 = vpop.f32.mrb[54].mxu0 }
0x11e1   :  { %v4165_v39 = vpop.f32.mrb[55].mxu0 }
0x11e6   :  { %v5120_v40 = vpop.f32.mrb[44].mxu1  ;;  %v2221_v41 = vpop.f32.mrb[56].mxu0 }
0x11e7   :  { %v4170_v42 = vpop.f32.mrb[45].mxu1  ;;  %v4176_v43 = vpop.f32.mrb[57].mxu0  ;;  %v2279_v44 = vsel %vm356_vm4, %v2221_v41, -inf }
0x11e8   :  { %v5123_v45 = vpop.f32.mrb[46].mxu1  ;;  %2280 = vmax.xlane.f32.xlu1 %v2279_v44  ;;  %v2224_v46 = vpop.f32.mrb[58].mxu0 }
0x11e9   :  { %v4171_v47 = vpop.f32.mrb[47].mxu1  ;;  %v4177_v48 = vpop.f32.mrb[59].mxu0  ;;  %v2282_v50 = vsel %vm356_vm4, %v2224_v46, -inf }
0x11ea   :  { %2283 = vmax.xlane.f32.xlu0 %v2282_v50 }
0x11ee   :  { %v2272_v13 = vpop.f32.mrb[48].mxu1 }
0x11ef   :  { %v4182_v60 = vpop.f32.mrb[49].mxu1  ;;  %v2285_v14 = vsel %vm356_vm4, %v2272_v13, -inf }
0x11f0   :  { %v2275_v61 = vpop.f32.mrb[50].mxu1  ;;  %2286 = vmax.xlane.f32.xlu0 %v2285_v14 }
0x11f1   :  { %v4183_v2 = vpop.f32.mrb[51].mxu1  ;;  %v2288_v3 = vsel %vm356_vm4, %v2275_v61, -inf }
0x11f2   :  { %2289 = vmax.xlane.f32.xlu1 %v2288_v3 }
0x1203   :  { %2372 = vrot.lane.b32.xlu1 %v5008_v56, %s4581_s27 }
0x1206   :  { %2325 = vrot.lane.b32.xlu0 %v5012_v58, %s4581_s27 }
0x1207   :  { %2453 = vrot.lane.b32.xlu1 %v5012_v58, %s4582_s28 }
0x1275   :  { %v2281_v10 = vpop.xlane.xlu1 %2280 }
0x1276   :  { %v2291_v4 = vsub.f32 %v2221_v41, %v2281_v10 }
0x1277   :  { %v2284_v5 = vpop.xlane.xlu0 %2283 }
0x1278   :  { %v2295_v6 = vmul.f32 1.442695, %v2291_v4  ;;  %v2292_v7 = vsub.f32 %v2224_v46, %v2284_v5 }
0x127a   :  { %4483 = vpow2.f32 %v2295_v6  ;;  %v2297_v11 = vmul.f32 1.442695, %v2292_v7 }
0x127c   :  { %4485 = vpow2.f32 %v2297_v11 }
0x127d   :  { %v2287_v12 = vpop.xlane.xlu0 %2286 }
0x127e   :  { %v2293_v18 = vsub.f32 %v2272_v13, %v2287_v12 }
0x127f   :  { %v2290_v21 = vpop.xlane.xlu1 %2289 }
0x1280   :  { %v2299_v25 = vmul.f32 1.442695, %v2293_v18  ;;  %v2294_v30 = vsub.f32 %v2275_v61, %v2290_v21 }
0x1281   :  { %v2326_v16 = vpop.permute.xlu0 %2325 }
0x1282   :  { %4487 = vpow2.f32 %v2299_v25  ;;  %v2301_v15 = vmul.f32 1.442695, %v2294_v30  ;;  %4185 = vmatpush3.bf16.msra.mxu0 %v2326_v16 }
0x1283   :  { %v2373_v22 = vpop.permute.xlu1 %2372  ;;  %4196 = vmatprep.subr.bf16.mxu0 %v4571_v1 }
0x1284   :  { %v4484_v24 = vpop.eup %4483  ;;  %4489 = vpow2.f32 %v2301_v15  ;;  %4191 = vmatpush3.bf16.msra.mxu1 %v2373_v22 }
0x1285   :  { %v2303_v26 = vsel %vm356_vm4, %v4484_v24, 0.0  ;;  %4202 = vmatprep.subr.bf16.mxu1 %v4571_v1 }
0x1286   :  { %v4486_v29 = vpop.eup %4485  ;;  %2304 = vadd.xlane.f32.xlu0 %v2303_v26 }
0x1287   :  { %v2306_v31 = vsel %vm356_vm4, %v4486_v29, 0.0  ;;  %v2454_v34 = vpop.permute.xlu1 %2453 }
0x1288   :  { %2307 = vadd.xlane.f32.xlu1 %v2306_v31  ;;  %v2459_v50 = vsel %vm256_vm3, %v2454_v34, 0 }
0x128c   :  { %v4488_v33 = vpop.eup %4487 }
0x128d   :  { %v2309_v49 = vsel %vm356_vm4, %v4488_v33, 0.0 }
0x128e   :  { %v4490_v35 = vpop.eup %4489  ;;  %2310 = vadd.xlane.f32.xlu0 %v2309_v49 }
0x128f   :  { %v2312_v32 = vsel %vm356_vm4, %v4490_v35, 0.0 }
0x1290   :  { %2313 = vadd.xlane.f32.xlu1 %v2312_v32 }
0x12a1   :  { %2451 = vrot.lane.b32.xlu1 %v5012_v58, %s4583_s9 }
0x12a4   :  { %2504 = vrot.lane.b32.xlu0 %v5008_v56, %s4582_s28 }
0x12a8   :  { %2502 = vrot.lane.b32.xlu0 %v5008_v56, %s4583_s9 }
0x1313   :  { %v2305_v37 = vpop.xlane.xlu0 %2304 }
0x1314   :  { %4491 = vrcp.f32 %v2305_v37 }
0x1315   :  { %v2308_v39 = vpop.xlane.xlu1 %2307 }
0x1316   :  { %4493 = vrcp.f32 %v2308_v39 }
0x131b   :  { %v2311_v41 = vpop.xlane.xlu0 %2310 }
0x131c   :  { %4495 = vrcp.f32 %v2311_v41 }
0x131d   :  { %v2314_v42 = vpop.xlane.xlu1 %2313 }
0x131e   :  { %v4492_v43 = vpop.eup %4491  ;;  %4497 = vrcp.f32 %v2314_v42 }
0x131f   :  { %v2319_v46 = vmul.f32 %v4492_v43, %v4484_v24  ;;  %v2505_v2 = vpop.permute.xlu0 %2504 }
0x1320   :  { %v4494_v44 = vpop.eup %4493  ;;  %v2510_v4 = vsel %vm256_vm3, %v2505_v2, 0 }
0x1321   :  { %v2320_v47 = vmul.f32 %v4494_v44, %v4486_v29  ;;  %v2452_v10 = vpop.permute.xlu1 %2451 }
0x1323   :  { %v2323_v48 = vpack.c.bf16 %v2320_v47, %v2319_v46  ;;  %v2503_v5 = vpop.permute.xlu0 %2502 }
0x1325   :  { %4187 = vmatmul.mubr.msk.bf16.vlgmr.msra.gmra.mrb[60].mxu0 %vm356_vm4, %v2323_v48 }
0x1326   :  { %v4496_v13 = vpop.eup %4495  ;;  %4197 = vmatpush3.bf16.xpose.msra.mxu0 %v2459_v50  ;;  %4198 = vmatprep.mubr.msk.bf16.mxu0 %vm4572_vm2, %v4571_v1 }
0x1327   :  { %4208 = vmatprep.subr.bf16.mxu0 %v4571_v1  ;;  %v2321_v14 = vmul.f32 %v4496_v13, %v4488_v33 }
0x1328   :  { %v4498_v60 = vpop.eup %4497 }
0x1329   :  { %v2322_v61 = vmul.f32 %v4498_v60, %v4490_v35 }
0x132b   :  { %v2324_v3 = vpack.c.bf16 %v2322_v61, %v2321_v14 }
0x132d   :  { %4193 = vmatmul.mubr.msk.bf16.vlgmr.msra.gmra.mrb[52].mxu1 %vm356_vm4, %v2324_v3  ;;  %4199 = vmatmul.mubr.msk.bf16.vlgmr.msra.gmra.mrb[64].mxu0 %vm256_vm3, %v2452_v10 }
0x132e   :  { %4203 = vmatpush3.bf16.xpose.msra.mxu1 %v2510_v4  ;;  %4204 = vmatprep.mubr.msk.bf16.mxu1 %vm4572_vm2, %v4571_v1 }
0x132f   :  { %4214 = vmatprep.subr.bf16.mxu1 %v4571_v1  ;;  %4210 = vmatprep.mubr.msk.bf16.mxu0 %vm4572_vm2, %v4571_v1 }
0x1335   :  { %4205 = vmatmul.mubr.msk.bf16.vlgmr.msra.gmra.mrb[56].mxu1 %vm256_vm3, %v2503_v5 }
0x1336   :  { %4216 = vmatprep.mubr.msk.bf16.mxu1 %vm4572_vm2, %v4571_v1 }
0x13f8   :  { %v2365_v6 = vpop.f32.mrb[60].mxu0 }
0x13f9   :  { %v4188_v7 = vpop.f32.mrb[61].mxu0 }
0x13fa   :  { %v2368_v11 = vpop.f32.mrb[62].mxu0 }
0x13fb   :  { %v4189_v12 = vpop.f32.mrb[63].mxu0 }
0x1400   :  { %v2412_v18 = vpop.f32.mrb[52].mxu1  ;;  %v2495_v21 = vpop.f32.mrb[64].mxu0 }
0x1401   :  { %v4194_v25 = vpop.f32.mrb[53].mxu1  ;;  %v4200_v30 = vpop.f32.mrb[65].mxu0  ;;  %v2553_v16 = vsel %vm356_vm4, %v2495_v21, -inf }
0x1402   :  { %v2415_v15 = vpop.f32.mrb[54].mxu1  ;;  %2554 = vmax.xlane.f32.xlu1 %v2553_v16  ;;  %v2498_v22 = vpop.f32.mrb[66].mxu0 }
0x1403   :  { %v4195_v24 = vpop.f32.mrb[55].mxu1  ;;  %v4201_v26 = vpop.f32.mrb[67].mxu0  ;;  %v2556_v29 = vsel %vm356_vm4, %v2498_v22, -inf }
0x1404   :  { %2557 = vmax.xlane.f32.xlu0 %v2556_v29 }
0x1408   :  { %v2546_v31 = vpop.f32.mrb[56].mxu1 }
0x1409   :  { %v4206_v33 = vpop.f32.mrb[57].mxu1  ;;  %v2559_v49 = vsel %vm356_vm4, %v2546_v31, -inf }
0x140a   :  { %v2549_v35 = vpop.f32.mrb[58].mxu1  ;;  %2560 = vmax.xlane.f32.xlu0 %v2559_v49  ;;  %v4367_v33 = vld [vmem:[#allocation3 + $0x8] sm:$0xff]   ;;  %v4368_v49 = vld [vmem:[#allocation3] sm:$0xff]  }
0x140b   :  { %v4207_v32 = vpop.f32.mrb[59].mxu1  ;;  %v2562_v34 = vsel %vm356_vm4, %v2549_v35, -inf }
0x140c   :  { %2563 = vmax.xlane.f32.xlu1 %v2562_v34 }
0x148f   :  { %v2555_v37 = vpop.xlane.xlu1 %2554 }
0x1490   :  { %v2565_v39 = vsub.f32 %v2495_v21, %v2555_v37 }
0x1491   :  { %v2558_v41 = vpop.xlane.xlu0 %2557 }
0x1492   :  { %v2569_v42 = vmul.f32 1.442695, %v2565_v39  ;;  %v2566_v43 = vsub.f32 %v2498_v22, %v2558_v41 }
0x1494   :  { %4499 = vpow2.f32 %v2569_v42  ;;  %v2571_v44 = vmul.f32 1.442695, %v2566_v43  ;;  %v1372_v43 = vld [vmem:[%s5359_s7] sm:$0xf] }
0x1496   :  { %4501 = vpow2.f32 %v2571_v44 }
0x1497   :  { %v2561_v46 = vpop.xlane.xlu0 %2560 }
0x1498   :  { %v2567_v47 = vsub.f32 %v2546_v31, %v2561_v46  ;;  %v1888_v46 = vrot.slane %v1372_v43, %v519_v59  ;;  %v2716_v59 = vrot.slane %v1372_v43, %v1347_v8 }
0x1499   :  { %v2564_v48 = vpop.xlane.xlu1 %2563 }
0x149a   :  { %v2573_v50 = vmul.f32 1.442695, %v2567_v47  ;;  %v2568_v13 = vsub.f32 %v2549_v35, %v2564_v48  ;;  %v2168_v48 = vrot.slane %v1372_v43, %v799_v62 }
0x149c   :  { %4503 = vpow2.f32 %v2573_v50  ;;  %v2575_v60 = vmul.f32 1.442695, %v2568_v13 }
0x149e   :  { %v4500_v14 = vpop.eup %4499  ;;  %4505 = vpow2.f32 %v2575_v60  ;;  %v2442_v60 = vrot.slane %v1372_v43, %v1073_v0 }
0x149f   :  { %v2577_v61 = vsel %vm356_vm4, %v4500_v14, 0.0 }
0x14a0   :  { %v4502_v2 = vpop.eup %4501  ;;  %2578 = vadd.xlane.f32.xlu0 %v2577_v61 }
0x14a1   :  { %v2580_v3 = vsel %vm356_vm4, %v4502_v2, 0.0 }
0x14a2   :  { %2581 = vadd.xlane.f32.xlu1 %v2580_v3 }
0x14a6   :  { %v4504_v10 = vpop.eup %4503 }
0x14a7   :  { %v2583_v4 = vsel %vm356_vm4, %v4504_v10, 0.0 }
0x14a8   :  { %v4506_v5 = vpop.eup %4505  ;;  %2584 = vadd.xlane.f32.xlu0 %v2583_v4 }
0x14a9   :  { %v2586_v7 = vsel %vm356_vm4, %v4506_v5, 0.0 }
0x14aa   :  { %2587 = vadd.xlane.f32.xlu1 %v2586_v7 }
0x14bb   :  { %2646 = vrot.lane.b32.xlu1 %v5008_v56, %s4585_s21 }
0x14be   :  { %2599 = vrot.lane.b32.xlu0 %v5012_v58, %s4585_s21 }
0x14bf   :  { %1867 = vperm.xlu1 %4360, %v5070_v19  }
0x14c2   :  { %1872 = vperm.xlu0 %4361, %v5072_v23  }
0x14c3   :  { %1877 = vperm.xlu1 %4360, %v5074_v27  }
0x14c6   :  { %1882 = vperm.xlu0 %4361, %v5077_v20  }
0x14c7   :  { %2147 = vperm.xlu1 %4360, %v5116_v36  }
0x14ca   :  { %2152 = vperm.xlu0 %4361, %v5118_v38  }
0x14cb   :  { %2157 = vperm.xlu1 %4360, %v5120_v40  }
0x14ce   :  { %2162 = vperm.xlu0 %4361, %v5123_v45  }
0x14cf   :  { %2421 = vperm.xlu1 %4360, %v2365_v6  }
0x14d2   :  { %2426 = vperm.xlu0 %4361, %v2368_v11  }
0x14d3   :  { %2431 = vperm.xlu1 %4360, %v2412_v18  }
0x14d6   :  { %2436 = vperm.xlu0 %4361, %v2415_v15  }
0x152d   :  { %v2579_v56 = vpop.xlane.xlu0 %2578 }
0x152e   :  { %4507 = vrcp.f32 %v2579_v56 }
0x152f   :  { %v2582_v58 = vpop.xlane.xlu1 %2581 }
0x1530   :  { %4509 = vrcp.f32 %v2582_v58 }
0x1535   :  { %v2585_v19 = vpop.xlane.xlu0 %2584 }
0x1536   :  { %4511 = vrcp.f32 %v2585_v19 }
0x1537   :  { %v2588_v23 = vpop.xlane.xlu1 %2587 }
0x1538   :  { %v4508_v27 = vpop.eup %4507  ;;  %4513 = vrcp.f32 %v2588_v23 }
0x1539   :  { %v2600_v20 = vpop.permute.xlu0 %2599  ;;  %v2593_v38 = vmul.f32 %v4508_v27, %v4500_v14  ;;  %v3836_v14 = vld [vmem:[%s5360_s8] ss:$0 sm:$0xff] }
0x153a   :  { %v4510_v36 = vpop.eup %4509  ;;  %4209 = vmatpush3.bf16.msra.mxu0 %v2600_v20 }
0x153b   :  { %v2594_v40 = vmul.f32 %v4510_v36, %v4502_v2  ;;  %v2647_v12 = vpop.permute.xlu1 %2646  ;;  %4220 = vmatprep.subr.bf16.mxu0 %v4571_v1  ;;  %v1615_v36 = vmul.f32 %v4936_v28, %v5002_v53 }
0x153c   :  { %4215 = vmatpush3.bf16.msra.mxu1 %v2647_v12 }
0x153d   :  { %v2597_v45 = vpack.c.bf16 %v2594_v40, %v2593_v38  ;;  %4226 = vmatprep.subr.bf16.mxu1 %v4571_v1 }
0x153f   :  { %4211 = vmatmul.mubr.msk.bf16.vlgmr.msra.gmra.mrb[68].mxu0 %vm356_vm4, %v2597_v45  ;;  %v1868_v35 = vpop.permute.xlu1 %1867 }
0x1540   :  { %v4512_v6 = vpop.eup %4511  ;;  %4222 = vmatprep.mubr.msk.bf16.mxu0 %vm4572_vm2, %v4571_v1  ;;  %4221 = vmatpush3.bf16.msra.mxu0 %v4367_v33  ;;  %v1889_v13 = vmul.f32 %v1888_v46, %v1868_v35  ;;  %v1617_v35 = vmul.f32 %v4936_v28, %v4998_v51 }
0x1541   :  { %v2595_v18 = vmul.f32 %v4512_v6, %v4504_v10  ;;  %4232 = vmatprep.subr.bf16.mxu0 %v4571_v1  ;;  %v1873_v32 = vpop.permute.xlu0 %1872 }
0x1542   :  { %v4514_v11 = vpop.eup %4513  ;;  %v1890_v61 = vmul.f32 %v1888_v46, %v1873_v32  ;;  %v1899_v10 = vadd.f32 %v3836_v14, %v1889_v13 }
0x1543   :  { %v2596_v21 = vmul.f32 %v4514_v11, %v4506_v5  ;;  %v1878_v34 = vpop.permute.xlu1 %1877 }
0x1544   :  { %v1900_v62 = vadd.f32 %v3836_v14, %v1890_v61  ;;  %v1891_v23 = vmul.f32 %v1888_v46, %v1878_v34 }
0x1545   :  { %v2598_v25 = vpack.c.bf16 %v2596_v21, %v2595_v18  ;;  %v1883_v37 = vpop.permute.xlu0 %1882 }
0x1546   :  { %v1892_v38 = vmul.f32 %v1888_v46, %v1883_v37  ;;  %v1901_v18 = vadd.f32 %v3836_v14, %v1891_v23 }
0x1547   :  { %4217 = vmatmul.mubr.msk.bf16.vlgmr.msra.gmra.mrb[60].mxu1 %vm356_vm4, %v2598_v25  ;;  %v2148_v39 = vpop.permute.xlu1 %2147 }
0x1548   :  { %4228 = vmatprep.mubr.msk.bf16.mxu1 %vm4572_vm2, %v4571_v1  ;;  %4227 = vmatpush3.bf16.msra.mxu1 %v4368_v49  ;;  %v2169_v2 = vmul.f32 %v2168_v48, %v2148_v39 }
0x1549   :  { %4238 = vmatprep.subr.bf16.mxu1 %v4571_v1  ;;  %v2153_v41 = vpop.permute.xlu0 %2152 }
0x154a   :  { %v2170_v4 = vmul.f32 %v2168_v48, %v2153_v41  ;;  %v2173_v56 = vadd.f32 %v2169_v2, %v1899_v10 }
0x154b   :  { %v2158_v42 = vpop.permute.xlu1 %2157 }
0x154c   :  { %v2174_v0 = vadd.f32 %v2170_v4, %v1900_v62  ;;  %v2171_v12 = vmul.f32 %v2168_v48, %v2158_v42  ;;  %v1618_v42 = vmul.f32 %v4936_v28, %v5000_v52 }
0x154d   :  { %v2163_v44 = vpop.permute.xlu0 %2162 }
0x154e   :  { %v2172_v8 = vmul.f32 %v2168_v48, %v2163_v44 }
0x154f   :  { %v2422_v47 = vpop.permute.xlu1 %2421 }
0x1550   :  { %v2443_v5 = vmul.f32 %v2442_v60, %v2422_v47 }
0x1551   :  { %v2427_v50 = vpop.permute.xlu0 %2426 }
0x1552   :  { %v2444_v58 = vmul.f32 %v2442_v60, %v2427_v50  ;;  %v2447_v27 = vadd.f32 %v2443_v5, %v2173_v56 }
0x1553   :  { %v2432_v3 = vpop.permute.xlu1 %2431 }
0x1554   :  { %v2448_v45 = vadd.f32 %v2444_v58, %v2174_v0  ;;  %v2445_v21 = vmul.f32 %v2442_v60, %v2432_v3  ;;  %v4370_v0 = vld [vmem:[#allocation3 + $0x18] sm:$0xff]  }
0x1555   :  { %v2437_v7 = vpop.permute.xlu0 %2436 }
0x1612   :  { %v2639_v30 = vpop.f32.mrb[68].mxu0 }
0x1613   :  { %2695 = vperm.xlu1 %4360, %v2639_v30   ;;  %v4212_v16 = vpop.f32.mrb[69].mxu0 }
0x1614   :  { %v2642_v15 = vpop.f32.mrb[70].mxu0  ;;  %v1902_v16 = vadd.f32 %v3836_v14, %v1892_v38 }
0x1615   :  { %2700 = vperm.xlu0 %4361, %v2642_v15   ;;  %v4213_v22 = vpop.f32.mrb[71].mxu0  ;;  %v2446_v15 = vmul.f32 %v2442_v60, %v2437_v7 }
0x1616   :  { %v2175_v22 = vadd.f32 %v2171_v12, %v1901_v18  ;;  %v2176_v53 = vadd.f32 %v2172_v8, %v1902_v16 }
0x1618   :  { %v2450_v32 = vadd.f32 %v2446_v15, %v2176_v53 }
0x161a   :  { %v2686_v24 = vpop.f32.mrb[60].mxu1 }
0x161b   :  { %v4218_v26 = vpop.f32.mrb[61].mxu1  ;;  %2705 = vperm.xlu1 %4360, %v2686_v24  }
0x161c   :  { %v2689_v29 = vpop.f32.mrb[62].mxu1 }
0x161d   :  { %v4219_v31 = vpop.f32.mrb[63].mxu1  ;;  %2710 = vperm.xlu0 %4361, %v2689_v29  }
0x161e   :  { %v2449_v31 = vadd.f32 %v2445_v21, %v2175_v22 }
0x1692   :  { %v2696_v19 = vpop.permute.xlu1 %2695 }
0x1693   :  { %v2717_v20 = vmul.f32 %v2716_v59, %v2696_v19 }
0x1694   :  { %v2701_v40 = vpop.permute.xlu0 %2700 }
0x1695   :  { %v2721_v6 = vadd.f32 %v2717_v20, %v2447_v27  ;;  %v2718_v11 = vmul.f32 %v2716_v59, %v2701_v40 }
0x1697   :  { %v2725_v25 = vadd.f32 %v2721_v6, %v1615_v36  ;;  %v2722_v30 = vadd.f32 %v2718_v11, %v2448_v45 }
0x1699   :  { %v2729_v24 = vmax.f32 %v2725_v25, 0.0  ;;  %v2726_v26 = vadd.f32 %v2722_v30, %v1616_v57 }
0x169a   :  { %v2706_v29 = vpop.permute.xlu1 %2705 }
0x169b   :  { %v2730_v33 = vmax.f32 %v2726_v26, 0.0  ;;  %v2719_v49 = vmul.f32 %v2716_v59, %v2706_v29  ;;  %v2733_v34 = vadd.f32 %v2729_v24, %v4945_v55  ;;  %v4371_v29 = vld [vmem:[#allocation3 + $0x20] sm:$0xff]  }
0x169c   :  { %v2711_v54 = vpop.permute.xlu0 %2710 }
0x169d   :  { %v2734_v37 = vadd.f32 %v2730_v33, %v4950_v63  ;;  %v2723_v39 = vadd.f32 %v2719_v49, %v2449_v31  ;;  %v2720_v41 = vmul.f32 %v2716_v59, %v2711_v54  ;;  %v4369_v59 = vld [vmem:[#allocation3 + $0x10] sm:$0xff]  }
0x169f   :  { %v2737_v43 = vpack.c.bf16 %v2734_v37, %v2733_v34  ;;  %v2727_v44 = vadd.f32 %v2723_v39, %v1617_v35  ;;  %v2724_v46 = vadd.f32 %v2720_v41, %v2450_v32  ;;  %v4372_v39 = vld [vmem:[#allocation3 + $0x28] sm:$0xff]  }
0x16a1   :  { %v2731_v47 = vmax.f32 %v2727_v44, 0.0  ;;  %v2728_v48 = vadd.f32 %v2724_v46, %v1618_v42  ;;  %v2773_v13 = vunpack.c.l.b16 %v2737_v43  ;;  %v5218_v55 = vunpack.c.h.b16 %v2737_v43  ;;  %v4373_v46 = vld [vmem:[#allocation3 + $0x30] sm:$0xff]  }
0x16a3   :  { %v2732_v50 = vmax.f32 %v2728_v48, 0.0  ;;  %v2735_v51 = vadd.f32 %v2731_v47, %v4958_v9  ;;  %v2775_v61 = vrot.slane %v2773_v13, 1  ;;  %v2880_v2 = vrot.slane %v2773_v13, 2  ;;  %v4374_v48 = vld [vmem:[#allocation3 + $0x38] sm:$0xff]  }
0x16a4   :  { %v2934_v3 = vrot.slane %v2773_v13, 3  ;;  %v2988_v52 = vrot.slane %v2773_v13, 4  ;;  %v3042_v10 = vrot.slane %v2773_v13, 5  ;;  %v3096_v4 = vrot.slane %v2773_v13, 6 }
0x16a5   :  { %v2736_v60 = vadd.f32 %v2732_v50, %v4961_v17  ;;  %v3150_v12 = vrot.slane %v2773_v13, 7  ;;  %v3259_v57 = vrot.slane %v5218_v55, 1  ;;  %v3312_v18 = vrot.slane %v5218_v55, 2 }
0x16a6   :  { %v3366_v16 = vrot.slane %v5218_v55, 3  ;;  %v3420_v24 = vrot.slane %v5218_v55, 4  ;;  %v3474_v53 = vrot.slane %v5218_v55, 5  ;;  %v3528_v49 = vrot.slane %v5218_v55, 6 }
0x16a7   :  { %v2738_v14 = vpack.c.bf16 %v2736_v60, %v2735_v51  ;;  %v3582_v34 = vrot.slane %v5218_v55, 7  ;;  %v4376_v60 = vld [vmem:[#allocation3 + $0x48] sm:$0xff]  }
0x16a9   :  { %v2774_v63 = vunpack.c.l.b16 %v2738_v14  ;;  %v3205_v28 = vunpack.c.h.b16 %v2738_v14 }
0x16ab   :  { %v2777_v5 = vsel %vm2776_vm12, %v2774_v63, %v2775_v61  ;;  %v2828_v7 = vrot.slane %v2774_v63, 7  ;;  %v2881_v62 = vrot.slane %v2774_v63, 1  ;;  %v2935_v9 = vrot.slane %v2774_v63, 2  ;;  %v4378_v61 = vld [vmem:[#allocation3 + $0x58] sm:$0xff]  }
0x16ac   :  { %v2778_v56 = vpack.c.b16 %v2777_v5, %v2777_v5  ;;  %v2989_v17 = vrot.slane %v2774_v63, 3  ;;  %v3043_v58 = vrot.slane %v2774_v63, 4  ;;  %v3097_v19 = vrot.slane %v2774_v63, 5 }
0x16ad   :  { %v2829_v23 = vsel %vm2776_vm12, %v2828_v7, %v2773_v13  ;;  %v2882_v27 = vsel %vm2776_vm12, %v2881_v62, %v2880_v2  ;;  %v2936_v20 = vsel %vm2776_vm12, %v2935_v9, %v2934_v3  ;;  %v3151_v36 = vrot.slane %v2774_v63, 6  ;;  %v4375_v13 = vld [vmem:[#allocation3 + $0x40] sm:$0xff]  }
0x16ae   :  { %4223 = vmatmul.mubr.msk.bf16.vlgmr.msra.gmra.mrb[72].mxu0 %vm356_vm4, %v2778_v56  ;;  %v2830_v38 = vpack.c.b16 %v2829_v23, %v2829_v23  ;;  %v2990_v40 = vsel %vm2776_vm12, %v2989_v17, %v2988_v52  ;;  %v3044_v45 = vsel %vm2776_vm12, %v3043_v58, %v3042_v10  ;;  %v3098_v6 = vsel %vm2776_vm12, %v3097_v19, %v3096_v4  ;;  %v4379_v3 = vld [vmem:[#allocation3 + $0x60] sm:$0xff]   ;;  %v4380_v52 = vld [vmem:[#allocation3 + $0x68] sm:$0xff]   ;;  %v4381_v4 = vld [vmem:[#allocation3 + $0x70] sm:$0xff]  }
0x16af   :  { %4233 = vmatpush3.bf16.msra.mxu0 %v4369_v59  ;;  %4234 = vmatprep.mubr.msk.bf16.mxu0 %vm4572_vm2, %v4571_v1  ;;  %v3206_v11 = vrot.slane %v3205_v28, 7  ;;  %v3152_v8 = vsel %vm2776_vm12, %v3151_v36, %v3150_v12  ;;  %v3313_v21 = vrot.slane %v3205_v28, 1  ;;  %v3260_v30 = vsel %vm2776_vm12, %v3205_v28, %v3259_v57  ;;  %v4382_v59 = vld [vmem:[#allocation3 + $0x78] sm:$0xff]   ;;  %v4384_v17 = vld [vmem:[%s5363_s11 + $0x8] sm:$0xff]  }
0x16b0   :  { %4229 = vmatmul.mubr.msk.bf16.vlgmr.msra.gmra.mrb[64].mxu1 %vm356_vm4, %v2830_v38  ;;  %4244 = vmatprep.subr.bf16.mxu0 %v4571_v1  ;;  %v3367_v15 = vrot.slane %v3205_v28, 2  ;;  %v3421_v26 = vrot.slane %v3205_v28, 3  ;;  %v3475_v33 = vrot.slane %v3205_v28, 4  ;;  %v3529_v35 = vrot.slane %v3205_v28, 5  ;;  %v4383_v56 = vld [vmem:[%s5363_s11] sm:$0xff]  }
0x16b1   :  { %4239 = vmatpush3.bf16.msra.mxu1 %v4370_v0  ;;  %4240 = vmatprep.mubr.msk.bf16.mxu1 %vm4572_vm2, %v4571_v1  ;;  %v3207_v25 = vsel %vm2776_vm12, %v3206_v11, %v5218_v55  ;;  %v5243_v22 = vsel %vm2776_vm12, %v3313_v21, %v3312_v18  ;;  %v2883_v32 = vpack.c.b16 %v2882_v27, %v2882_v27  ;;  %v3583_v37 = vrot.slane %v3205_v28, 6  ;;  %v4377_v55 = vld [vmem:[#allocation3 + $0x50] sm:$0xff]  }
0x16b2   :  { %4250 = vmatprep.subr.bf16.mxu1 %v4571_v1  ;;  %v5248_v31 = vsel %vm2776_vm12, %v3367_v15, %v3366_v16  ;;  %v5252_v54 = vsel %vm2776_vm12, %v3421_v26, %v3420_v24  ;;  %v5256_v41 = vsel %vm2776_vm12, %v3475_v33, %v3474_v53  ;;  %v5259_v42 = vsel %vm2776_vm12, %v3529_v35, %v3528_v49 }
0x16b3   :  { %v2937_v43 = vpack.c.b16 %v2936_v20, %v2936_v20  ;;  %v5263_v44 = vsel %vm2776_vm12, %v3583_v37, %v3582_v34  ;;  %v2991_v47 = vpack.c.b16 %v2990_v40, %v2990_v40  ;;  %v3045_v50 = vpack.c.b16 %v3044_v45, %v3044_v45 }
0x16b4   :  { %v3099_v51 = vpack.c.b16 %v3098_v6, %v3098_v6  ;;  %v3153_v14 = vpack.c.b16 %v3152_v8, %v3152_v8  ;;  %v3208_v63 = vpack.c.b16 %v3207_v25, %v3207_v25  ;;  %v3261_v2 = vpack.c.b16 %v3260_v30, %v3260_v30 }
0x16b5   :  { %v3315_v28 = vpack.c.b16 %v5243_v22, %v5243_v22  ;;  %v3369_v10 = vpack.c.b16 %v5248_v31, %v5248_v31  ;;  %v3423_v5 = vpack.c.b16 %v5252_v54, %v5252_v54  ;;  %v3477_v7 = vpack.c.b16 %v5256_v41, %v5256_v41 }
0x16b6   :  { %4235 = vmatmul.mubr.msk.bf16.vlgmr.msra.gmra.mrb[76].mxu0 %vm356_vm4, %v2883_v32  ;;  %v3531_v62 = vpack.c.b16 %v5259_v42, %v5259_v42  ;;  %v3585_v9 = vpack.c.b16 %v5263_v44, %v5263_v44 }
0x16b7   :  { %4245 = vmatpush3.bf16.msra.mxu0 %v4371_v29  ;;  %4246 = vmatprep.mubr.msk.bf16.mxu0 %vm4572_vm2, %v4571_v1 }
0x16b8   :  { %4241 = vmatmul.mubr.msk.bf16.vlgmr.msra.gmra.mrb[68].mxu1 %vm356_vm4, %v2937_v43  ;;  %4256 = vmatprep.subr.bf16.mxu0 %v4571_v1 }
0x16b9   :  { %4251 = vmatpush3.bf16.msra.mxu1 %v4372_v39  ;;  %4252 = vmatprep.mubr.msk.bf16.mxu1 %vm4572_vm2, %v4571_v1 }
0x16ba   :  { %4262 = vmatprep.subr.bf16.mxu1 %v4571_v1 }
0x16be   :  { %4247 = vmatmul.mubr.msk.bf16.vlgmr.msra.gmra.mrb[80].mxu0 %vm356_vm4, %v2991_v47 }
0x16bf   :  { %4257 = vmatpush3.bf16.msra.mxu0 %v4373_v46  ;;  %4258 = vmatprep.mubr.msk.bf16.mxu0 %vm4572_vm2, %v4571_v1 }
0x16c0   :  { %4253 = vmatmul.mubr.msk.bf16.vlgmr.msra.gmra.mrb[72].mxu1 %vm356_vm4, %v3045_v50  ;;  %4268 = vmatprep.subr.bf16.mxu0 %v4571_v1 }
0x16c1   :  { %4263 = vmatpush3.bf16.msra.mxu1 %v4374_v48  ;;  %4264 = vmatprep.mubr.msk.bf16.mxu1 %vm4572_vm2, %v4571_v1 }
0x16c2   :  { %4274 = vmatprep.subr.bf16.mxu1 %v4571_v1 }
0x16c6   :  { %4259 = vmatmul.mubr.msk.bf16.vlgmr.msra.gmra.mrb[84].mxu0 %vm356_vm4, %v3099_v51 }
0x16c7   :  { %4269 = vmatpush3.bf16.msra.mxu0 %v4375_v13  ;;  %4270 = vmatprep.mubr.msk.bf16.mxu0 %vm4572_vm2, %v4571_v1 }
0x16c8   :  { %4265 = vmatmul.mubr.msk.bf16.vlgmr.msra.gmra.mrb[76].mxu1 %vm356_vm4, %v3153_v14  ;;  %4280 = vmatprep.subr.bf16.mxu0 %v4571_v1 }
0x16c9   :  { %4275 = vmatpush3.bf16.msra.mxu1 %v4376_v60  ;;  %4276 = vmatprep.mubr.msk.bf16.mxu1 %vm4572_vm2, %v4571_v1 }
0x16ca   :  { %4286 = vmatprep.subr.bf16.mxu1 %v4571_v1 }
0x16ce   :  { %4271 = vmatmul.mubr.msk.bf16.vlgmr.msra.gmra.mrb[88].mxu0 %vm356_vm4, %v3208_v63 }
0x16cf   :  { %4281 = vmatpush3.bf16.msra.mxu0 %v4377_v55  ;;  %4282 = vmatprep.mubr.msk.bf16.mxu0 %vm4572_vm2, %v4571_v1 }
0x16d0   :  { %4277 = vmatmul.mubr.msk.bf16.vlgmr.msra.gmra.mrb[80].mxu1 %vm356_vm4, %v3261_v2  ;;  %4292 = vmatprep.subr.bf16.mxu0 %v4571_v1 }
0x16d1   :  { %4287 = vmatpush3.bf16.msra.mxu1 %v4378_v61  ;;  %4288 = vmatprep.mubr.msk.bf16.mxu1 %vm4572_vm2, %v4571_v1 }
0x16d2   :  { %4298 = vmatprep.subr.bf16.mxu1 %v4571_v1 }
0x16d6   :  { %4283 = vmatmul.mubr.msk.bf16.vlgmr.msra.gmra.mrb[92].mxu0 %vm356_vm4, %v3315_v28 }
0x16d7   :  { %4293 = vmatpush3.bf16.msra.mxu0 %v4379_v3  ;;  %4294 = vmatprep.mubr.msk.bf16.mxu0 %vm4572_vm2, %v4571_v1 }
0x16d8   :  { %4289 = vmatmul.mubr.msk.bf16.vlgmr.msra.gmra.mrb[84].mxu1 %vm356_vm4, %v3369_v10  ;;  %4304 = vmatprep.subr.bf16.mxu0 %v4571_v1 }
0x16d9   :  { %4299 = vmatpush3.bf16.msra.mxu1 %v4380_v52  ;;  %4300 = vmatprep.mubr.msk.bf16.mxu1 %vm4572_vm2, %v4571_v1 }
0x16da   :  { %4310 = vmatprep.subr.bf16.mxu1 %v4571_v1 }
0x16de   :  { %4295 = vmatmul.mubr.msk.bf16.vlgmr.msra.gmra.mrb[96].mxu0 %vm356_vm4, %v3423_v5 }
0x16df   :  { %4305 = vmatpush3.bf16.msra.mxu0 %v4381_v4  ;;  %4306 = vmatprep.mubr.msk.bf16.mxu0 %vm4572_vm2, %v4571_v1 }
0x16e0   :  { %4301 = vmatmul.mubr.msk.bf16.vlgmr.msra.gmra.mrb[88].mxu1 %vm356_vm4, %v3477_v7  ;;  %4316 = vmatprep.subr.bf16.mxu0 %v4571_v1 }
0x16e1   :  { %4311 = vmatpush3.bf16.msra.mxu1 %v4382_v59  ;;  %4312 = vmatprep.mubr.msk.bf16.mxu1 %vm4572_vm2, %v4571_v1 }
0x16e2   :  { %4324 = vmatprep.subr.bf16.mxu1 %v4571_v1 }
0x16e6   :  { %4307 = vmatmul.mubr.msk.bf16.vlgmr.msra.gmra.mrb[100].mxu0 %vm356_vm4, %v3531_v62 }
0x16e7   :  { %4320 = vmatprep.mubr.msk.bf16.mxu0 %vm4572_vm2, %v4571_v1  ;;  %4317 = vmatpush3.bf16.msra.mxu0 %v4383_v56 }
0x16e8   :  { %4313 = vmatmul.mubr.msk.bf16.vlgmr.msra.gmra.mrb[92].mxu1 %vm356_vm4, %v3585_v9  ;;  %4318 = vmatprep.subr.bf16.mxu0 %v4571_v1 }
0x16e9   :  { %4328 = vmatprep.mubr.msk.bf16.mxu1 %vm4572_vm2, %v4571_v1 }
0x16eb   :  { %4319 = vmatpush3.bf16.msra.mxu0 %v4384_v17 }
0x1781   :  { %v2822_v58 = vpop.f32.mrb[72].mxu0 }
0x1782   :  { %v4224_v19 = vpop.f32.mrb[73].mxu0 }
0x1783   :  { %v2825_v23 = vpop.f32.mrb[74].mxu0  ;;  %v2874_v0 = vpop.f32.mrb[64].mxu1 }
0x1784   :  { %v2875_v27 = vadd.f32 %v2874_v0, %v2822_v58  ;;  %v4225_v20 = vpop.f32.mrb[75].mxu0  ;;  %v4230_v36 = vpop.f32.mrb[65].mxu1 }
0x1785   :  { %v2877_v38 = vpop.f32.mrb[66].mxu1 }
0x1786   :  { %v4231_v40 = vpop.f32.mrb[67].mxu1 }
0x1789   :  { %v2927_v12 = vpop.f32.mrb[76].mxu0 }
0x178a   :  { %v2933_v45 = vadd.f32 %v2927_v12, %v2875_v27  ;;  %v4236_v6 = vpop.f32.mrb[77].mxu0 }
0x178b   :  { %v2930_v11 = vpop.f32.mrb[78].mxu0  ;;  %v2981_v57 = vpop.f32.mrb[68].mxu1  ;;  %v3881_v6 = vld [vmem:[#allocation5] ss:$0 sm:$0xff] }
0x178c   :  { %v2987_v8 = vadd.f32 %v2981_v57, %v2933_v45  ;;  %v4237_v18 = vpop.f32.mrb[79].mxu0  ;;  %v4242_v21 = vpop.f32.mrb[69].mxu1 }
0x178d   :  { %v2984_v25 = vpop.f32.mrb[70].mxu1 }
0x178e   :  { %v4243_v30 = vpop.f32.mrb[71].mxu1 }
0x1791   :  { %v3035_v16 = vpop.f32.mrb[80].mxu0 }
0x1792   :  { %v3041_v15 = vadd.f32 %v3035_v16, %v2987_v8  ;;  %v4248_v22 = vpop.f32.mrb[81].mxu0 }
0x1793   :  { %v3038_v24 = vpop.f32.mrb[82].mxu0  ;;  %v3089_v26 = vpop.f32.mrb[72].mxu1  ;;  %v4386_v22 = vld [vmem:[%s5365_s13 + $0x8] sm:$0xff]  }
0x1794   :  { %v3095_v53 = vadd.f32 %v3089_v26, %v3041_v15  ;;  %v4249_v29 = vpop.f32.mrb[83].mxu0  ;;  %v4254_v31 = vpop.f32.mrb[73].mxu1  ;;  %v4385_v15 = vld [vmem:[%s5365_s13] sm:$0xff]  }
0x1795   :  { %v3092_v33 = vpop.f32.mrb[74].mxu1  ;;  %4325 = vmatpush3.bf16.msra.mxu1 %v4385_v15  ;;  %v3882_v24 = vld [vmem:[%s5364_s12] ss:$0 sm:$0xff] }
0x1796   :  { %v4255_v49 = vpop.f32.mrb[75].mxu1  ;;  %4326 = vmatprep.subr.bf16.mxu1 %v4571_v1 }
0x1799   :  { %v3143_v35 = vpop.f32.mrb[84].mxu0  ;;  %4327 = vmatpush3.bf16.msra.mxu1 %v4386_v22 }
0x179a   :  { %v3149_v32 = vadd.f32 %v3143_v35, %v3095_v53  ;;  %v4260_v54 = vpop.f32.mrb[85].mxu0 }
0x179b   :  { %v3146_v34 = vpop.f32.mrb[86].mxu0  ;;  %v3197_v37 = vpop.f32.mrb[76].mxu1 }
0x179c   :  { %v3203_v39 = vadd.f32 %v3197_v37, %v3149_v32  ;;  %v4261_v41 = vpop.f32.mrb[87].mxu0  ;;  %v4266_v42 = vpop.f32.mrb[77].mxu1  ;;  %v3886_v32 = vld [vmem:[#allocation2] ss:$0 sm:$0xff] }
0x179d   :  { %v3200_v43 = vpop.f32.mrb[78].mxu1 }
0x179e   :  { %v4267_v44 = vpop.f32.mrb[79].mxu1 }
0x17a1   :  { %v3252_v46 = vpop.f32.mrb[88].mxu0 }
0x17a2   :  { %v3258_v47 = vadd.f32 %v3252_v46, %v3203_v39  ;;  %v4272_v48 = vpop.f32.mrb[89].mxu0 }
0x17a3   :  { %v3255_v50 = vpop.f32.mrb[90].mxu0  ;;  %v3305_v13 = vpop.f32.mrb[80].mxu1 }
0x17a4   :  { %v3311_v51 = vadd.f32 %v3305_v13, %v3258_v47  ;;  %v4273_v60 = vpop.f32.mrb[91].mxu0  ;;  %v4278_v14 = vpop.f32.mrb[81].mxu1 }
0x17a5   :  { %v3308_v55 = vpop.f32.mrb[82].mxu1 }
0x17a6   :  { %v4279_v63 = vpop.f32.mrb[83].mxu1 }
0x17a9   :  { %v3359_v61 = vpop.f32.mrb[92].mxu0 }
0x17aa   :  { %v3365_v2 = vadd.f32 %v3359_v61, %v3311_v51  ;;  %v4284_v3 = vpop.f32.mrb[93].mxu0 }
0x17ab   :  { %v3362_v28 = vpop.f32.mrb[94].mxu0  ;;  %v3413_v52 = vpop.f32.mrb[84].mxu1 }
0x17ac   :  { %v3419_v10 = vadd.f32 %v3413_v52, %v3365_v2  ;;  %v4285_v4 = vpop.f32.mrb[95].mxu0  ;;  %v4290_v5 = vpop.f32.mrb[85].mxu1 }
0x17ad   :  { %v3416_v59 = vpop.f32.mrb[86].mxu1 }
0x17ae   :  { %v4291_v7 = vpop.f32.mrb[87].mxu1 }
0x17b1   :  { %v3467_v62 = vpop.f32.mrb[96].mxu0 }
0x17b2   :  { %v3473_v9 = vadd.f32 %v3467_v62, %v3419_v10  ;;  %v4296_v56 = vpop.f32.mrb[97].mxu0 }
0x17b3   :  { %v3470_v17 = vpop.f32.mrb[98].mxu0  ;;  %v3521_v58 = vpop.f32.mrb[88].mxu1 }
0x17b4   :  { %v3527_v19 = vadd.f32 %v3521_v58, %v3473_v9  ;;  %v4297_v23 = vpop.f32.mrb[99].mxu0  ;;  %v4302_v0 = vpop.f32.mrb[89].mxu1 }
0x17b5   :  { %v3524_v27 = vpop.f32.mrb[90].mxu1 }
0x17b6   :  { %v4303_v20 = vpop.f32.mrb[91].mxu1 }
0x17b9   :  { %v3575_v36 = vpop.f32.mrb[100].mxu0 }
0x17ba   :  { %v3581_v38 = vadd.f32 %v3575_v36, %v3527_v19  ;;  %v4308_v40 = vpop.f32.mrb[101].mxu0 }
0x17bb   :  { %v3578_v12 = vpop.f32.mrb[102].mxu0  ;;  %v3629_v45 = vpop.f32.mrb[92].mxu1 }
0x17bc   :  { %v3635_v11 = vadd.f32 %v3629_v45, %v3581_v38  ;;  %v4309_v57 = vpop.f32.mrb[103].mxu0  ;;  %v4314_v8 = vpop.f32.mrb[93].mxu1 }
0x17bd   :  { %v3632_v18 = vpop.f32.mrb[94].mxu1 }
0x17be   :  { %v3643_v21 = vadd.f32 %v3881_v6, %v3635_v11  ;;  %v4315_v25 = vpop.f32.mrb[95].mxu1 }
0x17c0   :  { %v3644_v30 = vmax.f32 %v3643_v21, 0.0 }
0x17c2   :  { %v3645_v16 = vpack.c.bf16 %v3644_v30, %v3644_v30 }
0x17c4   :  { %4321 = vmatmul.mubr.msk.bf16.vlgmr.msra.gmra.mrb[104].mxu0 %vm3669_vm13, %v3645_v16 }
0x1897   :  { %v3707_v26 = vpop.f32.mrb[104].mxu0 }
0x1898   :  { %v3708_v53 = vadd.f32 %v3882_v24, %v3707_v26  ;;  %v4322_v29 = vpop.f32.mrb[105].mxu0 }
0x1899   :  { %v3710_v31 = vpop.f32.mrb[106].mxu0 }
0x189a   :  { %v3713_v33 = vmax.f32 %v3708_v53, 0.0  ;;  %v4323_v49 = vpop.f32.mrb[107].mxu0 }
0x189c   :  { %v3714_v35 = vpack.c.bf16 %v3713_v33, %v3713_v33 }
0x189e   :  { %4329 = vmatmul.mubr.msk.bf16.vlgmr.msra.gmra.mrb[96].mxu1 %vm3669_vm13, %v3714_v35 }
0x1971   :  { %v3775_v54 = vpop.f32.mrb[96].mxu1 }
0x1972   :  { %v3776_v34 = vadd.f32 %v3886_v32, %v3775_v54  ;;  %v4330_v37 = vpop.f32.mrb[97].mxu1 }
0x1973   :  { %v3778_v39 = vpop.f32.mrb[98].mxu1 }
0x1974   :  { %v3781_v1 = vsub.f32 0.0, %v3776_v34  ;;  %v4331_v41 = vpop.f32.mrb[99].mxu1 }
0x1976   :  { %v3782_v42 = vmul.f32 1.442695, %v3781_v1 }
0x1978   :  { %4515 = vpow2.f32 %v3782_v42 }
0x1982   :  { %v4516_v43 = vpop.eup %4515 }
0x1983   :  { %v3784_v44 = vadd.f32 1.0, %v4516_v43 }
0x1985   :  { %4517 = vrcp.f32 %v3784_v44 }
0x198f   :  { %v4518_v46 = vpop.eup %4517 }
0x1990   :  { %3788 = vst.msk [vmem:[%s5367_s15] sm:$0x3] %vm3787_vm14, %v4518_v46 }
0x1991   :  { %3793 = vsyncpa [#allocation4], 1 }
0x1992   :  { %3794 = vsyncpa [#allocation6], 1 }

</bundles_post_ra>
